<compile_context>
chip_gen: v6e
topology: v6e:2x2x1
jax: 0.10.0
libtpu: 0.0.40
codegen_flags: <defaults>
</compile_context>

<pallas_src>
import math
from functools import partial

import jax
import jax.numpy as jnp
from jax.experimental import pallas as pl
from jax.experimental.pallas import tpu as pltpu


# ---------------------------------------------------------------------------
# small math helpers (shared by kernel and pure-JAX reference)
# ---------------------------------------------------------------------------
def _layer_norm(y, gamma, beta, eps):
    mean = jnp.mean(y, axis=-1, keepdims=True)
    yc = y - mean
    var = jnp.mean(yc * yc, axis=-1, keepdims=True)
    return yc * jax.lax.rsqrt(var + eps) * gamma + beta


def _gelu_new(x):
    # tanh-approximate gelu ("gelu_new"), ALBERT's default hidden_act.
    c = math.sqrt(2.0 / math.pi)
    return 0.5 * x * (1.0 + jnp.tanh(c * (x + 0.044715 * x * x * x)))


# ---------------------------------------------------------------------------
# fused kernel: embedding mapping (step 0) + all ALBERT layer steps
# ---------------------------------------------------------------------------
def _fused_albert_kernel(x_ref, we_ref, be_ref,
                         wqkv_ref, bqkv_ref, wd_ref, bd_ref,
                         ln1g_ref, ln1b_ref, wf1_ref, bf1_ref,
                         wf2_ref, bf2_ref, ln2g_ref, ln2b_ref,
                         o_ref, h_ref,
                         *, num_heads, head_dim, eps, q_tile):
    t = pl.program_id(1)          # layer-step axis ("arbitrary", in order)

    # ---- step 0: fused embedding_hidden_mapping_in (E -> H) into scratch ----
    @pl.when(t == 0)
    def _():
        x_emb = x_ref[...].astype(jnp.bfloat16)                  # (S, E)
        h_ref[...] = (jnp.dot(x_emb, we_ref[...],
                              preferred_element_type=jnp.float32)
                      + be_ref[...])

    x = h_ref[...]                                               # (S, H) f32
    S, H = x.shape
    x_bf = x.astype(jnp.bfloat16)

    # ---- fused QKV projection: one MXU op, bf16 operands, f32 accumulation ----
    qkv = (jnp.dot(x_bf, wqkv_ref[...], preferred_element_type=jnp.float32)
           + bqkv_ref[...])                                      # (S, 3H) f32

    def to_heads(t2d):
        # cast BEFORE the relayout: halves the bytes moved by the transpose
        return (t2d.astype(jnp.bfloat16)
                .reshape(S, num_heads, head_dim).transpose(1, 0, 2))

    qh = to_heads(qkv[:, 0 * H:1 * H])                           # (nH, S, d) bf16
    kh = to_heads(qkv[:, 1 * H:2 * H])
    vh = to_heads(qkv[:, 2 * H:3 * H])

    # ---- scaled dot-product attention over static q-tiles ----
    inv_sqrt_d = 1.0 / math.sqrt(head_dim)
    n_q_tiles = S // q_tile
    ctx_tiles = []
    for qi in range(n_q_tiles):                                  # static unroll
        q_blk = qh[:, qi * q_tile:(qi + 1) * q_tile, :]
        scores = jnp.einsum('hqd,hkd->hqk', q_blk, kh,
                            preferred_element_type=jnp.float32) * inv_sqrt_d
        scores = scores - jnp.max(scores, axis=-1, keepdims=True)
        p = jnp.exp(scores)                                      # f32 (VPU/EUP)
        p = p * pl.reciprocal(jnp.sum(p, axis=-1, keepdims=True), approx=True)
        # q-major output: no explicit (nH,S,d)->(S,nH,d) transpose afterwards
        ctx_tiles.append(jnp.einsum('hqk,hkd->qhd', p.astype(jnp.bfloat16), vh,
                                    preferred_element_type=jnp.float32))
    ctx = ctx_tiles[0] if n_q_tiles == 1 else jnp.concatenate(ctx_tiles, axis=0)
    ctx = ctx.reshape(S, H)       # matches torch context.transpose(2,1).flatten(2)

    # ---- attention output projection + residual + LayerNorm (f32) ----
    proj = (jnp.dot(ctx.astype(jnp.bfloat16), wd_ref[...],
                    preferred_element_type=jnp.float32) + bd_ref[...])
    attn_out = _layer_norm(x + proj, ln1g_ref[...], ln1b_ref[...], eps)

    # ---- FFN (gelu_new) + residual + full-layer LayerNorm (f32) ----
    h1 = (jnp.dot(attn_out.astype(jnp.bfloat16), wf1_ref[...],
                  preferred_element_type=jnp.float32) + bf1_ref[...])
    h1 = _gelu_new(h1)
    h2 = (jnp.dot(h1.astype(jnp.bfloat16), wf2_ref[...],
                  preferred_element_type=jnp.float32) + bf2_ref[...])
    out = _layer_norm(h2 + attn_out, ln2g_ref[...], ln2b_ref[...], eps)

    h_ref[...] = out              # activation stays resident in VMEM across layers

    @pl.when(t == pl.num_programs(1) - 1)
    def _():
        o_ref[0] = out.astype(o_ref.dtype)


# ---------------------------------------------------------------------------
# wrappers
# ---------------------------------------------------------------------------
def _vmem_limit_bytes(working_set_bytes):
    """Generation-aware VMEM limit: derived from the device, not hard-coded."""
    try:
        cap = int(pltpu.get_tpu_info().vmem_capacity_bytes)  # 128 MiB v5e/v6e, 64 MiB v7x
    except Exception:
        cap = 64 << 20                                       # conservative default
    ceiling = max(cap - (12 << 20), 16 << 20)                # headroom for Mosaic scratch
    est = int(working_set_bytes * 1.5) + (4 << 20)           # spill / pipeline headroom
    return int(min(max(est, 16 << 20), ceiling))


def _param_index_fn(num_hidden_layers, num_hidden_groups, inner_group_num,
                    num_param_sets):
    """Map global layer-step t -> index into the stacked per-group parameters."""
    if num_param_sets == 1:
        return lambda t: 0                       # constant -> truly grid-invariant
    def fn(t):
        i = t // inner_group_num                 # outer layer index
        j = t % inner_group_num                  # inner layer index within the group
        # mirrors torch: group_idx = int(i / (num_hidden_layers / num_hidden_groups))
        g = (i * num_hidden_groups) // num_hidden_layers
        return g * inner_group_num + j
    return fn


def _albert_transformer_impl(x, params, *, num_heads, eps, num_hidden_layers,
                             num_hidden_groups, inner_group_num, q_tile,
                             single_buffer_invariants):
    B, S, E = x.shape
    w_e, b_e = params['embed']
    H = w_e.shape[1]
    head_dim = H // num_heads
    inter = params['w_ffn'].shape[-1]
    P = params['w_qkv'].shape[0]                 # distinct (group, inner) param sets
    T = num_hidden_layers * inner_group_num      # total layer applications

    q_tile = min(q_tile, S)
    if S % q_tile != 0:
        q_tile = S                               # single-tile fallback

    pidx = _param_index_fn(num_hidden_layers, num_hidden_groups,
                           inner_group_num, P)

    # single-buffer blocks whose index_map never changes (halves their VMEM)
    inv_mode = pl.Buffered(1) if single_buffer_invariants else None
    layer_mode = inv_mode if P == 1 else None    # ALBERT weight sharing: invariant

    def _spec(shape, index_map, mode):
        if mode is None:
            return pl.BlockSpec(shape, index_map)
        return pl.BlockSpec(shape, index_map, pipeline_mode=mode)

    def _inv2(r, c, mode):                       # grid-invariant 2-D param block
        return _spec((r, c), lambda b, t: (0, 0), mode)

    def _layer3(r, c, mode):                     # stacked (P, r, c) param block
        return _spec((None, r, c), lambda b, t: (pidx(t), 0, 0), mode)

    in_specs = [
        pl.BlockSpec((None, S, E), lambda b, t: (b, 0, 0)),       # x (read at t==0)
        _inv2(E, H, inv_mode), _inv2(1, H, inv_mode),             # embed mapping
        _layer3(H, 3 * H, layer_mode), _layer3(1, 3 * H, layer_mode),   # fused qkv
        _layer3(H, H, layer_mode), _layer3(1, H, layer_mode),           # dense
        _layer3(1, H, layer_mode), _layer3(1, H, layer_mode),           # LN1 g/b
        _layer3(H, inter, layer_mode), _layer3(1, inter, layer_mode),   # ffn
        _layer3(inter, H, layer_mode), _layer3(1, H, layer_mode),       # ffn_output
        _layer3(1, H, layer_mode), _layer3(1, H, layer_mode),           # LN2 g/b
    ]

    # ---- VMEM budget estimate (weights + resident activation + live f32 temps) ----
    def nbytes(a):
        return int(a.size) * a.dtype.itemsize
    layer_keys = ('w_qkv', 'b_qkv', 'w_dense', 'b_dense', 'ln1_g', 'ln1_b',
                  'w_ffn', 'b_ffn', 'w_ffn_out', 'b_ffn_out', 'ln2_g', 'ln2_b')
    per_layer = sum(nbytes(params[k]) // P for k in layer_keys)
    wbufs = 1 if (P == 1 and single_buffer_invariants) else 2
    ebufs = 1 if single_buffer_invariants else 2
    weight_bytes = wbufs * per_layer + ebufs * (nbytes(w_e) + nbytes(b_e))
    act_bytes = (2 * S * E * 4                  # input block (double buffered)
                 + 2 * S * H * 4                # output block
                 + S * H * 4                    # resident activation scratch
                 + S * (3 * H + inter + 6 * H) * 4   # live f32 intermediates
                 + num_heads * q_tile * S * 8)  # scores + probs per q-tile
    vmem_limit = _vmem_limit_bytes(weight_bytes + act_bytes)

    fused = pl.pallas_call(
        partial(_fused_albert_kernel, num_heads=num_heads, head_dim=head_dim,
                eps=eps, q_tile=q_tile),
        out_shape=jax.ShapeDtypeStruct((B, S, H), jnp.float32),
        grid_spec=pltpu.PrefetchScalarGridSpec(
            num_scalar_prefetch=0,
            grid=(B, T),
            in_specs=in_specs,
            out_specs=pl.BlockSpec((1, S, H), lambda b, t: (b, 0, 0)),
            scratch_shapes=[pltpu.VMEM((S, H), jnp.float32)]),
        compiler_params=pltpu.CompilerParams(
            # B is independent work (megacore-parallel); the layer axis carries
            # the resident activation, so it must stay "arbitrary"/in-order.
            # TODO(synk): on v7x at small B, sharding B duplicates weight DMA per
            # core; acceptable given 3.2 TB/s HBM and single-shot weight fetch.
            dimension_semantics=("parallel", "arbitrary"),
            vmem_limit_bytes=vmem_limit),
    )
    out = fused(x, w_e, b_e,
                params['w_qkv'], params['b_qkv'],
                params['w_dense'], params['b_dense'],
                params['ln1_g'], params['ln1_b'],
                params['w_ffn'], params['b_ffn'],
                params['w_ffn_out'], params['b_ffn_out'],
                params['ln2_g'], params['ln2_b'])
    return jax.block_until_ready(out)


def albert_transformer(x, params, *, num_heads, eps, num_hidden_layers,
                       num_hidden_groups, inner_group_num=1, q_tile=256):
    kwargs = dict(num_heads=num_heads, eps=eps,
                  num_hidden_layers=num_hidden_layers,
                  num_hidden_groups=num_hidden_groups,
                  inner_group_num=inner_group_num, q_tile=q_tile)
    try:
        return _albert_transformer_impl(x, params,
                                        single_buffer_invariants=True, **kwargs)
    except Exception:
        # pl.Buffered(1) (single-buffered invariant weights) unsupported on this
        # jax/Mosaic version -> fall back to default double buffering.
        return _albert_transformer_impl(x, params,
                                        single_buffer_invariants=False, **kwargs)


# ---------------------------------------------------------------------------
# pure-JAX f32 reference (matches the PyTorch forward in eval mode)
# ---------------------------------------------------------------------------
def _ref_layer(x, lp, *, num_heads, eps):
    B, S, H = x.shape
    d = H // num_heads

    def split_heads(t):
        return t.reshape(B, S, num_heads, d).transpose(0, 2, 1, 3)

    q = split_heads(x @ lp['wq'] + lp['bq'])
    k = split_heads(x @ lp['wk'] + lp['bk'])
    v = split_heads(x @ lp['wv'] + lp['bv'])
    scores = jnp.einsum('bhqd,bhkd->bhqk', q, k) / math.sqrt(d)
    probs = jax.nn.softmax(scores, axis=-1)
    ctx = jnp.einsum('bhqk,bhkd->bhqd', probs, v)
    ctx = ctx.transpose(0, 2, 1, 3).reshape(B, S, H)
    proj = ctx @ lp['wd'] + lp['bd']
    attn_out = _layer_norm(x + proj, lp['ln1_g'], lp['ln1_b'], eps)
    h1 = _gelu_new(attn_out @ lp['wf1'] + lp['bf1'])
    h2 = h1 @ lp['wf2'] + lp['bf2']
    return _layer_norm(h2 + attn_out, lp['ln2_g'], lp['ln2_b'], eps)


def reference_albert_transformer(x, ref_params, *, num_heads, eps,
                                 num_hidden_layers, num_hidden_groups):
    w_e, b_e = ref_params['embed']
    h = x @ w_e + b_e
    for i in range(num_hidden_layers):
        group_idx = int(i / (num_hidden_layers / num_hidden_groups))
        for lp in ref_params['groups'][group_idx]:
            h = _ref_layer(h, lp, num_heads=num_heads, eps=eps)
    return h


# ---------------------------------------------------------------------------
# test
# ---------------------------------------------------------------------------
if __name__ == "__main__":
    # Small ALBERT-like config: embedding=16, hidden=32, heads=4, ffn=64,
    # 2 hidden layers sharing 1 group with 1 inner layer (ALBERT weight sharing).
    B, S = 2, 8
    E, H, NH, INTER = 16, 32, 4, 64
    NUM_LAYERS, NUM_GROUPS, INNER_GROUP = 2, 1, 1
    EPS = 1e-12

    key = jax.random.PRNGKey(0)
    ks = jax.random.split(key, 16)
    scale = 0.05

    x = jax.random.normal(ks[0], (B, S, E), jnp.float32)

    w_e = scale * jax.random.normal(ks[1], (E, H), jnp.float32)
    b_e = scale * jax.random.normal(ks[2], (1, H), jnp.float32)

    wq = scale * jax.random.normal(ks[3], (H, H), jnp.float32)
    wk = scale * jax.random.normal(ks[4], (H, H), jnp.float32)
    wv = scale * jax.random.normal(ks[5], (H, H), jnp.float32)
    wd = scale * jax.random.normal(ks[6], (H, H), jnp.float32)
    bq = scale * jax.random.normal(ks[7], (1, H), jnp.float32)
    bk = scale * jax.random.normal(ks[8], (1, H), jnp.float32)
    bv = scale * jax.random.normal(ks[9], (1, H), jnp.float32)
    bd = scale * jax.random.normal(ks[10], (1, H), jnp.float32)
    wf1 = scale * jax.random.normal(ks[11], (H, INTER), jnp.float32)
    bf1 = scale * jax.random.normal(ks[12], (1, INTER), jnp.float32)
    wf2 = scale * jax.random.normal(ks[13], (INTER, H), jnp.float32)
    bf2 = scale * jax.random.normal(ks[14], (1, H), jnp.float32)
    ln1_g = jnp.ones((1, H), jnp.float32); ln1_b = jnp.zeros((1, H), jnp.float32)
    ln2_g = jnp.ones((1, H), jnp.float32); ln2_b = jnp.zeros((1, H), jnp.float32)

    # Kernel params: matmul weights in bf16 (f32 accumulation in-kernel), fused
    # QKV, and every distinct (group, inner-layer) parameter set stacked along a
    # leading axis of size P = num_hidden_groups * inner_group_num so the fused
    # kernel can index them per layer step (P == 1 here -> grid-invariant).
    kernel_params = {
        'embed': (w_e.astype(jnp.bfloat16), b_e),
        'w_qkv': jnp.concatenate([wq, wk, wv], axis=1).astype(jnp.bfloat16)[None],
        'b_qkv': jnp.concatenate([bq, bk, bv], axis=1)[None],
        'w_dense': wd.astype(jnp.bfloat16)[None], 'b_dense': bd[None],
        'ln1_g': ln1_g[None], 'ln1_b': ln1_b[None],
        'w_ffn': wf1.astype(jnp.bfloat16)[None], 'b_ffn': bf1[None],
        'w_ffn_out': wf2.astype(jnp.bfloat16)[None], 'b_ffn_out': bf2[None],
        'ln2_g': ln2_g[None], 'ln2_b': ln2_b[None],
    }

    ref_layer_params = {
        'wq': wq, 'bq': bq, 'wk': wk, 'bk': bk, 'wv': wv, 'bv': bv,
        'wd': wd, 'bd': bd, 'ln1_g': ln1_g, 'ln1_b': ln1_b,
        'wf1': wf1, 'bf1': bf1, 'wf2': wf2, 'bf2': bf2,
        'ln2_g': ln2_g, 'ln2_b': ln2_b,
    }
    ref_params = {
        'embed': (w_e, b_e),
        'groups': [[ref_layer_params] * INNER_GROUP] * NUM_GROUPS,
    }

    out = albert_transformer(x, kernel_params, num_heads=NH, eps=EPS,
                             num_hidden_layers=NUM_LAYERS,
                             num_hidden_groups=NUM_GROUPS,
                             inner_group_num=INNER_GROUP)
    out = jax.block_until_ready(out)

    ref = reference_albert_transformer(x, ref_params, num_heads=NH, eps=EPS,
                                       num_hidden_layers=NUM_LAYERS,
                                       num_hidden_groups=NUM_GROUPS)

    assert out.shape == (B, S, H)
    max_err = float(jnp.max(jnp.abs(out - ref)))
    # bf16 matmul operands (f32 accumulation) + approx reciprocal => loose-ish tol
    assert max_err < 2e-2, f"mismatch vs pure-JAX reference: {max_err}"

    print("KERNEL_OK")
</pallas_src>

<mosaic_0001>
module attributes {stable_mosaic.version = 11 : i64} {
  func.func @_fused_albert_kernel(%arg0: i32, %arg1: i32, %arg2: memref<1x8x16xf32, #tpu.memory_space<vmem>>, %arg3: memref<16x32xbf16, #tpu.memory_space<vmem>>, %arg4: memref<1x32xf32, #tpu.memory_space<vmem>>, %arg5: memref<1x32x96xbf16, #tpu.memory_space<vmem>>, %arg6: memref<1x1x96xf32, #tpu.memory_space<vmem>>, %arg7: memref<1x32x32xbf16, #tpu.memory_space<vmem>>, %arg8: memref<1x1x32xf32, #tpu.memory_space<vmem>>, %arg9: memref<1x1x32xf32, #tpu.memory_space<vmem>>, %arg10: memref<1x1x32xf32, #tpu.memory_space<vmem>>, %arg11: memref<1x32x64xbf16, #tpu.memory_space<vmem>>, %arg12: memref<1x1x64xf32, #tpu.memory_space<vmem>>, %arg13: memref<1x64x32xbf16, #tpu.memory_space<vmem>>, %arg14: memref<1x1x32xf32, #tpu.memory_space<vmem>>, %arg15: memref<1x1x32xf32, #tpu.memory_space<vmem>>, %arg16: memref<1x1x32xf32, #tpu.memory_space<vmem>>, %arg17: memref<1x8x32xf32, #tpu.memory_space<vmem>>, %arg18: memref<8x32xf32, #tpu.memory_space<vmem>>) attributes {dimension_semantics = [#tpu.dimension_semantics<parallel>, #tpu.dimension_semantics<arbitrary>], iteration_bounds = array<i64: 2, 2>, scalar_prefetch = 0 : i64, scratch_operands = 1 : i64, tpu.core_type = #tpu.core_type<tc>, window_params = [{transform_indices = @transform_0, window_bounds = array<i64: 1, 8, 16>}, {pipeline_mode = #tpu.pipeline_mode<synchronous>, transform_indices = @transform_1, window_bounds = array<i64: 16, 32>}, {pipeline_mode = #tpu.pipeline_mode<synchronous>, transform_indices = @transform_2, window_bounds = array<i64: 1, 32>}, {pipeline_mode = #tpu.pipeline_mode<synchronous>, transform_indices = @transform_3, window_bounds = array<i64: 1, 32, 96>}, {pipeline_mode = #tpu.pipeline_mode<synchronous>, transform_indices = @transform_4, window_bounds = array<i64: 1, 1, 96>}, {pipeline_mode = #tpu.pipeline_mode<synchronous>, transform_indices = @transform_5, window_bounds = array<i64: 1, 32, 32>}, {pipeline_mode = #tpu.pipeline_mode<synchronous>, transform_indices = @transform_6, window_bounds = array<i64: 1, 1, 32>}, {pipeline_mode = #tpu.pipeline_mode<synchronous>, transform_indices = @transform_7, window_bounds = array<i64: 1, 1, 32>}, {pipeline_mode = #tpu.pipeline_mode<synchronous>, transform_indices = @transform_8, window_bounds = array<i64: 1, 1, 32>}, {pipeline_mode = #tpu.pipeline_mode<synchronous>, transform_indices = @transform_9, window_bounds = array<i64: 1, 32, 64>}, {pipeline_mode = #tpu.pipeline_mode<synchronous>, transform_indices = @transform_10, window_bounds = array<i64: 1, 1, 64>}, {pipeline_mode = #tpu.pipeline_mode<synchronous>, transform_indices = @transform_11, window_bounds = array<i64: 1, 64, 32>}, {pipeline_mode = #tpu.pipeline_mode<synchronous>, transform_indices = @transform_12, window_bounds = array<i64: 1, 1, 32>}, {pipeline_mode = #tpu.pipeline_mode<synchronous>, transform_indices = @transform_13, window_bounds = array<i64: 1, 1, 32>}, {pipeline_mode = #tpu.pipeline_mode<synchronous>, transform_indices = @transform_14, window_bounds = array<i64: 1, 1, 32>}, {transform_indices = @transform_15, window_bounds = array<i64: 1, 8, 32>}]} {
    %c0_i32 = arith.constant 0 : i32
    %0 = arith.cmpi eq, %arg1, %c0_i32 : i32
    %1 = arith.extui %0 : i1 to i32
    %c0_i32_0 = arith.constant 0 : i32
    %2 = arith.cmpi ne, %1, %c0_i32_0 : i32
    scf.if %2 {
      %c0_63 = arith.constant 0 : index
      %c0_64 = arith.constant 0 : index
      %c0_65 = arith.constant 0 : index
      %132 = vector.load %arg2[%c0_63, %c0_64, %c0_65] : memref<1x8x16xf32, #tpu.memory_space<vmem>>, vector<1x8x16xf32>
      %133 = vector.shape_cast %132 : vector<1x8x16xf32> to vector<8x16xf32>
      %134 = arith.truncf %133 : vector<8x16xf32> to vector<8x16xbf16>
      %c0_66 = arith.constant 0 : index
      %c0_67 = arith.constant 0 : index
      %135 = vector.load %arg3[%c0_66, %c0_67] : memref<16x32xbf16, #tpu.memory_space<vmem>>, vector<16x32xbf16>
      %cst_68 = arith.constant dense<0.000000e+00> : vector<8x32xf32>
      %136 = tpu.matmul %134, %135, %cst_68 {dimension_numbers = #tpu.dot_dimension_numbers<[1], [0], [0], [1], [0, 0, 1, 1], [], []>} : vector<8x16xbf16>, vector<16x32xbf16>, vector<8x32xf32> -> vector<8x32xf32>
      %c0_69 = arith.constant 0 : index
      %c0_70 = arith.constant 0 : index
      %137 = vector.load %arg4[%c0_69, %c0_70] : memref<1x32xf32, #tpu.memory_space<vmem>>, vector<1x32xf32>
      %138 = vector.broadcast %137 : vector<1x32xf32> to vector<8x32xf32>
      %139 = arith.addf %136, %138 : vector<8x32xf32>
      %c0_71 = arith.constant 0 : index
      %c0_72 = arith.constant 0 : index
      %140 = vector.load %arg18[%c0_71, %c0_72] : memref<8x32xf32, #tpu.memory_space<vmem>>, vector<8x32xf32>
      tpu.vector_store %arg18[%c0_71, %c0_72], %139 {strides = array<i32>} : memref<8x32xf32, #tpu.memory_space<vmem>>, vector<8x32xf32>,
    } else {
    }
    %c0 = arith.constant 0 : index
    %c0_1 = arith.constant 0 : index
    %3 = vector.load %arg18[%c0, %c0_1] : memref<8x32xf32, #tpu.memory_space<vmem>>, vector<8x32xf32>
    %4 = arith.truncf %3 : vector<8x32xf32> to vector<8x32xbf16>
    %c0_2 = arith.constant 0 : index
    %c0_3 = arith.constant 0 : index
    %c0_4 = arith.constant 0 : index
    %5 = vector.load %arg5[%c0_2, %c0_3, %c0_4] : memref<1x32x96xbf16, #tpu.memory_space<vmem>>, vector<1x32x96xbf16>
    %6 = vector.shape_cast %5 : vector<1x32x96xbf16> to vector<32x96xbf16>
    %cst = arith.constant dense<0.000000e+00> : vector<8x96xf32>
    %7 = tpu.matmul %4, %6, %cst {dimension_numbers = #tpu.dot_dimension_numbers<[1], [0], [0], [1], [0, 0, 1, 1], [], []>} : vector<8x32xbf16>, vector<32x96xbf16>, vector<8x96xf32> -> vector<8x96xf32>
    %c0_5 = arith.constant 0 : index
    %c0_6 = arith.constant 0 : index
    %c0_7 = arith.constant 0 : index
    %8 = vector.load %arg6[%c0_5, %c0_6, %c0_7] : memref<1x1x96xf32, #tpu.memory_space<vmem>>, vector<1x1x96xf32>
    %9 = vector.shape_cast %8 : vector<1x1x96xf32> to vector<1x96xf32>
    %10 = vector.broadcast %9 : vector<1x96xf32> to vector<8x96xf32>
    %11 = arith.addf %7, %10 : vector<8x96xf32>
    %12 = vector.extract_strided_slice %11 {offsets = [0, 0], sizes = [8, 32], strides = [1, 1]} : vector<8x96xf32> to vector<8x32xf32>
    %13 = arith.truncf %12 : vector<8x32xf32> to vector<8x32xbf16>
    %14 = vector.shape_cast %13 : vector<8x32xbf16> to vector<8x4x8xbf16>
    %15 = tpu.transpose %14, [1, 0, 2] : vector<8x4x8xbf16> -> vector<4x8x8xbf16>
    %16 = vector.extract_strided_slice %11 {offsets = [0, 32], sizes = [8, 32], strides = [1, 1]} : vector<8x96xf32> to vector<8x32xf32>
    %17 = arith.truncf %16 : vector<8x32xf32> to vector<8x32xbf16>
    %18 = vector.shape_cast %17 : vector<8x32xbf16> to vector<8x4x8xbf16>
    %19 = tpu.transpose %18, [1, 0, 2] : vector<8x4x8xbf16> -> vector<4x8x8xbf16>
    %20 = vector.extract_strided_slice %11 {offsets = [0, 64], sizes = [8, 32], strides = [1, 1]} : vector<8x96xf32> to vector<8x32xf32>
    %21 = arith.truncf %20 : vector<8x32xf32> to vector<8x32xbf16>
    %22 = vector.shape_cast %21 : vector<8x32xbf16> to vector<8x4x8xbf16>
    %23 = tpu.transpose %22, [1, 0, 2] : vector<8x4x8xbf16> -> vector<4x8x8xbf16>
    "tpu.trace_start"() <{level = 10 : i32, message = "hqd,hkd->hqk"}> : () -> ()
    %cst_8 = arith.constant dense<0.000000e+00> : vector<4x8x8xf32>
    %24 = tpu.matmul %15, %19, %cst_8 {dimension_numbers = #tpu.dot_dimension_numbers<[2], [2], [1], [1], [0, 0, 0, 1, 1, 1], [0], [0]>} : vector<4x8x8xbf16>, vector<4x8x8xbf16>, vector<4x8x8xf32> -> vector<4x8x8xf32>
    "tpu.trace_stop"() : () -> ()
    %cst_9 = arith.constant 0.353553385 : f32
    %25 = vector.broadcast %cst_9 : f32 to vector<4x8x8xf32>
    %26 = arith.mulf %24, %25 : vector<4x8x8xf32>
    %cst_10 = arith.constant dense<0xFF800000> : vector<4x8xf32>
    %27 = vector.multi_reduction <maximumf>, %26, %cst_10 [2] : vector<4x8x8xf32> to vector<4x8xf32>
    %28 = vector.shape_cast %27 : vector<4x8xf32> to vector<4x8x1xf32>
    %29 = vector.broadcast %28 : vector<4x8x1xf32> to vector<4x8x8xf32>
    %30 = arith.subf %26, %29 : vector<4x8x8xf32>
    %31 = math.exp %30 : vector<4x8x8xf32>
    %cst_11 = arith.constant dense<0.000000e+00> : vector<4x8xf32>
    %32 = vector.multi_reduction <add>, %31, %cst_11 [2] : vector<4x8x8xf32> to vector<4x8xf32>
    %33 = vector.shape_cast %32 : vector<4x8xf32> to vector<4x8x1xf32>
    %34 = tpu.reciprocal %33 {approx = true} : vector<4x8x1xf32> -> vector<4x8x1xf32>
    %35 = vector.broadcast %34 : vector<4x8x1xf32> to vector<4x8x8xf32>
    %36 = arith.mulf %31, %35 : vector<4x8x8xf32>
    %37 = arith.truncf %36 : vector<4x8x8xf32> to vector<4x8x8xbf16>
    "tpu.trace_start"() <{level = 10 : i32, message = "hqk,hkd->qhd"}> : () -> ()
    %cst_12 = arith.constant dense<0.000000e+00> : vector<4x8x8xf32>
    %38 = tpu.matmul %23, %37, %cst_12 {dimension_numbers = #tpu.dot_dimension_numbers<[1], [2], [2], [1], [0, 0, 0, 2, 1, 1], [0], [0]>} : vector<4x8x8xbf16>, vector<4x8x8xbf16>, vector<4x8x8xf32> -> vector<4x8x8xf32>
    %39 = tpu.transpose %38, [2, 0, 1] : vector<4x8x8xf32> -> vector<8x4x8xf32>
    "tpu.trace_stop"() : () -> ()
    %40 = vector.shape_cast %39 : vector<8x4x8xf32> to vector<8x32xf32>
    %41 = arith.truncf %40 : vector<8x32xf32> to vector<8x32xbf16>
    %c0_13 = arith.constant 0 : index
    %c0_14 = arith.constant 0 : index
    %c0_15 = arith.constant 0 : index
    %42 = vector.load %arg7[%c0_13, %c0_14, %c0_15] : memref<1x32x32xbf16, #tpu.memory_space<vmem>>, vector<1x32x32xbf16>
    %43 = vector.shape_cast %42 : vector<1x32x32xbf16> to vector<32x32xbf16>
    %cst_16 = arith.constant dense<0.000000e+00> : vector<8x32xf32>
    %44 = tpu.matmul %41, %43, %cst_16 {dimension_numbers = #tpu.dot_dimension_numbers<[1], [0], [0], [1], [0, 0, 1, 1], [], []>} : vector<8x32xbf16>, vector<32x32xbf16>, vector<8x32xf32> -> vector<8x32xf32>
    %c0_17 = arith.constant 0 : index
    %c0_18 = arith.constant 0 : index
    %c0_19 = arith.constant 0 : index
    %45 = vector.load %arg8[%c0_17, %c0_18, %c0_19] : memref<1x1x32xf32, #tpu.memory_space<vmem>>, vector<1x1x32xf32>
    %46 = vector.shape_cast %45 : vector<1x1x32xf32> to vector<1x32xf32>
    %47 = vector.broadcast %46 : vector<1x32xf32> to vector<8x32xf32>
    %48 = arith.addf %44, %47 : vector<8x32xf32>
    %49 = arith.addf %3, %48 : vector<8x32xf32>
    %c0_20 = arith.constant 0 : index
    %c0_21 = arith.constant 0 : index
    %c0_22 = arith.constant 0 : index
    %50 = vector.load %arg9[%c0_20, %c0_21, %c0_22] : memref<1x1x32xf32, #tpu.memory_space<vmem>>, vector<1x1x32xf32>
    %51 = vector.shape_cast %50 : vector<1x1x32xf32> to vector<1x32xf32>
    %c0_23 = arith.constant 0 : index
    %c0_24 = arith.constant 0 : index
    %c0_25 = arith.constant 0 : index
    %52 = vector.load %arg10[%c0_23, %c0_24, %c0_25] : memref<1x1x32xf32, #tpu.memory_space<vmem>>, vector<1x1x32xf32>
    %53 = vector.shape_cast %52 : vector<1x1x32xf32> to vector<1x32xf32>
    %cst_26 = arith.constant dense<0.000000e+00> : vector<8xf32>
    %54 = vector.multi_reduction <add>, %49, %cst_26 [1] : vector<8x32xf32> to vector<8xf32>
    %55 = vector.shape_cast %54 : vector<8xf32> to vector<8x1xf32>
    %cst_27 = arith.constant 3.200000e+01 : f32
    %56 = vector.broadcast %cst_27 : f32 to vector<8x1xf32>
    %57 = arith.divf %55, %56 : vector<8x1xf32>
    %58 = vector.broadcast %57 : vector<8x1xf32> to vector<8x32xf32>
    %59 = arith.subf %49, %58 : vector<8x32xf32>
    %60 = arith.mulf %59, %59 : vector<8x32xf32>
    %cst_28 = arith.constant dense<0.000000e+00> : vector<8xf32>
    %61 = vector.multi_reduction <add>, %60, %cst_28 [1] : vector<8x32xf32> to vector<8xf32>
    %62 = vector.shape_cast %61 : vector<8xf32> to vector<8x1xf32>
    %cst_29 = arith.constant 3.200000e+01 : f32
    %63 = vector.broadcast %cst_29 : f32 to vector<8x1xf32>
    %64 = arith.divf %62, %63 : vector<8x1xf32>
    %cst_30 = arith.constant 9.99999996E-13 : f32
    %65 = vector.broadcast %cst_30 : f32 to vector<8x1xf32>
    %66 = arith.addf %64, %65 : vector<8x1xf32>
    %67 = math.rsqrt %66 : vector<8x1xf32>
    %68 = vector.broadcast %67 : vector<8x1xf32> to vector<8x32xf32>
    %69 = arith.mulf %59, %68 : vector<8x32xf32>
    %70 = vector.broadcast %51 : vector<1x32xf32> to vector<8x32xf32>
    %71 = arith.mulf %69, %70 : vector<8x32xf32>
    %72 = vector.broadcast %53 : vector<1x32xf32> to vector<8x32xf32>
    %73 = arith.addf %71, %72 : vector<8x32xf32>
    %74 = arith.truncf %73 : vector<8x32xf32> to vector<8x32xbf16>
    %c0_31 = arith.constant 0 : index
    %c0_32 = arith.constant 0 : index
    %c0_33 = arith.constant 0 : index
    %75 = vector.load %arg11[%c0_31, %c0_32, %c0_33] : memref<1x32x64xbf16, #tpu.memory_space<vmem>>, vector<1x32x64xbf16>
    %76 = vector.shape_cast %75 : vector<1x32x64xbf16> to vector<32x64xbf16>
    %cst_34 = arith.constant dense<0.000000e+00> : vector<8x64xf32>
    %77 = tpu.matmul %74, %76, %cst_34 {dimension_numbers = #tpu.dot_dimension_numbers<[1], [0], [0], [1], [0, 0, 1, 1], [], []>} : vector<8x32xbf16>, vector<32x64xbf16>, vector<8x64xf32> -> vector<8x64xf32>
    %c0_35 = arith.constant 0 : index
    %c0_36 = arith.constant 0 : index
    %c0_37 = arith.constant 0 : index
    %78 = vector.load %arg12[%c0_35, %c0_36, %c0_37] : memref<1x1x64xf32, #tpu.memory_space<vmem>>, vector<1x1x64xf32>
    %79 = vector.shape_cast %78 : vector<1x1x64xf32> to vector<1x64xf32>
    %80 = vector.broadcast %79 : vector<1x64xf32> to vector<8x64xf32>
    %81 = arith.addf %77, %80 : vector<8x64xf32>
    %cst_38 = arith.constant 5.000000e-01 : f32
    %82 = vector.broadcast %cst_38 : f32 to vector<8x64xf32>
    %83 = arith.mulf %82, %81 : vector<8x64xf32>
    %cst_39 = arith.constant 4.471500e-02 : f32
    %84 = vector.broadcast %cst_39 : f32 to vector<8x64xf32>
    %85 = arith.mulf %84, %81 : vector<8x64xf32>
    %86 = arith.mulf %85, %81 : vector<8x64xf32>
    %87 = arith.mulf %86, %81 : vector<8x64xf32>
    %88 = arith.addf %81, %87 : vector<8x64xf32>
    %cst_40 = arith.constant 0.797884583 : f32
    %89 = vector.broadcast %cst_40 : f32 to vector<8x64xf32>
    %90 = arith.mulf %89, %88 : vector<8x64xf32>
    %91 = math.tanh %90 : vector<8x64xf32>
    %cst_41 = arith.constant 1.000000e+00 : f32
    %92 = vector.broadcast %cst_41 : f32 to vector<8x64xf32>
    %93 = arith.addf %92, %91 : vector<8x64xf32>
    %94 = arith.mulf %83, %93 : vector<8x64xf32>
    %95 = arith.truncf %94 : vector<8x64xf32> to vector<8x64xbf16>
    %c0_42 = arith.constant 0 : index
    %c0_43 = arith.constant 0 : index
    %c0_44 = arith.constant 0 : index
    %96 = vector.load %arg13[%c0_42, %c0_43, %c0_44] : memref<1x64x32xbf16, #tpu.memory_space<vmem>>, vector<1x64x32xbf16>
    %97 = vector.shape_cast %96 : vector<1x64x32xbf16> to vector<64x32xbf16>
    %cst_45 = arith.constant dense<0.000000e+00> : vector<8x32xf32>
    %98 = tpu.matmul %95, %97, %cst_45 {dimension_numbers = #tpu.dot_dimension_numbers<[1], [0], [0], [1], [0, 0, 1, 1], [], []>} : vector<8x64xbf16>, vector<64x32xbf16>, vector<8x32xf32> -> vector<8x32xf32>
    %c0_46 = arith.constant 0 : index
    %c0_47 = arith.constant 0 : index
    %c0_48 = arith.constant 0 : index
    %99 = vector.load %arg14[%c0_46, %c0_47, %c0_48] : memref<1x1x32xf32, #tpu.memory_space<vmem>>, vector<1x1x32xf32>
    %100 = vector.shape_cast %99 : vector<1x1x32xf32> to vector<1x32xf32>
    %101 = vector.broadcast %100 : vector<1x32xf32> to vector<8x32xf32>
    %102 = arith.addf %98, %101 : vector<8x32xf32>
    %103 = arith.addf %102, %73 : vector<8x32xf32>
    %c0_49 = arith.constant 0 : index
    %c0_50 = arith.constant 0 : index
    %c0_51 = arith.constant 0 : index
    %104 = vector.load %arg15[%c0_49, %c0_50, %c0_51] : memref<1x1x32xf32, #tpu.memory_space<vmem>>, vector<1x1x32xf32>
    %105 = vector.shape_cast %104 : vector<1x1x32xf32> to vector<1x32xf32>
    %c0_52 = arith.constant 0 : index
    %c0_53 = arith.constant 0 : index
    %c0_54 = arith.constant 0 : index
    %106 = vector.load %arg16[%c0_52, %c0_53, %c0_54] : memref<1x1x32xf32, #tpu.memory_space<vmem>>, vector<1x1x32xf32>
    %107 = vector.shape_cast %106 : vector<1x1x32xf32> to vector<1x32xf32>
    %cst_55 = arith.constant dense<0.000000e+00> : vector<8xf32>
    %108 = vector.multi_reduction <add>, %103, %cst_55 [1] : vector<8x32xf32> to vector<8xf32>
    %109 = vector.shape_cast %108 : vector<8xf32> to vector<8x1xf32>
    %cst_56 = arith.constant 3.200000e+01 : f32
    %110 = vector.broadcast %cst_56 : f32 to vector<8x1xf32>
    %111 = arith.divf %109, %110 : vector<8x1xf32>
    %112 = vector.broadcast %111 : vector<8x1xf32> to vector<8x32xf32>
    %113 = arith.subf %103, %112 : vector<8x32xf32>
    %114 = arith.mulf %113, %113 : vector<8x32xf32>
    %cst_57 = arith.constant dense<0.000000e+00> : vector<8xf32>
    %115 = vector.multi_reduction <add>, %114, %cst_57 [1] : vector<8x32xf32> to vector<8xf32>
    %116 = vector.shape_cast %115 : vector<8xf32> to vector<8x1xf32>
    %cst_58 = arith.constant 3.200000e+01 : f32
    %117 = vector.broadcast %cst_58 : f32 to vector<8x1xf32>
    %118 = arith.divf %116, %117 : vector<8x1xf32>
    %cst_59 = arith.constant 9.99999996E-13 : f32
    %119 = vector.broadcast %cst_59 : f32 to vector<8x1xf32>
    %120 = arith.addf %118, %119 : vector<8x1xf32>
    %121 = math.rsqrt %120 : vector<8x1xf32>
    %122 = vector.broadcast %121 : vector<8x1xf32> to vector<8x32xf32>
    %123 = arith.mulf %113, %122 : vector<8x32xf32>
    %124 = vector.broadcast %105 : vector<1x32xf32> to vector<8x32xf32>
    %125 = arith.mulf %123, %124 : vector<8x32xf32>
    %126 = vector.broadcast %107 : vector<1x32xf32> to vector<8x32xf32>
    %127 = arith.addf %125, %126 : vector<8x32xf32>
    %c0_60 = arith.constant 0 : index
    %c0_61 = arith.constant 0 : index
    %128 = vector.load %arg18[%c0_60, %c0_61] : memref<8x32xf32, #tpu.memory_space<vmem>>, vector<8x32xf32>
    tpu.vector_store %arg18[%c0_60, %c0_61], %127 {strides = array<i32>} : memref<8x32xf32, #tpu.memory_space<vmem>>, vector<8x32xf32>,
    %c1_i32 = arith.constant 1 : i32
    %129 = arith.cmpi eq, %arg1, %c1_i32 : i32
    %130 = arith.extui %129 : i1 to i32
    %c0_i32_62 = arith.constant 0 : i32
    %131 = arith.cmpi ne, %130, %c0_i32_62 : i32
    scf.if %131 {
      %c0_63 = arith.constant 0 : index
      %c0_64 = arith.constant 0 : index
      %c0_65 = arith.constant 0 : index
      %132 = vector.load %arg17[%c0_63, %c0_64, %c0_65] : memref<1x8x32xf32, #tpu.memory_space<vmem>>, vector<1x8x32xf32>
      %133 = vector.shape_cast %132 : vector<1x8x32xf32> to vector<8x32xf32>
      %134 = vector.shape_cast %127 : vector<8x32xf32> to vector<1x8x32xf32>
      tpu.vector_store %arg17[%c0_63, %c0_64, %c0_65], %134 {strides = array<i32>} : memref<1x8x32xf32, #tpu.memory_space<vmem>>, vector<1x8x32xf32>,
    } else {
    }
    return
  }
  func.func @transform_0(%arg0: i32, %arg1: i32) -> (i32, i32, i32) {
    %c0_i32 = arith.constant 0 : i32
    %c0_i32_0 = arith.constant 0 : i32
    %c0_i32_1 = arith.constant 0 : i32
    return %arg0, %c0_i32, %c0_i32_0 : i32, i32, i32
  }
  func.func @transform_1(%arg0: i32, %arg1: i32) -> (i32, i32) {
    %c0_i32 = arith.constant 0 : i32
    %c0_i32_0 = arith.constant 0 : i32
    %c0_i32_1 = arith.constant 0 : i32
    return %c0_i32, %c0_i32_0 : i32, i32
  }
  func.func @transform_2(%arg0: i32, %arg1: i32) -> (i32, i32) {
    %c0_i32 = arith.constant 0 : i32
    %c0_i32_0 = arith.constant 0 : i32
    %c0_i32_1 = arith.constant 0 : i32
    return %c0_i32, %c0_i32_0 : i32, i32
  }
  func.func @transform_3(%arg0: i32, %arg1: i32) -> (i32, i32, i32) {
    %c0_i32 = arith.constant 0 : i32
    %c0_i32_0 = arith.constant 0 : i32
    %c0_i32_1 = arith.constant 0 : i32
    %c0_i32_2 = arith.constant 0 : i32
    return %c0_i32, %c0_i32_0, %c0_i32_1 : i32, i32, i32
  }
  func.func @transform_4(%arg0: i32, %arg1: i32) -> (i32, i32, i32) {
    %c0_i32 = arith.constant 0 : i32
    %c0_i32_0 = arith.constant 0 : i32
    %c0_i32_1 = arith.constant 0 : i32
    %c0_i32_2 = arith.constant 0 : i32
    return %c0_i32, %c0_i32_0, %c0_i32_1 : i32, i32, i32
  }
  func.func @transform_5(%arg0: i32, %arg1: i32) -> (i32, i32, i32) {
    %c0_i32 = arith.constant 0 : i32
    %c0_i32_0 = arith.constant 0 : i32
    %c0_i32_1 = arith.constant 0 : i32
    %c0_i32_2 = arith.constant 0 : i32
    return %c0_i32, %c0_i32_0, %c0_i32_1 : i32, i32, i32
  }
  func.func @transform_6(%arg0: i32, %arg1: i32) -> (i32, i32, i32) {
    %c0_i32 = arith.constant 0 : i32
    %c0_i32_0 = arith.constant 0 : i32
    %c0_i32_1 = arith.constant 0 : i32
    %c0_i32_2 = arith.constant 0 : i32
    return %c0_i32, %c0_i32_0, %c0_i32_1 : i32, i32, i32
  }
  func.func @transform_7(%arg0: i32, %arg1: i32) -> (i32, i32, i32) {
    %c0_i32 = arith.constant 0 : i32
    %c0_i32_0 = arith.constant 0 : i32
    %c0_i32_1 = arith.constant 0 : i32
    %c0_i32_2 = arith.constant 0 : i32
    return %c0_i32, %c0_i32_0, %c0_i32_1 : i32, i32, i32
  }
  func.func @transform_8(%arg0: i32, %arg1: i32) -> (i32, i32, i32) {
    %c0_i32 = arith.constant 0 : i32
    %c0_i32_0 = arith.constant 0 : i32
    %c0_i32_1 = arith.constant 0 : i32
    %c0_i32_2 = arith.constant 0 : i32
    return %c0_i32, %c0_i32_0, %c0_i32_1 : i32, i32, i32
  }
  func.func @transform_9(%arg0: i32, %arg1: i32) -> (i32, i32, i32) {
    %c0_i32 = arith.constant 0 : i32
    %c0_i32_0 = arith.constant 0 : i32
    %c0_i32_1 = arith.constant 0 : i32
    %c0_i32_2 = arith.constant 0 : i32
    return %c0_i32, %c0_i32_0, %c0_i32_1 : i32, i32, i32
  }
  func.func @transform_10(%arg0: i32, %arg1: i32) -> (i32, i32, i32) {
    %c0_i32 = arith.constant 0 : i32
    %c0_i32_0 = arith.constant 0 : i32
    %c0_i32_1 = arith.constant 0 : i32
    %c0_i32_2 = arith.constant 0 : i32
    return %c0_i32, %c0_i32_0, %c0_i32_1 : i32, i32, i32
  }
  func.func @transform_11(%arg0: i32, %arg1: i32) -> (i32, i32, i32) {
    %c0_i32 = arith.constant 0 : i32
    %c0_i32_0 = arith.constant 0 : i32
    %c0_i32_1 = arith.constant 0 : i32
    %c0_i32_2 = arith.constant 0 : i32
    return %c0_i32, %c0_i32_0, %c0_i32_1 : i32, i32, i32
  }
  func.func @transform_12(%arg0: i32, %arg1: i32) -> (i32, i32, i32) {
    %c0_i32 = arith.constant 0 : i32
    %c0_i32_0 = arith.constant 0 : i32
    %c0_i32_1 = arith.constant 0 : i32
    %c0_i32_2 = arith.constant 0 : i32
    return %c0_i32, %c0_i32_0, %c0_i32_1 : i32, i32, i32
  }
  func.func @transform_13(%arg0: i32, %arg1: i32) -> (i32, i32, i32) {
    %c0_i32 = arith.constant 0 : i32
    %c0_i32_0 = arith.constant 0 : i32
    %c0_i32_1 = arith.constant 0 : i32
    %c0_i32_2 = arith.constant 0 : i32
    return %c0_i32, %c0_i32_0, %c0_i32_1 : i32, i32, i32
  }
  func.func @transform_14(%arg0: i32, %arg1: i32) -> (i32, i32, i32) {
    %c0_i32 = arith.constant 0 : i32
    %c0_i32_0 = arith.constant 0 : i32
    %c0_i32_1 = arith.constant 0 : i32
    %c0_i32_2 = arith.constant 0 : i32
    return %c0_i32, %c0_i32_0, %c0_i32_1 : i32, i32, i32
  }
  func.func @transform_15(%arg0: i32, %arg1: i32) -> (i32, i32, i32) {
    %c0_i32 = arith.constant 0 : i32
    %c0_i32_0 = arith.constant 0 : i32
    %c0_i32_1 = arith.constant 0 : i32
    return %arg0, %c0_i32, %c0_i32_0 : i32, i32, i32
  }
}

module attributes {stable_mosaic.version = 11 : i64} {
  func.func @_fused_albert_kernel(%arg0: i32, %arg1: i32, %arg2: memref<1x8x16xf32, #tpu.memory_space<vmem>>, %arg3: memref<16x32xbf16, #tpu.memory_space<vmem>>, %arg4: memref<1x32xf32, #tpu.memory_space<vmem>>, %arg5: memref<1x32x96xbf16, #tpu.memory_space<vmem>>, %arg6: memref<1x1x96xf32, #tpu.memory_space<vmem>>, %arg7: memref<1x32x32xbf16, #tpu.memory_space<vmem>>, %arg8: memref<1x1x32xf32, #tpu.memory_space<vmem>>, %arg9: memref<1x1x32xf32, #tpu.memory_space<vmem>>, %arg10: memref<1x1x32xf32, #tpu.memory_space<vmem>>, %arg11: memref<1x32x64xbf16, #tpu.memory_space<vmem>>, %arg12: memref<1x1x64xf32, #tpu.memory_space<vmem>>, %arg13: memref<1x64x32xbf16, #tpu.memory_space<vmem>>, %arg14: memref<1x1x32xf32, #tpu.memory_space<vmem>>, %arg15: memref<1x1x32xf32, #tpu.memory_space<vmem>>, %arg16: memref<1x1x32xf32, #tpu.memory_space<vmem>>, %arg17: memref<1x8x32xf32, #tpu.memory_space<vmem>>, %arg18: memref<8x32xf32, #tpu.memory_space<vmem>>) attributes {dimension_semantics = [#tpu.dimension_semantics<parallel>, #tpu.dimension_semantics<arbitrary>], iteration_bounds = array<i64: 2, 2>, scalar_prefetch = 0 : i64, scratch_operands = 1 : i64, tpu.core_type = #tpu.core_type<tc>, window_params = [{transform_indices = @transform_0, window_bounds = array<i64: 1, 8, 16>}, {pipeline_mode = #tpu.pipeline_mode<synchronous>, transform_indices = @transform_1, window_bounds = array<i64: 16, 32>}, {pipeline_mode = #tpu.pipeline_mode<synchronous>, transform_indices = @transform_2, window_bounds = array<i64: 1, 32>}, {pipeline_mode = #tpu.pipeline_mode<synchronous>, transform_indices = @transform_3, window_bounds = array<i64: 1, 32, 96>}, {pipeline_mode = #tpu.pipeline_mode<synchronous>, transform_indices = @transform_4, window_bounds = array<i64: 1, 1, 96>}, {pipeline_mode = #tpu.pipeline_mode<synchronous>, transform_indices = @transform_5, window_bounds = array<i64: 1, 32, 32>}, {pipeline_mode = #tpu.pipeline_mode<synchronous>, transform_indices = @transform_6, window_bounds = array<i64: 1, 1, 32>}, {pipeline_mode = #tpu.pipeline_mode<synchronous>, transform_indices = @transform_7, window_bounds = array<i64: 1, 1, 32>}, {pipeline_mode = #tpu.pipeline_mode<synchronous>, transform_indices = @transform_8, window_bounds = array<i64: 1, 1, 32>}, {pipeline_mode = #tpu.pipeline_mode<synchronous>, transform_indices = @transform_9, window_bounds = array<i64: 1, 32, 64>}, {pipeline_mode = #tpu.pipeline_mode<synchronous>, transform_indices = @transform_10, window_bounds = array<i64: 1, 1, 64>}, {pipeline_mode = #tpu.pipeline_mode<synchronous>, transform_indices = @transform_11, window_bounds = array<i64: 1, 64, 32>}, {pipeline_mode = #tpu.pipeline_mode<synchronous>, transform_indices = @transform_12, window_bounds = array<i64: 1, 1, 32>}, {pipeline_mode = #tpu.pipeline_mode<synchronous>, transform_indices = @transform_13, window_bounds = array<i64: 1, 1, 32>}, {pipeline_mode = #tpu.pipeline_mode<synchronous>, transform_indices = @transform_14, window_bounds = array<i64: 1, 1, 32>}, {transform_indices = @transform_15, window_bounds = array<i64: 1, 8, 32>}]} {
    %c0_i32 = arith.constant 0 : i32
    %0 = arith.cmpi eq, %arg1, %c0_i32 : i32
    %1 = arith.extui %0 : i1 to i32
    %c0_i32_0 = arith.constant 0 : i32
    %2 = arith.cmpi ne, %1, %c0_i32_0 : i32
    scf.if %2 {
      %c0_63 = arith.constant 0 : index
      %c0_64 = arith.constant 0 : index
      %c0_65 = arith.constant 0 : index
      %132 = vector.load %arg2[%c0_63, %c0_64, %c0_65] : memref<1x8x16xf32, #tpu.memory_space<vmem>>, vector<1x8x16xf32>
      %133 = vector.shape_cast %132 : vector<1x8x16xf32> to vector<8x16xf32>
      %134 = arith.truncf %133 : vector<8x16xf32> to vector<8x16xbf16>
      %c0_66 = arith.constant 0 : index
      %c0_67 = arith.constant 0 : index
      %135 = vector.load %arg3[%c0_66, %c0_67] : memref<16x32xbf16, #tpu.memory_space<vmem>>, vector<16x32xbf16>
      %cst_68 = arith.constant dense<0.000000e+00> : vector<8x32xf32>
      %136 = tpu.matmul %134, %135, %cst_68 {dimension_numbers = #tpu.dot_dimension_numbers<[1], [0], [0], [1], [0, 0, 1, 1], [], []>} : vector<8x16xbf16>, vector<16x32xbf16>, vector<8x32xf32> -> vector<8x32xf32>
      %c0_69 = arith.constant 0 : index
      %c0_70 = arith.constant 0 : index
      %137 = vector.load %arg4[%c0_69, %c0_70] : memref<1x32xf32, #tpu.memory_space<vmem>>, vector<1x32xf32>
      %138 = vector.broadcast %137 : vector<1x32xf32> to vector<8x32xf32>
      %139 = arith.addf %136, %138 : vector<8x32xf32>
      %c0_71 = arith.constant 0 : index
      %c0_72 = arith.constant 0 : index
      %140 = vector.load %arg18[%c0_71, %c0_72] : memref<8x32xf32, #tpu.memory_space<vmem>>, vector<8x32xf32>
      tpu.vector_store %arg18[%c0_71, %c0_72], %139 {strides = array<i32>} : memref<8x32xf32, #tpu.memory_space<vmem>>, vector<8x32xf32>,
    } else {
    }
    %c0 = arith.constant 0 : index
    %c0_1 = arith.constant 0 : index
    %3 = vector.load %arg18[%c0, %c0_1] : memref<8x32xf32, #tpu.memory_space<vmem>>, vector<8x32xf32>
    %4 = arith.truncf %3 : vector<8x32xf32> to vector<8x32xbf16>
    %c0_2 = arith.constant 0 : index
    %c0_3 = arith.constant 0 : index
    %c0_4 = arith.constant 0 : index
    %5 = vector.load %arg5[%c0_2, %c0_3, %c0_4] : memref<1x32x96xbf16, #tpu.memory_space<vmem>>, vector<1x32x96xbf16>
    %6 = vector.shape_cast %5 : vector<1x32x96xbf16> to vector<32x96xbf16>
    %cst = arith.constant dense<0.000000e+00> : vector<8x96xf32>
    %7 = tpu.matmul %4, %6, %cst {dimension_numbers = #tpu.dot_dimension_numbers<[1], [0], [0], [1], [0, 0, 1, 1], [], []>} : vector<8x32xbf16>, vector<32x96xbf16>, vector<8x96xf32> -> vector<8x96xf32>
    %c0_5 = arith.constant 0 : index
    %c0_6 = arith.constant 0 : index
    %c0_7 = arith.constant 0 : index
    %8 = vector.load %arg6[%c0_5, %c0_6, %c0_7] : memref<1x1x96xf32, #tpu.memory_space<vmem>>, vector<1x1x96xf32>
    %9 = vector.shape_cast %8 : vector<1x1x96xf32> to vector<1x96xf32>
    %10 = vector.broadcast %9 : vector<1x96xf32> to vector<8x96xf32>
    %11 = arith.addf %7, %10 : vector<8x96xf32>
    %12 = vector.extract_strided_slice %11 {offsets = [0, 0], sizes = [8, 32], strides = [1, 1]} : vector<8x96xf32> to vector<8x32xf32>
    %13 = arith.truncf %12 : vector<8x32xf32> to vector<8x32xbf16>
    %14 = vector.shape_cast %13 : vector<8x32xbf16> to vector<8x4x8xbf16>
    %15 = tpu.transpose %14, [1, 0, 2] : vector<8x4x8xbf16> -> vector<4x8x8xbf16>
    %16 = vector.extract_strided_slice %11 {offsets = [0, 32], sizes = [8, 32], strides = [1, 1]} : vector<8x96xf32> to vector<8x32xf32>
    %17 = arith.truncf %16 : vector<8x32xf32> to vector<8x32xbf16>
    %18 = vector.shape_cast %17 : vector<8x32xbf16> to vector<8x4x8xbf16>
    %19 = tpu.transpose %18, [1, 0, 2] : vector<8x4x8xbf16> -> vector<4x8x8xbf16>
    %20 = vector.extract_strided_slice %11 {offsets = [0, 64], sizes = [8, 32], strides = [1, 1]} : vector<8x96xf32> to vector<8x32xf32>
    %21 = arith.truncf %20 : vector<8x32xf32> to vector<8x32xbf16>
    %22 = vector.shape_cast %21 : vector<8x32xbf16> to vector<8x4x8xbf16>
    %23 = tpu.transpose %22, [1, 0, 2] : vector<8x4x8xbf16> -> vector<4x8x8xbf16>
    "tpu.trace_start"() <{level = 10 : i32, message = "hqd,hkd->hqk"}> : () -> ()
    %cst_8 = arith.constant dense<0.000000e+00> : vector<4x8x8xf32>
    %24 = tpu.matmul %15, %19, %cst_8 {dimension_numbers = #tpu.dot_dimension_numbers<[2], [2], [1], [1], [0, 0, 0, 1, 1, 1], [0], [0]>} : vector<4x8x8xbf16>, vector<4x8x8xbf16>, vector<4x8x8xf32> -> vector<4x8x8xf32>
    "tpu.trace_stop"() : () -> ()
    %cst_9 = arith.constant 0.353553385 : f32
    %25 = vector.broadcast %cst_9 : f32 to vector<4x8x8xf32>
    %26 = arith.mulf %24, %25 : vector<4x8x8xf32>
    %cst_10 = arith.constant dense<0xFF800000> : vector<4x8xf32>
    %27 = vector.multi_reduction <maximumf>, %26, %cst_10 [2] : vector<4x8x8xf32> to vector<4x8xf32>
    %28 = vector.shape_cast %27 : vector<4x8xf32> to vector<4x8x1xf32>
    %29 = vector.broadcast %28 : vector<4x8x1xf32> to vector<4x8x8xf32>
    %30 = arith.subf %26, %29 : vector<4x8x8xf32>
    %31 = math.exp %30 : vector<4x8x8xf32>
    %cst_11 = arith.constant dense<0.000000e+00> : vector<4x8xf32>
    %32 = vector.multi_reduction <add>, %31, %cst_11 [2] : vector<4x8x8xf32> to vector<4x8xf32>
    %33 = vector.shape_cast %32 : vector<4x8xf32> to vector<4x8x1xf32>
    %34 = tpu.reciprocal %33 {approx = true} : vector<4x8x1xf32> -> vector<4x8x1xf32>
    %35 = vector.broadcast %34 : vector<4x8x1xf32> to vector<4x8x8xf32>
    %36 = arith.mulf %31, %35 : vector<4x8x8xf32>
    %37 = arith.truncf %36 : vector<4x8x8xf32> to vector<4x8x8xbf16>
    "tpu.trace_start"() <{level = 10 : i32, message = "hqk,hkd->qhd"}> : () -> ()
    %cst_12 = arith.constant dense<0.000000e+00> : vector<4x8x8xf32>
    %38 = tpu.matmul %23, %37, %cst_12 {dimension_numbers = #tpu.dot_dimension_numbers<[1], [2], [2], [1], [0, 0, 0, 2, 1, 1], [0], [0]>} : vector<4x8x8xbf16>, vector<4x8x8xbf16>, vector<4x8x8xf32> -> vector<4x8x8xf32>
    %39 = tpu.transpose %38, [2, 0, 1] : vector<4x8x8xf32> -> vector<8x4x8xf32>
    "tpu.trace_stop"() : () -> ()
    %40 = vector.shape_cast %39 : vector<8x4x8xf32> to vector<8x32xf32>
    %41 = arith.truncf %40 : vector<8x32xf32> to vector<8x32xbf16>
    %c0_13 = arith.constant 0 : index
    %c0_14 = arith.constant 0 : index
    %c0_15 = arith.constant 0 : index
    %42 = vector.load %arg7[%c0_13, %c0_14, %c0_15] : memref<1x32x32xbf16, #tpu.memory_space<vmem>>, vector<1x32x32xbf16>
    %43 = vector.shape_cast %42 : vector<1x32x32xbf16> to vector<32x32xbf16>
    %cst_16 = arith.constant dense<0.000000e+00> : vector<8x32xf32>
    %44 = tpu.matmul %41, %43, %cst_16 {dimension_numbers = #tpu.dot_dimension_numbers<[1], [0], [0], [1], [0, 0, 1, 1], [], []>} : vector<8x32xbf16>, vector<32x32xbf16>, vector<8x32xf32> -> vector<8x32xf32>
    %c0_17 = arith.constant 0 : index
    %c0_18 = arith.constant 0 : index
    %c0_19 = arith.constant 0 : index
    %45 = vector.load %arg8[%c0_17, %c0_18, %c0_19] : memref<1x1x32xf32, #tpu.memory_space<vmem>>, vector<1x1x32xf32>
    %46 = vector.shape_cast %45 : vector<1x1x32xf32> to vector<1x32xf32>
    %47 = vector.broadcast %46 : vector<1x32xf32> to vector<8x32xf32>
    %48 = arith.addf %44, %47 : vector<8x32xf32>
    %49 = arith.addf %3, %48 : vector<8x32xf32>
    %c0_20 = arith.constant 0 : index
    %c0_21 = arith.constant 0 : index
    %c0_22 = arith.constant 0 : index
    %50 = vector.load %arg9[%c0_20, %c0_21, %c0_22] : memref<1x1x32xf32, #tpu.memory_space<vmem>>, vector<1x1x32xf32>
    %51 = vector.shape_cast %50 : vector<1x1x32xf32> to vector<1x32xf32>
    %c0_23 = arith.constant 0 : index
    %c0_24 = arith.constant 0 : index
    %c0_25 = arith.constant 0 : index
    %52 = vector.load %arg10[%c0_23, %c0_24, %c0_25] : memref<1x1x32xf32, #tpu.memory_space<vmem>>, vector<1x1x32xf32>
    %53 = vector.shape_cast %52 : vector<1x1x32xf32> to vector<1x32xf32>
    %cst_26 = arith.constant dense<0.000000e+00> : vector<8xf32>
    %54 = vector.multi_reduction <add>, %49, %cst_26 [1] : vector<8x32xf32> to vector<8xf32>
    %55 = vector.shape_cast %54 : vector<8xf32> to vector<8x1xf32>
    %cst_27 = arith.constant 3.200000e+01 : f32
    %56 = vector.broadcast %cst_27 : f32 to vector<8x1xf32>
    %57 = arith.divf %55, %56 : vector<8x1xf32>
    %58 = vector.broadcast %57 : vector<8x1xf32> to vector<8x32xf32>
    %59 = arith.subf %49, %58 : vector<8x32xf32>
    %60 = arith.mulf %59, %59 : vector<8x32xf32>
    %cst_28 = arith.constant dense<0.000000e+00> : vector<8xf32>
    %61 = vector.multi_reduction <add>, %60, %cst_28 [1] : vector<8x32xf32> to vector<8xf32>
    %62 = vector.shape_cast %61 : vector<8xf32> to vector<8x1xf32>
    %cst_29 = arith.constant 3.200000e+01 : f32
    %63 = vector.broadcast %cst_29 : f32 to vector<8x1xf32>
    %64 = arith.divf %62, %63 : vector<8x1xf32>
    %cst_30 = arith.constant 9.99999996E-13 : f32
    %65 = vector.broadcast %cst_30 : f32 to vector<8x1xf32>
    %66 = arith.addf %64, %65 : vector<8x1xf32>
    %67 = math.rsqrt %66 : vector<8x1xf32>
    %68 = vector.broadcast %67 : vector<8x1xf32> to vector<8x32xf32>
    %69 = arith.mulf %59, %68 : vector<8x32xf32>
    %70 = vector.broadcast %51 : vector<1x32xf32> to vector<8x32xf32>
    %71 = arith.mulf %69, %70 : vector<8x32xf32>
    %72 = vector.broadcast %53 : vector<1x32xf32> to vector<8x32xf32>
    %73 = arith.addf %71, %72 : vector<8x32xf32>
    %74 = arith.truncf %73 : vector<8x32xf32> to vector<8x32xbf16>
    %c0_31 = arith.constant 0 : index
    %c0_32 = arith.constant 0 : index
    %c0_33 = arith.constant 0 : index
    %75 = vector.load %arg11[%c0_31, %c0_32, %c0_33] : memref<1x32x64xbf16, #tpu.memory_space<vmem>>, vector<1x32x64xbf16>
    %76 = vector.shape_cast %75 : vector<1x32x64xbf16> to vector<32x64xbf16>
    %cst_34 = arith.constant dense<0.000000e+00> : vector<8x64xf32>
    %77 = tpu.matmul %74, %76, %cst_34 {dimension_numbers = #tpu.dot_dimension_numbers<[1], [0], [0], [1], [0, 0, 1, 1], [], []>} : vector<8x32xbf16>, vector<32x64xbf16>, vector<8x64xf32> -> vector<8x64xf32>
    %c0_35 = arith.constant 0 : index
    %c0_36 = arith.constant 0 : index
    %c0_37 = arith.constant 0 : index
    %78 = vector.load %arg12[%c0_35, %c0_36, %c0_37] : memref<1x1x64xf32, #tpu.memory_space<vmem>>, vector<1x1x64xf32>
    %79 = vector.shape_cast %78 : vector<1x1x64xf32> to vector<1x64xf32>
    %80 = vector.broadcast %79 : vector<1x64xf32> to vector<8x64xf32>
    %81 = arith.addf %77, %80 : vector<8x64xf32>
    %cst_38 = arith.constant 5.000000e-01 : f32
    %82 = vector.broadcast %cst_38 : f32 to vector<8x64xf32>
    %83 = arith.mulf %82, %81 : vector<8x64xf32>
    %cst_39 = arith.constant 4.471500e-02 : f32
    %84 = vector.broadcast %cst_39 : f32 to vector<8x64xf32>
    %85 = arith.mulf %84, %81 : vector<8x64xf32>
    %86 = arith.mulf %85, %81 : vector<8x64xf32>
    %87 = arith.mulf %86, %81 : vector<8x64xf32>
    %88 = arith.addf %81, %87 : vector<8x64xf32>
    %cst_40 = arith.constant 0.797884583 : f32
    %89 = vector.broadcast %cst_40 : f32 to vector<8x64xf32>
    %90 = arith.mulf %89, %88 : vector<8x64xf32>
    %91 = math.tanh %90 : vector<8x64xf32>
    %cst_41 = arith.constant 1.000000e+00 : f32
    %92 = vector.broadcast %cst_41 : f32 to vector<8x64xf32>
    %93 = arith.addf %92, %91 : vector<8x64xf32>
    %94 = arith.mulf %83, %93 : vector<8x64xf32>
    %95 = arith.truncf %94 : vector<8x64xf32> to vector<8x64xbf16>
    %c0_42 = arith.constant 0 : index
    %c0_43 = arith.constant 0 : index
    %c0_44 = arith.constant 0 : index
    %96 = vector.load %arg13[%c0_42, %c0_43, %c0_44] : memref<1x64x32xbf16, #tpu.memory_space<vmem>>, vector<1x64x32xbf16>
    %97 = vector.shape_cast %96 : vector<1x64x32xbf16> to vector<64x32xbf16>
    %cst_45 = arith.constant dense<0.000000e+00> : vector<8x32xf32>
    %98 = tpu.matmul %95, %97, %cst_45 {dimension_numbers = #tpu.dot_dimension_numbers<[1], [0], [0], [1], [0, 0, 1, 1], [], []>} : vector<8x64xbf16>, vector<64x32xbf16>, vector<8x32xf32> -> vector<8x32xf32>
    %c0_46 = arith.constant 0 : index
    %c0_47 = arith.constant 0 : index
    %c0_48 = arith.constant 0 : index
    %99 = vector.load %arg14[%c0_46, %c0_47, %c0_48] : memref<1x1x32xf32, #tpu.memory_space<vmem>>, vector<1x1x32xf32>
    %100 = vector.shape_cast %99 : vector<1x1x32xf32> to vector<1x32xf32>
    %101 = vector.broadcast %100 : vector<1x32xf32> to vector<8x32xf32>
    %102 = arith.addf %98, %101 : vector<8x32xf32>
    %103 = arith.addf %102, %73 : vector<8x32xf32>
    %c0_49 = arith.constant 0 : index
    %c0_50 = arith.constant 0 : index
    %c0_51 = arith.constant 0 : index
    %104 = vector.load %arg15[%c0_49, %c0_50, %c0_51] : memref<1x1x32xf32, #tpu.memory_space<vmem>>, vector<1x1x32xf32>
    %105 = vector.shape_cast %104 : vector<1x1x32xf32> to vector<1x32xf32>
    %c0_52 = arith.constant 0 : index
    %c0_53 = arith.constant 0 : index
    %c0_54 = arith.constant 0 : index
    %106 = vector.load %arg16[%c0_52, %c0_53, %c0_54] : memref<1x1x32xf32, #tpu.memory_space<vmem>>, vector<1x1x32xf32>
    %107 = vector.shape_cast %106 : vector<1x1x32xf32> to vector<1x32xf32>
    %cst_55 = arith.constant dense<0.000000e+00> : vector<8xf32>
    %108 = vector.multi_reduction <add>, %103, %cst_55 [1] : vector<8x32xf32> to vector<8xf32>
    %109 = vector.shape_cast %108 : vector<8xf32> to vector<8x1xf32>
    %cst_56 = arith.constant 3.200000e+01 : f32
    %110 = vector.broadcast %cst_56 : f32 to vector<8x1xf32>
    %111 = arith.divf %109, %110 : vector<8x1xf32>
    %112 = vector.broadcast %111 : vector<8x1xf32> to vector<8x32xf32>
    %113 = arith.subf %103, %112 : vector<8x32xf32>
    %114 = arith.mulf %113, %113 : vector<8x32xf32>
    %cst_57 = arith.constant dense<0.000000e+00> : vector<8xf32>
    %115 = vector.multi_reduction <add>, %114, %cst_57 [1] : vector<8x32xf32> to vector<8xf32>
    %116 = vector.shape_cast %115 : vector<8xf32> to vector<8x1xf32>
    %cst_58 = arith.constant 3.200000e+01 : f32
    %117 = vector.broadcast %cst_58 : f32 to vector<8x1xf32>
    %118 = arith.divf %116, %117 : vector<8x1xf32>
    %cst_59 = arith.constant 9.99999996E-13 : f32
    %119 = vector.broadcast %cst_59 : f32 to vector<8x1xf32>
    %120 = arith.addf %118, %119 : vector<8x1xf32>
    %121 = math.rsqrt %120 : vector<8x1xf32>
    %122 = vector.broadcast %121 : vector<8x1xf32> to vector<8x32xf32>
    %123 = arith.mulf %113, %122 : vector<8x32xf32>
    %124 = vector.broadcast %105 : vector<1x32xf32> to vector<8x32xf32>
    %125 = arith.mulf %123, %124 : vector<8x32xf32>
    %126 = vector.broadcast %107 : vector<1x32xf32> to vector<8x32xf32>
    %127 = arith.addf %125, %126 : vector<8x32xf32>
    %c0_60 = arith.constant 0 : index
    %c0_61 = arith.constant 0 : index
    %128 = vector.load %arg18[%c0_60, %c0_61] : memref<8x32xf32, #tpu.memory_space<vmem>>, vector<8x32xf32>
    tpu.vector_store %arg18[%c0_60, %c0_61], %127 {strides = array<i32>} : memref<8x32xf32, #tpu.memory_space<vmem>>, vector<8x32xf32>,
    %c1_i32 = arith.constant 1 : i32
    %129 = arith.cmpi eq, %arg1, %c1_i32 : i32
    %130 = arith.extui %129 : i1 to i32
    %c0_i32_62 = arith.constant 0 : i32
    %131 = arith.cmpi ne, %130, %c0_i32_62 : i32
    scf.if %131 {
      %c0_63 = arith.constant 0 : index
      %c0_64 = arith.constant 0 : index
      %c0_65 = arith.constant 0 : index
      %132 = vector.load %arg17[%c0_63, %c0_64, %c0_65] : memref<1x8x32xf32, #tpu.memory_space<vmem>>, vector<1x8x32xf32>
      %133 = vector.shape_cast %132 : vector<1x8x32xf32> to vector<8x32xf32>
      %134 = vector.shape_cast %127 : vector<8x32xf32> to vector<1x8x32xf32>
      tpu.vector_store %arg17[%c0_63, %c0_64, %c0_65], %134 {strides = array<i32>} : memref<1x8x32xf32, #tpu.memory_space<vmem>>, vector<1x8x32xf32>,
    } else {
    }
    return
  }
  func.func @transform_0(%arg0: i32, %arg1: i32) -> (i32, i32, i32) {
    %c0_i32 = arith.constant 0 : i32
    %c0_i32_0 = arith.constant 0 : i32
    %c0_i32_1 = arith.constant 0 : i32
    return %arg0, %c0_i32, %c0_i32_0 : i32, i32, i32
  }
  func.func @transform_1(%arg0: i32, %arg1: i32) -> (i32, i32) {
    %c0_i32 = arith.constant 0 : i32
    %c0_i32_0 = arith.constant 0 : i32
    %c0_i32_1 = arith.constant 0 : i32
    return %c0_i32, %c0_i32_0 : i32, i32
  }
  func.func @transform_2(%arg0: i32, %arg1: i32) -> (i32, i32) {
    %c0_i32 = arith.constant 0 : i32
    %c0_i32_0 = arith.constant 0 : i32
    %c0_i32_1 = arith.constant 0 : i32
    return %c0_i32, %c0_i32_0 : i32, i32
  }
  func.func @transform_3(%arg0: i32, %arg1: i32) -> (i32, i32, i32) {
    %c0_i32 = arith.constant 0 : i32
    %c0_i32_0 = arith.constant 0 : i32
    %c0_i32_1 = arith.constant 0 : i32
    %c0_i32_2 = arith.constant 0 : i32
    return %c0_i32, %c0_i32_0, %c0_i32_1 : i32, i32, i32
  }
  func.func @transform_4(%arg0: i32, %arg1: i32) -> (i32, i32, i32) {
    %c0_i32 = arith.constant 0 : i32
    %c0_i32_0 = arith.constant 0 : i32
    %c0_i32_1 = arith.constant 0 : i32
    %c0_i32_2 = arith.constant 0 : i32
    return %c0_i32, %c0_i32_0, %c0_i32_1 : i32, i32, i32
  }
  func.func @transform_5(%arg0: i32, %arg1: i32) -> (i32, i32, i32) {
    %c0_i32 = arith.constant 0 : i32
    %c0_i32_0 = arith.constant 0 : i32
    %c0_i32_1 = arith.constant 0 : i32
    %c0_i32_2 = arith.constant 0 : i32
    return %c0_i32, %c0_i32_0, %c0_i32_1 : i32, i32, i32
  }
  func.func @transform_6(%arg0: i32, %arg1: i32) -> (i32, i32, i32) {
    %c0_i32 = arith.constant 0 : i32
    %c0_i32_0 = arith.constant 0 : i32
    %c0_i32_1 = arith.constant 0 : i32
    %c0_i32_2 = arith.constant 0 : i32
    return %c0_i32, %c0_i32_0, %c0_i32_1 : i32, i32, i32
  }
  func.func @transform_7(%arg0: i32, %arg1: i32) -> (i32, i32, i32) {
    %c0_i32 = arith.constant 0 : i32
    %c0_i32_0 = arith.constant 0 : i32
    %c0_i32_1 = arith.constant 0 : i32
    %c0_i32_2 = arith.constant 0 : i32
    return %c0_i32, %c0_i32_0, %c0_i32_1 : i32, i32, i32
  }
  func.func @transform_8(%arg0: i32, %arg1: i32) -> (i32, i32, i32) {
    %c0_i32 = arith.constant 0 : i32
    %c0_i32_0 = arith.constant 0 : i32
    %c0_i32_1 = arith.constant 0 : i32
    %c0_i32_2 = arith.constant 0 : i32
    return %c0_i32, %c0_i32_0, %c0_i32_1 : i32, i32, i32
  }
  func.func @transform_9(%arg0: i32, %arg1: i32) -> (i32, i32, i32) {
    %c0_i32 = arith.constant 0 : i32
    %c0_i32_0 = arith.constant 0 : i32
    %c0_i32_1 = arith.constant 0 : i32
    %c0_i32_2 = arith.constant 0 : i32
    return %c0_i32, %c0_i32_0, %c0_i32_1 : i32, i32, i32
  }
  func.func @transform_10(%arg0: i32, %arg1: i32) -> (i32, i32, i32) {
    %c0_i32 = arith.constant 0 : i32
    %c0_i32_0 = arith.constant 0 : i32
    %c0_i32_1 = arith.constant 0 : i32
    %c0_i32_2 = arith.constant 0 : i32
    return %c0_i32, %c0_i32_0, %c0_i32_1 : i32, i32, i32
  }
  func.func @transform_11(%arg0: i32, %arg1: i32) -> (i32, i32, i32) {
    %c0_i32 = arith.constant 0 : i32
    %c0_i32_0 = arith.constant 0 : i32
    %c0_i32_1 = arith.constant 0 : i32
    %c0_i32_2 = arith.constant 0 : i32
    return %c0_i32, %c0_i32_0, %c0_i32_1 : i32, i32, i32
  }
  func.func @transform_12(%arg0: i32, %arg1: i32) -> (i32, i32, i32) {
    %c0_i32 = arith.constant 0 : i32
    %c0_i32_0 = arith.constant 0 : i32
    %c0_i32_1 = arith.constant 0 : i32
    %c0_i32_2 = arith.constant 0 : i32
    return %c0_i32, %c0_i32_0, %c0_i32_1 : i32, i32, i32
  }
  func.func @transform_13(%arg0: i32, %arg1: i32) -> (i32, i32, i32) {
    %c0_i32 = arith.constant 0 : i32
    %c0_i32_0 = arith.constant 0 : i32
    %c0_i32_1 = arith.constant 0 : i32
    %c0_i32_2 = arith.constant 0 : i32
    return %c0_i32, %c0_i32_0, %c0_i32_1 : i32, i32, i32
  }
  func.func @transform_14(%arg0: i32, %arg1: i32) -> (i32, i32, i32) {
    %c0_i32 = arith.constant 0 : i32
    %c0_i32_0 = arith.constant 0 : i32
    %c0_i32_1 = arith.constant 0 : i32
    %c0_i32_2 = arith.constant 0 : i32
    return %c0_i32, %c0_i32_0, %c0_i32_1 : i32, i32, i32
  }
  func.func @transform_15(%arg0: i32, %arg1: i32) -> (i32, i32, i32) {
    %c0_i32 = arith.constant 0 : i32
    %c0_i32_0 = arith.constant 0 : i32
    %c0_i32_1 = arith.constant 0 : i32
    return %arg0, %c0_i32, %c0_i32_0 : i32, i32, i32
  }
}

</mosaic_0001>

<bundles_post_ra>
// kernel: tpu_custom_call.1
= control target key start
LH: loop header
LB: loop body
LE: loop exit
PB: predicated region body
PF: predicated region fallthrough
CT: control target
= control target key end

     0   :  { %s3644_s0 = inlined_call_operand.vmem [shape: f32[2,8,16], index: 0, kind: input, shape index: {}]   ;;  %s3645_s1 = inlined_call_operand.hbm [shape: bf16[16,32], index: 1, kind: input, shape index: {}]   ;;  %s3646_s2 = inlined_call_operand.hbm [shape: f32[1,32], index: 2, kind: input, shape index: {}]   ;;  %s3647_s3 = inlined_call_operand.vmem [shape: bf16[1,32,96], index: 3, kind: input, shape index: {}]   ;;  %s3648_s4 = inlined_call_operand.hbm [shape: f32[1,1,96], index: 4, kind: input, shape index: {}]   ;;  %s3649_s5 = inlined_call_operand.vmem [shape: bf16[1,32,32], index: 5, kind: input, shape index: {}]   ;;  %s3650_s6 = inlined_call_operand.hbm [shape: f32[1,1,32], index: 6, kind: input, shape index: {}]   ;;  %s3651_s7 = inlined_call_operand.hbm [shape: f32[1,1,32], index: 7, kind: input, shape index: {}]   ;;  %s3652_s8 = inlined_call_operand.hbm [shape: f32[1,1,32], index: 8, kind: input, shape index: {}]   ;;  %s3653_s9 = inlined_call_operand.vmem [shape: bf16[1,32,64], index: 9, kind: input, shape index: {}]   ;;  %s3654_s10 = inlined_call_operand.vmem [shape: f32[1,1,64], index: 10, kind: input, shape index: {}]   ;;  %s3655_s11 = inlined_call_operand.vmem [shape: bf16[1,64,32], index: 11, kind: input, shape index: {}]   ;;  %s3656_s12 = inlined_call_operand.vmem [shape: f32[1,1,32], index: 12, kind: input, shape index: {}]   ;;  %s3657_s13 = inlined_call_operand.vmem [shape: f32[1,1,32], index: 13, kind: input, shape index: {}]   ;;  %s3658_s14 = inlined_call_operand.vmem [shape: f32[1,1,32], index: 14, kind: input, shape index: {}]   ;;  %s3659_s15 = inlined_call_operand.hbm [shape: f32[2,8,32], index: 15, kind: output, shape index: {}]  }
   0x1   :  { %3675 = sst [smem:[#allocation30_spill]] %s3646_s2 }
   0x2   :  { %3676 = sst [smem:[#allocation31_spill]] %s3650_s6 }
   0x3   :  { %3677 = sst [smem:[#allocation32_spill]] %s3659_s15 }
   0x4   :  { %20 = vsyncpa [#allocation4], 0 }
   0x5   :  { %21 = vsyncpa [#allocation7], 0 }
   0x6   :  { %22 = vsyncpa [#allocation10], 0 }
   0x7   :  { %23 = vsyncpa [#allocation13], 0 }
   0x8   :  { %24 = vsyncpa [#allocation5], 0 }
   0x9   :  { %26 = vsyncpa [#allocation5 + $0x1], 0  ;;  %s3168_s18 = smov 0   ;;  %s3170_s19 = smov 0  }
   0xa   :  { %s3172_s20 = smov 0   ;;  %s3174_s21 = smov 0  }
   0xb   :  { %s3176_s22 = smov 0   ;;  %s3178_s23 = smov 0  }
   0xc   :  { %s3180_s24 = smov 0   ;;  %s3182_s25 = smov 0  }
   0xd LB: > { %3678 = sst [smem:[#allocation20_spill]] %s3034_s18  ;;  %s2434_s26 = sadd.s32 4294967295, %s3062_s25   ;;  %s3062_s25 = sphi %s3182_s25, %s32_s25   ;;  %s3058_s24 = sphi %s3180_s24, %s3710_s24   ;;  %s3054_s23 = sphi %s3178_s23, %s3709_s23   ;;  %s3050_s22 = sphi %s3176_s22, %s3714_s22   ;;  %s3046_s21 = sphi %s3174_s21, %s3707_s21   ;;  %s3042_s20 = sphi %s3172_s20, %s3713_s20   ;;  %s3038_s19 = sphi %s3170_s19, %s3712_s19   ;;  %s3034_s18 = sphi %s3168_s18, %s3711_s18  }
   0xe   : > { %3679 = sst [smem:[#allocation21_spill]] %s3042_s20  ;;  %s2435_s27 = sadd.s32 4294967294, %s3062_s25  }
   0xf   : > { %3680 = sst [smem:[#allocation22_spill]] %s3054_s23  ;;  %s41_s28 = sadd.s32 1, %s3054_s23 }
  0x10   : > { %3681 = sst [smem:[#allocation23_spill]] %s3058_s24  ;;  %s44_s29 = sadd.s32 1, %s3058_s24 }
  0x11   : > { %3682 = sst [smem:[#allocation24_spill]] %s3062_s25  ;;  %p42_p0 = scmp.ge.s32.totalorder %s41_s28, 2 }
  0x12   : > { %s371_s30 = sadd.s32 1, %s3042_s20  ;;  %p381_p1 = scmp.ne.s32.totalorder %s3042_s20, %s3038_s19 }
  0x13   : > { %p382_p2 = scmp.eq.s32.totalorder %s2434_s26, 3  ;;  %s3716_s28 = smov (%p42_p0, %s41_s28), 0 }
  0x14   : > { %3683 = sst [smem:[#allocation25_spill]] %s3716_s28  ;;  %s3718_s29 = smov (!%p42_p0, %s44_s29), %s3058_s24 }
  0x15   : > { %p3218_p3 = por %p382_p2, %p381_p1  ;;  %p387_p4 = scmp.ne.s32.totalorder %s3038_s19, %s3034_s18 }
  0x16   : > { %p46_p5 = scmp.ge.s32.totalorder %s3718_s29, 2  ;;  %p388_p6 = scmp.eq.s32.totalorder %s2435_s27, 3 }
  0x17   : > { %s3684_s16 = scalar_select %p3218_p3, 1, 0 }
  0x18   : > { %p2436_p7 = scmp.ge.s32.totalorder %s3062_s25, 1  ;;  %p395_p8 = scmp.lt.s32.totalorder %s3062_s25, 5 }
  0x19   : > { %3685 = sst [smem:[#allocation26_spill]] %s3684_s16  ;;  %s3720_s29 = smov (%p46_p5, %s3718_s29), 0 }
  0x1a   : > { %3686 = sst [smem:[#allocation27_spill]] %s3720_s29  ;;  %p3228_p9 = por %p388_p6, %p387_p4 }
  0x1b   : > { %p3232_p10 = pnand %p2436_p7, %p395_p8  ;;  %s368_s28 = ssub.s32 %s3058_s24, %s3720_s29 }
  0x1c   : > { %s3687_s17 = scalar_select %p3228_p9, 1, 0 }
  0x1d   : > { %s3689_s23 = scalar_select %p3232_p10, 1, 0 }
  0x1e   : > { %3688 = sst [smem:[#allocation28_spill]] %s3687_s17  ;;  %p369_p11 = scmp.eq.s32.totalorder %s368_s28, 0 }
  0x1f   : > { %p2642_p12 = pneg %p3232_p10  ;;  %p3240_p13 = scmp.eq.s32.totalorder %s2434_s26, 0 }
  0x20   : > { %s3245_s18 = scalar_select %p369_p11, %s3042_s20, %s371_s30  }
  0x21   : > { %s3690_s27 = scalar_select %p3240_p13, 1, 0 }
  0x22   : > { %3691 = sst [smem:[#allocation29_spill]] %s3245_s18  ;;  %p3249_p0 = pnand %p3240_p13, %p2642_p12 }
  0x23   : > { %s3064_s17 = smov [#allocation6]   ;;  %s3065_s29 = smov [#allocation9]  }
  0x24   : > { %s421_s15 = sshll.u32 %s3064_s17, 4  ;;  %s449_s28 = sshll.u32 %s3065_s29, 4  ;;  %s422_s15 = int_to_ptr.vmem [resolvable:$true] %s421_s15  ;;  %s450_s28 = int_to_ptr.vmem [resolvable:$true] %s449_s28 }
  0x25   : > { %p3255_p1 = pneg %p3249_p0  ;;  %s2809_s24 = scalar_lea.vmem %s422_s15, 16 }
  0x26   : > { %p2810_p2 = scmp.ne.s32.totalorder %s422_s15, %s2809_s24  ;;  %s2816_s30 = scalar_lea.vmem %s422_s15, 32 }
  0x27   : > { %p2817_p6 = scmp.lt.s32.totalorder %s422_s15, %s422_s15  ;;  %p2818_p7 = scmp.lt.s32.totalorder %s2816_s30, %s2809_s24 }
  0x28   : > { %p2812_p4 = pnand %p2810_p2, %p3255_p1 }
  0x29   : > { %p2819_p8 = por %p2818_p7, %p2817_p6 }
  0x2a   : > { %p2813_p5 = pneg %p2812_p4 }
  0x2c   : > { %p2820_p11 = pnand %p2819_p8, %p2813_p5 }
  0x2e   : > { %2823 = shalt.err (!%p2820_p11)
}
  0x2f   : > { %s3694_s2 = sld [smem:[#allocation30_spill]]  ;;  %s2835_s18 = scalar_lea.vmem %s450_s28, 16 }
  0x30   : > { %p2836_p12 = scmp.ne.s32.totalorder %s450_s28, %s2835_s18  ;;  %s2842_s20 = scalar_lea.vmem %s450_s28, 32 }
  0x31   : > { %p2843_p4 = scmp.lt.s32.totalorder %s450_s28, %s450_s28  ;;  %p2844_p3 = scmp.lt.s32.totalorder %s2842_s20, %s2835_s18 }
  0x32   : > { %p2838_p9 = pnand %p2836_p12, %p3255_p1 }
  0x33   : > { %p2845_p13 = por %p2844_p3, %p2843_p4 }
  0x34   : > { %p2839_p2 = pneg %p2838_p9 }
  0x35   : > { %2648 = dma.hbm_to_vmem [thread:$0]  (!%p3249_p0), %s3694_s2, 16, %s422_s15, [#allocation7]  }
  0x36   : > { %p2846_p6 = pnand %p2845_p13, %p2839_p2 }
  0x38   : > { %2849 = shalt.err (!%p2846_p6)
}
  0x39   : > { %s3695_s6 = sld [smem:[#allocation31_spill]]  ;;  %s3066_s15 = smov [#allocation3]  }
  0x3a   : > { %s407_s29 = sshll.u32 %s3066_s15, 4  ;;  %s408_s29 = int_to_ptr.vmem [resolvable:$true] %s407_s29 }
  0x3b   : > { %s2861_s17 = scalar_lea.vmem %s408_s29, 128  ;;  %p2869_p8 = scmp.lt.s32.totalorder %s408_s29, %s408_s29 }
  0x3c   : > { %p2862_p5 = scmp.ne.s32.totalorder %s408_s29, %s2861_s17  ;;  %p2870_p11 = scmp.lt.s32.totalorder %s2861_s17, %s2861_s17 }
  0x3e   : > { %p2864_p9 = pnand %p2862_p5, %p3255_p1  ;;  %p2871_p3 = por %p2870_p11, %p2869_p8 }
  0x3f   : > { %2654 = dma.hbm_to_vmem [thread:$0]  (!%p3249_p0), %s3695_s6, 16, %s450_s28, [#allocation10]  }
  0x40   : > { %p2865_p7 = pneg %p2864_p9 }
  0x42   : > { %p2872_p13 = pnand %p2871_p3, %p2865_p7 }
  0x44   : > { %2875 = shalt.err (!%p2872_p13)
}
  0x45   : > { %s3067_s18 = smov 64   ;;  %s3068_s20 = smov 4  }
  0x46   : > { %2645 = dma.hbm_to_vmem [thread:$0]  (!%p3249_p0), %s3645_s1, 128, %s408_s29, [#allocation4], %s3067_s18, %s3067_s18, %s3068_s20  }
  0x47   : > { %s3069_s30 = smov [#allocation8]   ;;  %s3070_s2 = smov [#allocation11]  }
  0x48   : > { %s435_s15 = sshll.u32 %s3069_s30, 4  ;;  %s460_s6 = sshll.u32 %s3070_s2, 4  ;;  %s436_s15 = int_to_ptr.vmem [resolvable:$true] %s435_s15  ;;  %s461_s6 = int_to_ptr.vmem [resolvable:$true] %s460_s6 }
  0x49   : > { %s2887_s16 = scalar_lea.vmem %s436_s15, 16  ;;  %s2894_s17 = scalar_lea.vmem %s436_s15, 32 }
  0x4a   : > { %p2888_p12 = scmp.ne.s32.totalorder %s436_s15, %s2887_s16  ;;  %p2895_p6 = scmp.lt.s32.totalorder %s436_s15, %s436_s15 }
  0x4b   : > { %p2896_p5 = scmp.lt.s32.totalorder %s2894_s17, %s2887_s16 }
  0x4c   : > { %p2890_p2 = pnand %p2888_p12, %p3255_p1 }
  0x4d   : > { %p2897_p9 = por %p2896_p5, %p2895_p6 }
  0x4e   : > { %p2891_p4 = pneg %p2890_p2 }
  0x50   : > { %p2898_p7 = pnand %p2897_p9, %p2891_p4 }
  0x52   : > { %2901 = shalt.err (!%p2898_p7)
}
  0x53   : > { %2651 = dma.hbm_to_vmem [thread:$0]  (!%p3249_p0), %s3648_s4, 16, %s436_s15, [#allocation7]  }
  0x54   : > { %s2913_s2 = scalar_lea.vmem %s461_s6, 16  ;;  %s2920_s20 = scalar_lea.vmem %s461_s6, 32 }
  0x55   : > { %p2914_p8 = scmp.ne.s32.totalorder %s461_s6, %s2913_s2  ;;  %p2921_p13 = scmp.lt.s32.totalorder %s461_s6, %s461_s6 }
  0x56   : > { %p2922_p12 = scmp.lt.s32.totalorder %s2920_s20, %s2913_s2 }
  0x57   : > { %p2916_p11 = pnand %p2914_p8, %p3255_p1 }
  0x58   : > { %p2923_p2 = por %p2922_p12, %p2921_p13 }
  0x59   : > { %p2917_p3 = pneg %p2916_p11 }
  0x5b   : > { %p2924_p10 = pnand %p2923_p2, %p2917_p3 }
  0x5d   : > { %2927 = shalt.err (!%p2924_p10)
}
  0x5e   : > { %2657 = dma.hbm_to_vmem [thread:$0]  (!%p3249_p0), %s3651_s7, 16, %s461_s6, [#allocation10]  }
  0x5f   : > { %s3071_s28 = smov [#allocation12]  }
  0x60   : > { %s471_s30 = sshll.u32 %s3071_s28, 4  ;;  %s472_s30 = int_to_ptr.vmem [resolvable:$true] %s471_s30 }
  0x61   : > { %s2939_s15 = scalar_lea.vmem %s472_s30, 16  ;;  %s2946_s17 = scalar_lea.vmem %s472_s30, 32 }
  0x62   : > { %p2940_p4 = scmp.ne.s32.totalorder %s472_s30, %s2939_s15  ;;  %p2947_p9 = scmp.lt.s32.totalorder %s472_s30, %s472_s30 }
  0x63   : > { %p2948_p7 = scmp.lt.s32.totalorder %s2946_s17, %s2939_s15 }
  0x64   : > { %p2942_p6 = pnand %p2940_p4, %p3255_p1 }
  0x65   : > { %p2949_p8 = por %p2948_p7, %p2947_p9 }
  0x66   : > { %p2943_p5 = pneg %p2942_p6 }
  0x68   : > { %p2950_p10 = pnand %p2949_p8, %p2943_p5 }
  0x6a   : > { %2953 = shalt.err (!%p2950_p10)
}
  0x6b   : > { %2660 = dma.hbm_to_vmem [thread:$0]  (!%p3249_p0), %s3652_s8, 16, %s472_s30, [#allocation13]  }
  0x6c   : > { %p3696_p11 = scmp.ne.s32.totalorder %s3689_s23, 0 }
  0x6d   : > { %p3697_p3 = scmp.ne.s32.totalorder (!%p3696_p11), %s3690_s27, 0 }
  0x6e   : > { %509 = sbr.rel (%p3696_p11) target bundleno = 3057 (0xbf1), region = 80 }
  0x73   : > { %3013 = dma.done.wait (%p3697_p3), [#allocation4], 128  }
  0x74   : > { %3015 = vsyncadd (%p3697_p3), [#allocation4], 4294967168 }
  0x75   : > { %3017 = dma.done.wait (%p3697_p3), [#allocation7], 32  }
  0x76   : > { %3019 = vsyncadd (%p3697_p3), [#allocation7], 4294967264 }
  0x77   : > { %3021 = dma.done.wait (%p3697_p3), [#allocation10], 32  }
  0x78   : > { %3023 = vsyncadd (%p3697_p3), [#allocation10], 4294967264 }
  0x79   : > { %3025 = dma.done.wait (%p3697_p3), [#allocation13], 16  }
  0x7a   : > { %3027 = vsyncadd (%p3697_p3), [#allocation13], 4294967280  ;;  %s573_s6 = sand.u32 1, %s3038_s19   ;;  %p576_p0 = scmp.lt.s32.totalorder %s3050_s22, 1 }
  0x7b   : > { %s3323_s23 = sshll.u32 %s573_s6, 3  ;;  %p2453_p1 = scmp.ne.s32.totalorder %s3046_s21, 0 }
  0x7c   : > { %s577_s25 = scalar_select %p576_p0, %s3050_s22, 1 }
  0x7d   : > { %s575_s24 = scalar_lea.vmem [#allocation14], %s3323_s23  ;;  %584 = sbr.rel (%p2453_p1) target bundleno = 334 (0x14e), region = 108 }
  0x7e   : > { %s2452_s26 = sshll.u32 %s577_s25, 3 }
  0x7f   : > { %s579_s16 = scalar_lea.vmem %s3644_s0, %s2452_s26 }
  0x82   : > { %v2765_v0 = vld [vmem:[#allocation3] sm:$0xff]   ;;  %v3072_v1 = vmov 0.0   ;;  %v585_v2 = vld [vmem:[%s579_s16] sm:$0xff]  ;;  %vm3073_vm0 = vmmov 0   ;;  %vm602_vm1 = vcmask 130048   ;;  %vm646_vm2 = vcmask 261120  }
  0x83   : > { %2526 = vmatprep.subr.bf16.mxu0 %v3072_v1  ;;  %2528 = vmatprep.mubr.msk.bf16.mxu0 %vm3073_vm0, %v3072_v1  ;;  %v586_v3 = vpack.c.bf16 %v585_v2, %v585_v2  ;;  %v2454_v4 = vld [vmem:[#allocation6] ss:$0 sm:$0xff] }
  0x84   : > { %2527 = vmatpush3.bf16.msra.mxu0 %v2765_v0 }
  0x87   : > { %2529 = vmatmul.mubr.msk.bf16.vlgmr.msra.gmra.mxu0 %vm602_vm1, %v586_v3 }
 0x147   : > { %v640_v5 = vpop.f32.mrf.mxu0 }
 0x148   : > { %v641_v6 = vadd.f32 %v2454_v4, %v640_v5 }
 0x149   : > { %v2530_v7 = vpop.f32.mrf.mxu0 }
 0x14a   : > { %647 = vst.msk [vmem:[#allocation2] sm:$0xff] %vm646_vm2, %v641_v6 }
 0x14b   : > { %v643_v8 = vpop.f32.mrf.mxu0 }
 0x14d   : > { %v2531_v9 = vpop.f32.mrf.mxu0 }
 0x14e PF: > { %v2766_v10 = vld [vmem:[%s3647_s3 + $0x8] sm:$0xff]   ;;  %v3074_v11 = vmov 0.0   ;;  %v2767_v12 = vld [vmem:[%s3647_s3] sm:$0xff]   ;;  %vm3075_vm3 = vmmov 0   ;;  %vm673_vm4 = vcmask 261120   ;;  %s3076_s17 = smov 104   ;;  %v728_v27 = vlaneseq }
 0x14f   : > { %2532 = vmatprep.subr.bf16.mxu0 %v3074_v11  ;;  %2540 = vmatprep.subr.bf16.mxu1 %v3074_v11  ;;  %v2457_v15 = vld [vmem:[#allocation8] ss:$0 sm:$0xff]  ;;  %s3077_s29 = smov 120   ;;  %s3078_s18 = smov 96   ;;  %v3080_v25 = vmov 1983009808  }
 0x150   : > { %2533 = vmatpush3.bf16.msra.mxu0 %v2766_v10  ;;  %2536 = vmatprep.mubr.msk.bf16.mxu0 %vm3075_vm3, %v3074_v11  ;;  %s3079_s25 = smov 112   ;;  %v726_v26 = vunpack.c.l.s4 %v3080_v25  ;;  %v729_v29 = vshrl.u32 %v728_v27, 7  ;;  %v3081_v30 = vmov 1934713408   ;;  %v3082_v49 = vmov 0   ;;  %s3083_s26 = smov 64  }
 0x151   : > { %v3341_v13 = vld [vmem:[#allocation2] sm:$0xff]  ;;  %2534 = vmatprep.subr.bf16.mxu0 %v3074_v11  ;;  %2542 = vmatprep.mubr.msk.bf16.mxu1 %vm3075_vm3, %v3074_v11  ;;  %v743_v31 = vunpack.c.l.s4 %v3081_v30  ;;  %vm1230_vm5 = vcmask 64512   ;;  %s3084_s28 = smov 16   ;;  %s3085_s30 = smov 8   ;;  %vm1992_vm6 = vcmask 130048   ;;  %vm1994_vm7 = vcmask 195584  }
 0x152   : > { %v649_v14 = vpack.c.bf16 %v3341_v13, %v3341_v13  ;;  %v727_v28 = vunpack.c.0.s8 %v726_v26  ;;  %s3086_s15 = smov 24   ;;  %vm2210_vm8 = vcmask 523264   ;;  %p2489_p13 = scmp.ne.s32.totalorder %s3046_s21, 1 }
 0x153   : > { %v744_v34 = vunpack.c.0.s8 %v743_v31 }
 0x154   : > { %2535 = vmatpush3.bf16.msra.mxu0 %v2767_v12  ;;  %v3367_v32 = vsub.s32 %v727_v28, %v729_v29 }
 0x155   : > { %2546 = vmatprep.subr.bf16.mxu0 %v3074_v11  ;;  %v3377_v38 = vsub.s32 %v744_v34, %v729_v29 }
 0x157   : > { %2537 = vmatmul.mubr.msk.bf16.vlgmr.msra.gmra.mxu0 %vm673_vm4, %v649_v14 }
 0x158   : > { %2548 = vmatprep.mubr.msk.bf16.mxu0 %vm3075_vm3, %v3074_v11 }
 0x217   : > { %v711_v16 = vpop.f32.mrf.mxu0 }
 0x218   : > { %v712_v17 = vadd.f32 %v2457_v15, %v711_v16 }
 0x219   : > { %v2538_v18 = vpop.f32.mrf.mxu0 }
 0x21a   : > { %v3352_v19 = vpack.c.bf16 %v712_v17, %v712_v17 }
 0x21b   : > { %v714_v20 = vpop.f32.mrf.mxu0 }
 0x21c   : > { %723 = vrot.lane.b32.xlu1 %v3352_v19, %s3076_s17  ;;  %719 = vrot.lane.b32.xlu0 %v3352_v19, %s3077_s29  ;;  %v731_v37 = vrot.slane %v3352_v19, %v3367_v32 }
 0x21d   : > { %v2539_v21 = vpop.f32.mrf.mxu0 }
 0x220   : > { %886 = vrot.lane.b32.xlu1 %v3352_v19, %s3078_s18  ;;  %721 = vrot.lane.b32.xlu0 %v3352_v19, %s3079_s25 }
 0x28e   : > { %v3358_v22 = vpop.permute.xlu0 %719  ;;  %v3361_v23 = vpop.permute.xlu1 %723 }
 0x28f   : > { %888 = vrot.lane.b32.xlu0 %v3358_v22, %s3078_s18  ;;  %v773_v33 = vrot.slane %v3361_v23, %v3367_v32  ;;  %v765_v35 = vrot.slane %v3358_v22, %v3367_v32 }
 0x291   : > { %v774_v39 = vcombine.low %v765_v35, %v773_v33  ;;  %v775_v42 = vcombine.high %v765_v35, %v773_v33 }
 0x292   : > { %v3363_v24 = vpop.permute.xlu0 %721  ;;  %v887_v48 = vpop.permute.xlu1 %886 }
 0x293   : > { %892 = vrot.lane.b32.xlu0 %v3361_v23, %s3078_s18  ;;  %890 = vrot.lane.b32.xlu1 %v3363_v24, %s3078_s18  ;;  %v739_v36 = vrot.slane %v3363_v24, %v3367_v32  ;;  %v3380_v43 = vrot.slane %v774_v39, %v3377_v38  ;;  %v3389_v46 = vrot.slane %v775_v42, %v3377_v38 }
 0x294   : > { %v901_v55 = vrot.slane %v887_v48, %v3367_v32 }
 0x295   : > { %v740_v40 = vcombine.low %v731_v37, %v739_v36  ;;  %v741_v41 = vcombine.high %v731_v37, %v739_v36  ;;  %v790_v50 = vcombine.high %v3380_v43, %v3082_v49  ;;  %v791_v53 = vcombine.high %v3389_v46, %v3082_v49 }
 0x296   : > { %v797_v54 = vshrl.u32 %v3380_v43, 16  ;;  %v813_v58 = vshrl.u32 %v3389_v46, 16 }
 0x297   : > { %v3383_v44 = vrot.slane %v740_v40, %v3377_v38  ;;  %v3386_v45 = vrot.slane %v741_v41, %v3377_v38  ;;  %v805_v63 = vshrl.u32 %v790_v50, 16  ;;  %v821_v3 = vshrl.u32 %v791_v53, 16 }
 0x299   : > { %v756_v51 = vcombine.high %v3383_v44, %v3082_v49  ;;  %v757_v52 = vcombine.high %v3386_v45, %v3082_v49  ;;  %v796_v56 = vshrl.u32 %v3383_v44, 16  ;;  %v812_v59 = vshrl.u32 %v3386_v45, 16 }
 0x29a   : > { %v794_v4 = vpack.i.b16 %v3380_v43, %v3383_v44  ;;  %v810_v43 = vpack.i.b16 %v3389_v46, %v3386_v45 }
 0x29b   : > { %v804_v0 = vshrl.u32 %v756_v51, 16  ;;  %v820_v1 = vshrl.u32 %v757_v52, 16  ;;  %v798_v7 = vpack.i.b16 %v797_v54, %v796_v56  ;;  %v802_v8 = vpack.i.b16 %v790_v50, %v756_v51 }
 0x29c   : > { %v814_v12 = vpack.i.b16 %v813_v58, %v812_v59  ;;  %v818_v14 = vpack.i.b16 %v791_v53, %v757_v52  ;;  %v824_v58 = vcombine.low %v794_v4, %v810_v43 }
 0x29d   : > { %v806_v17 = vpack.i.b16 %v805_v63, %v804_v0  ;;  %v822_v18 = vpack.i.b16 %v821_v3, %v820_v1 }
 0x29e   : > { %v832_v53 = vcombine.low %v802_v8, %v818_v14  ;;  %v849_v56 = vcombine.low %v798_v7, %v814_v12  ;;  %v831_v3 = vrot.slane %v824_v58, %v3367_v32 }
 0x29f   : > { %v857_v52 = vcombine.low %v806_v17, %v822_v18 }
 0x2a0   : > { %v839_v63 = vrot.slane %v832_v53, %v3367_v32  ;;  %v856_v1 = vrot.slane %v849_v56, %v3367_v32 }
 0x2a1   : > { %v864_v46 = vrot.slane %v857_v52, %v3367_v32 }
 0x301   : > { %v889_v47 = vpop.permute.xlu0 %888 }
 0x302   : > { %v935_v60 = vrot.slane %v889_v47, %v3367_v32 }
 0x305   : > { %v893_v57 = vpop.permute.xlu0 %892  ;;  %v891_v61 = vpop.permute.xlu1 %890 }
 0x306   : > { %v943_v62 = vrot.slane %v893_v57, %v3367_v32  ;;  %v909_v2 = vrot.slane %v891_v61, %v3367_v32 }
 0x308   : > { %v944_v5 = vcombine.low %v935_v60, %v943_v62  ;;  %v945_v6 = vcombine.high %v935_v60, %v943_v62  ;;  %v910_v9 = vcombine.low %v901_v55, %v909_v2  ;;  %v911_v10 = vcombine.high %v901_v55, %v909_v2 }
 0x30a   : > { %v952_v15 = vrot.slane %v944_v5, %v3377_v38  ;;  %v959_v16 = vrot.slane %v945_v6, %v3377_v38  ;;  %v918_v20 = vrot.slane %v910_v9, %v3377_v38  ;;  %v925_v21 = vrot.slane %v911_v10, %v3377_v38 }
 0x30b   : > { %v865_v5 = vcombine.low %v856_v1, %v864_v46  ;;  %v840_v6 = vcombine.low %v831_v3, %v839_v63 }
 0x30c   : > { %v960_v25 = vcombine.high %v952_v15, %v3082_v49  ;;  %v961_v26 = vcombine.high %v959_v16, %v3082_v49  ;;  %v967_v27 = vshrl.u32 %v952_v15, 16  ;;  %v983_v28 = vshrl.u32 %v959_v16, 16 }
 0x30d   : > { %v926_v29 = vcombine.high %v918_v20, %v3082_v49  ;;  %v927_v30 = vcombine.high %v925_v21, %v3082_v49  ;;  %v966_v31 = vshrl.u32 %v918_v20, 16  ;;  %v982_v33 = vshrl.u32 %v925_v21, 16 }
 0x30e   : > { %v964_v34 = vpack.i.b16 %v952_v15, %v918_v20  ;;  %v975_v35 = vshrl.u32 %v960_v25, 16  ;;  %v980_v36 = vpack.i.b16 %v959_v16, %v925_v21  ;;  %v991_v37 = vshrl.u32 %v961_v26, 16 }
 0x30f   : > { %v974_v39 = vshrl.u32 %v926_v29, 16  ;;  %v990_v40 = vshrl.u32 %v927_v30, 16  ;;  %v968_v41 = vpack.i.b16 %v967_v27, %v966_v31  ;;  %v972_v42 = vpack.i.b16 %v960_v25, %v926_v29 }
 0x310   : > { %v984_v44 = vpack.i.b16 %v983_v28, %v982_v33  ;;  %v988_v47 = vpack.i.b16 %v961_v26, %v927_v30  ;;  %v994_v48 = vcombine.low %v964_v34, %v980_v36  ;;  %v872_v15 = vrot.slane %v865_v5, %v3377_v38 }
 0x311   : > { %v976_v50 = vpack.i.b16 %v975_v35, %v974_v39  ;;  %v992_v51 = vpack.i.b16 %v991_v37, %v990_v40  ;;  %v847_v18 = vrot.slane %v840_v6, %v3377_v38 }
 0x312   : > { %v1002_v54 = vcombine.low %v972_v42, %v988_v47  ;;  %v1019_v55 = vcombine.low %v968_v41, %v984_v44  ;;  %v1001_v59 = vrot.slane %v994_v48, %v3367_v32  ;;  %v878_v25 = vshrl.u32 %v872_v15, 16 }
 0x313   : > { %v1027_v57 = vcombine.low %v976_v50, %v992_v51  ;;  %v876_v27 = vpack.i.b16 %v872_v15, %v847_v18  ;;  %v877_v28 = vshrl.u32 %v847_v18, 16  ;;  %v873_v33 = vcombine.high %v872_v15, %v3082_v49 }
 0x314   : > { %v1009_v60 = vrot.slane %v1002_v54, %v3367_v32  ;;  %v1026_v61 = vrot.slane %v1019_v55, %v3367_v32  ;;  %v848_v35 = vcombine.high %v847_v18, %v3082_v49 }
 0x315   : > { %v1034_v45 = vrot.slane %v1027_v57, %v3367_v32  ;;  %v879_v31 = vpack.i.b16 %v878_v25, %v877_v28  ;;  %v884_v36 = vshrl.u32 %v873_v33, 16 }
 0x316   : > { %v1010_v62 = vcombine.low %v1001_v59, %v1009_v60  ;;  %v882_v37 = vpack.i.b16 %v873_v33, %v848_v35  ;;  %v883_v39 = vshrl.u32 %v848_v35, 16 }
 0x317   : > { %v1035_v0 = vcombine.low %v1026_v61, %v1034_v45 }
 0x318   : > { %v1017_v2 = vrot.slane %v1010_v62, %v3377_v38  ;;  %v885_v40 = vpack.i.b16 %v884_v36, %v883_v39 }
 0x319   : > { %v1042_v4 = vrot.slane %v1035_v0, %v3377_v38 }
 0x31a   : > { %v1047_v8 = vshrl.u32 %v1017_v2, 16  ;;  %v1018_v16 = vcombine.high %v1017_v2, %v3082_v49 }
 0x31b   : > { %v1046_v7 = vpack.i.b16 %v1042_v4, %v1017_v2  ;;  %v1048_v9 = vshrl.u32 %v1042_v4, 16  ;;  %v1043_v10 = vcombine.high %v1042_v4, %v3082_v49 }
 0x31c   : > { %v1053_v26 = vshrl.u32 %v1018_v16, 16 }
 0x31d   : > { %v1235_v12 = vsel %vm1230_vm5, %v1046_v7, 0  ;;  %v1049_v14 = vpack.i.b16 %v1048_v9, %v1047_v8  ;;  %v1054_v20 = vshrl.u32 %v1043_v10, 16  ;;  %v1052_v21 = vpack.i.b16 %v1043_v10, %v1018_v16 }
 0x31e   : > { %2541 = vmatpush3.bf16.xpose.msra.mxu1 %v1235_v12 }
 0x31f   : > { %v1281_v17 = vsel %vm1230_vm5, %v1049_v14, 0  ;;  %2552 = vmatprep.subr.bf16.mxu1 %v3074_v11  ;;  %v1055_v29 = vpack.i.b16 %v1054_v20, %v1053_v26  ;;  %v1327_v30 = vsel %vm1230_vm5, %v1052_v21, 0 }
 0x320   : > { %2547 = vmatpush3.bf16.xpose.msra.mxu0 %v1281_v17 }
 0x321   : > { %2558 = vmatprep.subr.bf16.mxu0 %v3074_v11  ;;  %v1373_v34 = vsel %vm1230_vm5, %v1055_v29, 0 }
 0x325   : > { %2543 = vmatmul.mubr.msk.bf16.vlgmr.msra.gmra.mxu1 %vm1230_vm5, %v876_v27 }
 0x326   : > { %2553 = vmatpush3.bf16.xpose.msra.mxu1 %v1327_v30  ;;  %2554 = vmatprep.mubr.msk.bf16.mxu1 %vm3075_vm3, %v3074_v11 }
 0x327   : > { %2549 = vmatmul.mubr.msk.bf16.vlgmr.msra.gmra.mxu0 %vm1230_vm5, %v879_v31  ;;  %2564 = vmatprep.subr.bf16.mxu1 %v3074_v11 }
 0x328   : > { %2559 = vmatpush3.bf16.xpose.msra.mxu0 %v1373_v34  ;;  %2560 = vmatprep.mubr.msk.bf16.mxu0 %vm3075_vm3, %v3074_v11 }
 0x329   : > { %2570 = vmatprep.subr.bf16.mxu0 %v3074_v11 }
 0x32d   : > { %2555 = vmatmul.mubr.msk.bf16.vlgmr.msra.gmra.mxu1 %vm1230_vm5, %v882_v37 }
 0x32e   : > { %2566 = vmatprep.mubr.msk.bf16.mxu1 %vm3075_vm3, %v3074_v11 }
 0x32f   : > { %2561 = vmatmul.mubr.msk.bf16.vlgmr.msra.gmra.mxu0 %vm1230_vm5, %v885_v40 }
 0x330   : > { %2572 = vmatprep.mubr.msk.bf16.mxu0 %vm3075_vm3, %v3074_v11 }
 0x3e5   : > { %v1271_v41 = vpop.f32.mrf.mxu1 }
 0x3e6   : > { %v1415_v42 = vmul.f32 0.35355338, %v1271_v41 }
 0x3e7   : > { %v2544_v43 = vpop.f32.mrf.mxu1  ;;  %v1317_v44 = vpop.f32.mrf.mxu0 }
 0x3e8   : > { %v1416_v47 = vmul.f32 0.35355338, %v1317_v44  ;;  %v1419_v48 = vsel %vm1230_vm5, %v1415_v42, -inf }
 0x3e9   : > { %1420 = vmax.xlane.f32.xlu1 %v1419_v48  ;;  %v1274_v50 = vpop.f32.mrf.mxu1  ;;  %v2550_v51 = vpop.f32.mrf.mxu0 }
 0x3ea   : > { %v1422_v52 = vsel %vm1230_vm5, %v1416_v47, -inf }
 0x3eb   : > { %v2545_v53 = vpop.f32.mrf.mxu1  ;;  %1423 = vmax.xlane.f32.xlu0 %v1422_v52  ;;  %v1320_v54 = vpop.f32.mrf.mxu0 }
 0x3ed   : > { %v2551_v55 = vpop.f32.mrf.mxu0  ;;  %v1363_v56 = vpop.f32.mrf.mxu1 }
 0x3ee   : > { %v1417_v57 = vmul.f32 0.35355338, %v1363_v56 }
 0x3ef   : > { %v2556_v58 = vpop.f32.mrf.mxu1  ;;  %v1409_v59 = vpop.f32.mrf.mxu0 }
 0x3f0   : > { %v1418_v60 = vmul.f32 0.35355338, %v1409_v59  ;;  %v1425_v61 = vsel %vm1230_vm5, %v1417_v57, -inf }
 0x3f1   : > { %v1366_v45 = vpop.f32.mrf.mxu1  ;;  %1426 = vmax.xlane.f32.xlu0 %v1425_v61  ;;  %v2562_v46 = vpop.f32.mrf.mxu0 }
 0x3f2   : > { %v1428_v62 = vsel %vm1230_vm5, %v1418_v60, -inf }
 0x3f3   : > { %v2557_v63 = vpop.f32.mrf.mxu1  ;;  %1429 = vmax.xlane.f32.xlu1 %v1428_v62  ;;  %v1412_v0 = vpop.f32.mrf.mxu0 }
 0x3f5   : > { %v2563_v1 = vpop.f32.mrf.mxu0 }
 0x404   : > { %1058 = vrot.lane.b32.xlu1 %v3358_v22, %s3083_s26 }
 0x407   : > { %1056 = vrot.lane.b32.xlu0 %v3352_v19, %s3083_s26 }
 0x408   : > { %1060 = vrot.lane.b32.xlu1 %v3363_v24, %s3083_s26 }
 0x40b   : > { %1062 = vrot.lane.b32.xlu0 %v3361_v23, %s3083_s26 }
 0x472   : > { %v1421_v2 = vpop.xlane.xlu1 %1420 }
 0x473   : > { %v1431_v3 = vsub.f32 %v1415_v42, %v1421_v2 }
 0x474   : > { %v1424_v4 = vpop.xlane.xlu0 %1423 }
 0x475   : > { %v1435_v5 = vmul.f32 1.442695, %v1431_v3  ;;  %v1432_v6 = vsub.f32 %v1416_v47, %v1424_v4 }
 0x477   : > { %2776 = vpow2.f32 %v1435_v5  ;;  %v1437_v7 = vmul.f32 1.442695, %v1432_v6 }
 0x479   : > { %2778 = vpow2.f32 %v1437_v7 }
 0x47a   : > { %v1427_v8 = vpop.xlane.xlu0 %1426 }
 0x47b   : > { %v1433_v9 = vsub.f32 %v1417_v57, %v1427_v8 }
 0x47c   : > { %v1430_v10 = vpop.xlane.xlu1 %1429 }
 0x47d   : > { %v1439_v12 = vmul.f32 1.442695, %v1433_v9  ;;  %v1434_v14 = vsub.f32 %v1418_v60, %v1430_v10 }
 0x47e   : > { %v1057_v16 = vpop.permute.xlu0 %1056 }
 0x47f   : > { %2780 = vpow2.f32 %v1439_v12  ;;  %v1441_v22 = vmul.f32 1.442695, %v1434_v14  ;;  %v1071_v29 = vrot.slane %v1057_v16, %v3367_v32 }
 0x480   : > { %v1059_v15 = vpop.permute.xlu1 %1058 }
 0x481   : > { %2782 = vpow2.f32 %v1441_v22  ;;  %v1105_v31 = vrot.slane %v1059_v15, %v3367_v32 }
 0x482   : > { %v1063_v26 = vpop.permute.xlu0 %1062 }
 0x483   : > { %v1113_v30 = vrot.slane %v1063_v26, %v3367_v32 }
 0x484   : > { %v3463_v19 = vpop.eup %2776  ;;  %v1061_v20 = vpop.permute.xlu1 %1060 }
 0x485   : > { %v1443_v23 = vsel %vm1230_vm5, %v3463_v19, 0.0  ;;  %v1079_v27 = vrot.slane %v1061_v20, %v3367_v32  ;;  %v1114_v35 = vcombine.low %v1105_v31, %v1113_v30  ;;  %v1115_v36 = vcombine.high %v1105_v31, %v1113_v30 }
 0x486   : > { %v3467_v24 = vpop.eup %2778  ;;  %1444 = vadd.xlane.f32.xlu1 %v1443_v23 }
 0x487   : > { %v1446_v17 = vsel %vm1230_vm5, %v3467_v24, 0.0  ;;  %v1080_v33 = vcombine.low %v1071_v29, %v1079_v27  ;;  %v1081_v34 = vcombine.high %v1071_v29, %v1079_v27  ;;  %v1122_v40 = vrot.slane %v1114_v35, %v3377_v38 }
 0x488   : > { %1447 = vadd.xlane.f32.xlu0 %v1446_v17  ;;  %v1129_v41 = vrot.slane %v1115_v36, %v3377_v38 }
 0x489   : > { %v1088_v37 = vrot.slane %v1080_v33, %v3377_v38  ;;  %v1095_v39 = vrot.slane %v1081_v34, %v3377_v38  ;;  %v1130_v44 = vcombine.high %v1122_v40, %v3082_v49  ;;  %v1137_v55 = vshrl.u32 %v1122_v40, 16 }
 0x48a   : > { %v1131_v47 = vcombine.high %v1129_v41, %v3082_v49  ;;  %v1153_v56 = vshrl.u32 %v1129_v41, 16 }
 0x48b   : > { %v1096_v42 = vcombine.high %v1088_v37, %v3082_v49  ;;  %v1097_v43 = vcombine.high %v1095_v39, %v3082_v49  ;;  %v1145_v51 = vshrl.u32 %v1130_v44, 16  ;;  %v1136_v53 = vshrl.u32 %v1088_v37, 16 }
 0x48c   : > { %v3471_v18 = vpop.eup %2780  ;;  %v1161_v52 = vshrl.u32 %v1131_v47, 16  ;;  %v1152_v54 = vshrl.u32 %v1095_v39, 16  ;;  %v1134_v46 = vpack.i.b16 %v1122_v40, %v1088_v37  ;;  %v1150_v62 = vpack.i.b16 %v1129_v41, %v1095_v39 }
 0x48d   : > { %v1449_v21 = vsel %vm1230_vm5, %v3471_v18, 0.0  ;;  %v1144_v48 = vshrl.u32 %v1096_v42, 16  ;;  %v1160_v50 = vshrl.u32 %v1097_v43, 16  ;;  %v1138_v59 = vpack.i.b16 %v1137_v55, %v1136_v53 }
 0x48e   : > { %v3475_v25 = vpop.eup %2782  ;;  %1450 = vadd.xlane.f32.xlu0 %v1449_v21  ;;  %v1142_v60 = vpack.i.b16 %v1130_v44, %v1096_v42  ;;  %v1154_v61 = vpack.i.b16 %v1153_v56, %v1152_v54  ;;  %v1158_v45 = vpack.i.b16 %v1131_v47, %v1097_v43  ;;  %v1164_v2 = vcombine.low %v1134_v46, %v1150_v62 }
 0x48f   : > { %v1452_v28 = vsel %vm1230_vm5, %v3475_v25, 0.0  ;;  %v1146_v57 = vpack.i.b16 %v1145_v51, %v1144_v48  ;;  %v1162_v58 = vpack.i.b16 %v1161_v52, %v1160_v50 }
 0x490   : > { %1453 = vadd.xlane.f32.xlu1 %v1452_v28  ;;  %v1172_v0 = vcombine.low %v1142_v60, %v1158_v45  ;;  %v1189_v1 = vcombine.low %v1138_v59, %v1154_v61  ;;  %v1171_v6 = vrot.slane %v1164_v2, %v3367_v32 }
 0x491   : > { %v1197_v63 = vcombine.low %v1146_v57, %v1162_v58 }
 0x492   : > { %v1179_v4 = vrot.slane %v1172_v0, %v3367_v32  ;;  %v1196_v5 = vrot.slane %v1189_v1, %v3367_v32 }
 0x493   : > { %v1204_v3 = vrot.slane %v1197_v63, %v3367_v32 }
 0x494   : > { %v1180_v8 = vcombine.low %v1171_v6, %v1179_v4 }
 0x495   : > { %v1205_v7 = vcombine.low %v1196_v5, %v1204_v3 }
 0x496   : > { %v1187_v10 = vrot.slane %v1180_v8, %v3377_v38 }
 0x497   : > { %v1212_v9 = vrot.slane %v1205_v7, %v3377_v38 }
 0x498   : > { %v1218_v23 = vshrl.u32 %v1187_v10, 16  ;;  %v1188_v15 = vcombine.high %v1187_v10, %v3082_v49 }
 0x499   : > { %v1219_v12 = vshrl.u32 %v1212_v9, 16  ;;  %v1213_v14 = vcombine.high %v1212_v9, %v3082_v49  ;;  %v1216_v22 = vpack.i.b16 %v1212_v9, %v1187_v10 }
 0x49a   : > { %v1226_v21 = vshrl.u32 %v1188_v15, 16 }
 0x49b   : > { %v1220_v16 = vpack.i.b16 %v1219_v12, %v1218_v23  ;;  %v1227_v17 = vshrl.u32 %v1213_v14, 16  ;;  %v1224_v20 = vpack.i.b16 %v1213_v14, %v1188_v15 }
 0x49d   : > { %v1228_v26 = vpack.i.b16 %v1227_v17, %v1226_v21  ;;  %v2768_v17 = vld [vmem:[%s3649_s5 + $0x8] sm:$0xff]  }
 0x4bb   : > { %1467 = vxpose.xlu0.c.b16.start.end [1/1] (short) (narrow) %v1216_v22, 16 }
 0x4bd   : > { %1529 = vxpose.xlu1.c.b16.start.end [1/1] (short) (narrow) %v1220_v16, 16 }
 0x4bf   : > { %1591 = vxpose.xlu0.c.b16.start.end [1/1] (short) (narrow) %v1224_v20, 16 }
 0x4c1   : > { %1653 = vxpose.xlu1.c.b16.start.end [1/1] (short) (narrow) %v1228_v26, 16 }
 0x50f   : > { %v1445_v27 = vpop.xlane.xlu1 %1444 }
 0x510   : > { %2784 = vrcp.f32 %v1445_v27 }
 0x511   : > { %v1448_v28 = vpop.xlane.xlu0 %1447 }
 0x512   : > { %2786 = vrcp.f32 %v1448_v28 }
 0x517   : > { %v1451_v29 = vpop.xlane.xlu0 %1450 }
 0x518   : > { %2788 = vrcp.f32 %v1451_v29 }
 0x519   : > { %v1454_v30 = vpop.xlane.xlu1 %1453 }
 0x51a   : > { %2790 = vrcp.f32 %v1454_v30 }
 0x51d   : > { %v2785_v31 = vpop.eup %2784  ;;  %v1475_v43 = vpop.trf.xlu0 }
 0x51e   : > { %v1459_v49 = vmul.f32 %v2785_v31, %v3463_v19 }
 0x51f   : > { %v2787_v33 = vpop.eup %2786  ;;  %v1537_v47 = vpop.trf.xlu1 }
 0x520   : > { %v1463_v34 = vpack.c.bf16 %v1459_v49, %v1459_v49  ;;  %v1460_v35 = vmul.f32 %v2787_v33, %v3467_v24  ;;  %v2769_v49 = vld [vmem:[%s3649_s5] sm:$0xff]  }
 0x522   : > { %v1487_v36 = vsel %vm1230_vm5, %v1463_v34, 0  ;;  %v1464_v37 = vpack.c.bf16 %v1460_v35, %v1460_v35 }
 0x523   : > { %2565 = vmatpush3.bf16.xpose.msra.mxu1 %v1487_v36 }
 0x524   : > { %2576 = vmatprep.subr.bf16.mxu1 %v3074_v11  ;;  %v1549_v40 = vsel %vm1230_vm5, %v1464_v37, 0 }
 0x525   : > { %v2789_v39 = vpop.eup %2788  ;;  %2571 = vmatpush3.bf16.xpose.msra.mxu0 %v1549_v40 }
 0x526   : > { %v1461_v41 = vmul.f32 %v2789_v39, %v3471_v18  ;;  %2582 = vmatprep.subr.bf16.mxu0 %v3074_v11  ;;  %v1599_v18 = vpop.trf.xlu0 }
 0x527   : > { %v2791_v42 = vpop.eup %2790 }
 0x528   : > { %v1465_v19 = vpack.c.bf16 %v1461_v41, %v1461_v41  ;;  %v1462_v44 = vmul.f32 %v2791_v42, %v3475_v25  ;;  %v1661_v25 = vpop.trf.xlu1 }
 0x52a   : > { %2567 = vmatmul.mubr.msk.bf16.vlgmr.msra.gmra.mxu1 %vm1230_vm5, %v1475_v43  ;;  %v1611_v24 = vsel %vm1230_vm5, %v1465_v19, 0  ;;  %v1466_v48 = vpack.c.bf16 %v1462_v44, %v1462_v44 }
 0x52b   : > { %2577 = vmatpush3.bf16.xpose.msra.mxu1 %v1611_v24  ;;  %2578 = vmatprep.mubr.msk.bf16.mxu1 %vm3075_vm3, %v3074_v11 }
 0x52c   : > { %v1673_v50 = vsel %vm1230_vm5, %v1466_v48, 0  ;;  %2588 = vmatprep.subr.bf16.mxu1 %v3074_v11  ;;  %2573 = vmatmul.mubr.msk.bf16.vlgmr.msra.gmra.mxu0 %vm1230_vm5, %v1537_v47 }
 0x52d   : > { %2583 = vmatpush3.bf16.xpose.msra.mxu0 %v1673_v50  ;;  %2584 = vmatprep.mubr.msk.bf16.mxu0 %vm3075_vm3, %v3074_v11 }
 0x52e   : > { %2596 = vmatprep.subr.bf16.mxu0 %v3074_v11 }
 0x532   : > { %2579 = vmatmul.mubr.msk.bf16.vlgmr.msra.gmra.mxu1 %vm1230_vm5, %v1599_v18 }
 0x533   : > { %2592 = vmatprep.mubr.msk.bf16.mxu1 %vm3075_vm3, %v3074_v11  ;;  %2589 = vmatpush3.bf16.msra.mxu1 %v2768_v17 }
 0x534   : > { %2585 = vmatmul.mubr.msk.bf16.vlgmr.msra.gmra.mxu0 %vm1230_vm5, %v1661_v25  ;;  %2590 = vmatprep.subr.bf16.mxu1 %v3074_v11 }
 0x535   : > { %2600 = vmatprep.mubr.msk.bf16.mxu0 %vm3075_vm3, %v3074_v11 }
 0x537   : > { %2591 = vmatpush3.bf16.msra.mxu1 %v2769_v49 }
 0x538   : > { %2604 = vmatprep.subr.bf16.mxu1 %v3074_v11 }
 0x5ea   : > { %v1523_v51 = vpop.f32.mrf.mxu1 }
 0x5eb   : > { %1715 = vxpose.xlu0.b32.start.end [1/1] (short) (narrow) %v1523_v51, 8 }
 0x5ec   : > { %v2568_v52 = vpop.f32.mrf.mxu1  ;;  %v1585_v53 = vpop.f32.mrf.mxu0 }
 0x5ed   : > { %1747 = vxpose.xlu1.b32.start.end [1/1] (short) (narrow) %v1585_v53, 8 }
 0x5ee   : > { %v1526_v54 = vpop.f32.mrf.mxu1  ;;  %v2574_v55 = vpop.f32.mrf.mxu0 }
 0x5ef   : > { %v2471_v54 = vld [vmem:[#allocation9] ss:$0 sm:$0xff] }
 0x5f0   : > { %v2569_v56 = vpop.f32.mrf.mxu1  ;;  %v1588_v57 = vpop.f32.mrf.mxu0 }
 0x5f2   : > { %v1647_v58 = vpop.f32.mrf.mxu1  ;;  %v2575_v59 = vpop.f32.mrf.mxu0 }
 0x5f3   : > { %1779 = vxpose.xlu0.b32.start.end [1/1] (short) (narrow) %v1647_v58, 8 }
 0x5f4   : > { %v2580_v60 = vpop.f32.mrf.mxu1  ;;  %v1709_v61 = vpop.f32.mrf.mxu0 }
 0x5f6   : > { %v1650_v45 = vpop.f32.mrf.mxu1  ;;  %v2586_v46 = vpop.f32.mrf.mxu0 }
 0x5f7   : > { %1811 = vxpose.xlu0.b32.start.end [1/1] (short) (narrow) %v1709_v61, 8 }
 0x5f8   : > { %v2581_v62 = vpop.f32.mrf.mxu1  ;;  %v1712_v63 = vpop.f32.mrf.mxu0 }
 0x5fa   : > { %v2587_v0 = vpop.f32.mrf.mxu0 }
 0x667   : > { %v1731_v1 = vpop.trf.xlu0 }
 0x669   : > { %v1763_v3 = vpop.trf.xlu1 }
 0x66f   : > { %v1795_v2 = vpop.trf.xlu0 }
 0x670   : > { %v1843_v4 = vcombine.low %v1731_v1, %v1795_v2  ;;  %v1844_v5 = vcombine.high %v1731_v1, %v1795_v2  ;;  %v2770_v1 = vld [vmem:[%s3653_s9 + $0x8] sm:$0xff]  }
 0x671   : > { %2597 = vmatpush3.bf16.msra.mxu0 %v2770_v1 }
 0x672   : > { %v1851_v9 = vrot.slane %v1843_v4, %v3367_v32  ;;  %v1858_v10 = vrot.slane %v1844_v5, %v3367_v32  ;;  %2598 = vmatprep.subr.bf16.mxu0 %v3074_v11 }
 0x673   : > { %v1827_v6 = vpop.trf.xlu0 }
 0x674   : > { %v1859_v7 = vcombine.low %v1763_v3, %v1827_v6  ;;  %v1860_v8 = vcombine.high %v1763_v3, %v1827_v6  ;;  %v2475_v6 = vld [vmem:[#allocation11] ss:$0 sm:$0xff] }
 0x676   : > { %v1867_v12 = vrot.slane %v1859_v7, %v3367_v32  ;;  %v1874_v14 = vrot.slane %v1860_v8, %v3367_v32  ;;  %v2476_v8 = vld [vmem:[#allocation12] ss:$0 sm:$0xff] }
 0x678   : > { %v1875_v22 = vcombine.low %v1851_v9, %v1867_v12  ;;  %v1876_v23 = vcombine.high %v1851_v9, %v1867_v12  ;;  %v1891_v15 = vcombine.low %v1858_v10, %v1874_v14  ;;  %v1892_v16 = vcombine.high %v1858_v10, %v1874_v14  ;;  %v2772_v14 = vld [vmem:[%s3655_s11 + $0x18] sm:$0xff]  }
 0x67a   : > { %v1883_v20 = vrot.slane %v1875_v22, %v3377_v38  ;;  %v1890_v21 = vrot.slane %v1876_v23, %v3377_v38  ;;  %v1899_v26 = vrot.slane %v1891_v15, %v3377_v38  ;;  %v1906_v27 = vrot.slane %v1892_v16, %v3377_v38  ;;  %v2773_v22 = vld [vmem:[%s3655_s11 + $0x10] sm:$0xff]   ;;  %v2774_v23 = vld [vmem:[%s3655_s11 + $0x8] sm:$0xff]   ;;  %v2775_v15 = vld [vmem:[%s3655_s11] sm:$0xff]  }
 0x67b   : > { %v2477_v16 = vld [vmem:[%s3654_s10] ss:$0 sm:$0xff] }
 0x67c   : > { %v1911_v28 = vcombine.low %v1883_v20, %v1890_v21  ;;  %v2469_v29 = vcombine.high %v1883_v20, %v1890_v21  ;;  %v1927_v30 = vcombine.low %v1899_v26, %v1906_v27  ;;  %v2470_v31 = vcombine.high %v1899_v26, %v1906_v27 }
 0x67e   : > { %v1918_v33 = vrot.slane %v1911_v28, %v3367_v32  ;;  %v1926_v34 = vrot.slane %v2469_v29, %v3367_v32  ;;  %v1934_v35 = vrot.slane %v1927_v30, %v3367_v32  ;;  %v1942_v36 = vrot.slane %v2470_v31, %v3367_v32 }
 0x680   : > { %v1944_v37 = vcombine.high %v1918_v33, %v1926_v34  ;;  %v1960_v39 = vcombine.high %v1934_v35, %v1942_v36  ;;  %v1943_v40 = vcombine.low %v1918_v33, %v1926_v34  ;;  %v1959_v41 = vcombine.low %v1934_v35, %v1942_v36 }
 0x682   : > { %v1958_v42 = vrot.slane %v1944_v37, %v3377_v38  ;;  %v1974_v43 = vrot.slane %v1960_v39, %v3377_v38  ;;  %v1951_v19 = vrot.slane %v1943_v40, %v3377_v38  ;;  %v1967_v44 = vrot.slane %v1959_v41, %v3377_v38  ;;  %v2481_v37 = vld [vmem:[%s3656_s12] ss:$0 sm:$0xff] }
 0x684   : > { %v1977_v24 = vcombine.low %v1958_v42, %v1974_v43  ;;  %v1976_v47 = vcombine.high %v1951_v19, %v1967_v44  ;;  %v1975_v48 = vcombine.low %v1951_v19, %v1967_v44  ;;  %v1978_v32 = vcombine.high %v1958_v42, %v1974_v43 }
 0x686   : > { %1984 = vrot.lane.b32.xlu0 %v1977_v24, %s3084_s28  ;;  %1980 = vrot.lane.b32.xlu1 %v1976_v47, %s3085_s30 }
 0x68a   : > { %1988 = vrot.lane.b32.xlu1 %v1978_v32, %s3086_s15 }
 0x6f8   : > { %v1981_v50 = vpop.permute.xlu1 %1980  ;;  %v1985_v18 = vpop.permute.xlu0 %1984 }
 0x6f9   : > { %v1991_v25 = vsel %vm1230_vm5, %v1975_v48, %v1981_v50 }
 0x6fa   : > { %v1993_v52 = vsel %vm1992_vm6, %v1991_v25, %v1985_v18 }
 0x6fc   : > { %v1989_v51 = vpop.permute.xlu1 %1988 }
 0x6fd   : > { %v1995_v53 = vsel %vm1994_vm7, %v1993_v52, %v1989_v51 }
 0x6fe   : > { %v1996_v38 = vpack.c.bf16 %v1995_v53, %v1995_v53  ;;  %v2487_v53 = vld [vmem:[%s3657_s13] ss:$0 sm:$0xff] }
 0x700   : > { %2593 = vmatmul.mubr.msk.bf16.vlgmr.msra.gmra.mxu1 %vm673_vm4, %v1996_v38 }
 0x701   : > { %2612 = vmatprep.mubr.msk.bf16.mxu1 %vm3075_vm3, %v3074_v11  ;;  %2605 = vmatpush3.bf16.msra.mxu1 %v2772_v14 }
 0x702   : > { %2606 = vmatprep.subr.bf16.mxu1 %v3074_v11 }
 0x705   : > { %2607 = vmatpush3.bf16.msra.mxu1 %v2773_v22 }
 0x706   : > { %2608 = vmatprep.subr.bf16.mxu1 %v3074_v11 }
 0x709   : > { %2609 = vmatpush3.bf16.msra.mxu1 %v2774_v23 }
 0x70a   : > { %2610 = vmatprep.subr.bf16.mxu1 %v3074_v11 }
 0x70d   : > { %2611 = vmatpush3.bf16.msra.mxu1 %v2775_v15 }
 0x7c0   : > { %v2057_v55 = vpop.f32.mrf.mxu1 }
 0x7c1   : > { %v2058_v56 = vadd.f32 %v2471_v54, %v2057_v55  ;;  %v2488_v54 = vld [vmem:[%s3658_s14] ss:$0 sm:$0xff] }
 0x7c2   : > { %v2594_v57 = vpop.f32.mrf.mxu1 }
 0x7c3   : > { %v2063_v58 = vadd.f32 %v2058_v56, %v3341_v13  ;;  %v2771_v13 = vld [vmem:[%s3653_s9] sm:$0xff]  }
 0x7c4   : > { %v2060_v59 = vpop.f32.mrf.mxu1  ;;  %2599 = vmatpush3.bf16.msra.mxu0 %v2771_v13 }
 0x7c5   : > { %v2066_v60 = vsel %vm673_vm4, %v2063_v58, 0.0 }
 0x7c6   : > { %2067 = vadd.xlane.f32.xlu1 %v2066_v60  ;;  %v2595_v61 = vpop.f32.mrf.mxu1 }
 0x84f   : > { %v2068_v45 = vpop.xlane.xlu1 %2067 }
 0x850   : > { %v2070_v46 = vmul.f32 0.03125, %v2068_v45 }
 0x852   : > { %v2071_v62 = vsub.f32 %v2063_v58, %v2070_v46 }
 0x854   : > { %v2072_v63 = vmul.f32 %v2071_v62, %v2071_v62 }
 0x856   : > { %v2073_v0 = vsel %vm673_vm4, %v2072_v63, 0.0 }
 0x857   : > { %2074 = vadd.xlane.f32.xlu0 %v2073_v0 }
 0x8e0   : > { %v2075_v2 = vpop.xlane.xlu0 %2074 }
 0x8e1   : > { %v2076_v3 = vmul.f32 0.03125, %v2075_v2 }
 0x8e3   : > { %v2077_v4 = vadd.f32 1e-12, %v2076_v3 }
 0x8e5   : > { %2792 = vrsqrt.f32 %v2077_v4 }
 0x8f2   : > { %v2793_v5 = vpop.eup %2792 }
 0x8f3   : > { %v2079_v7 = vmul.f32 %v2793_v5, %v2071_v62 }
 0x8f5   : > { %v2086_v9 = vmul.f32 %v2475_v6, %v2079_v7 }
 0x8f7   : > { %v2093_v10 = vadd.f32 %v2476_v8, %v2086_v9 }
 0x8f9   : > { %v2094_v12 = vpack.c.bf16 %v2093_v10, %v2093_v10 }
 0x8fb   : > { %2601 = vmatmul.mubr.msk.bf16.vlgmr.msra.gmra.mxu0 %vm673_vm4, %v2094_v12 }
 0x9bb   : > { %v2155_v17 = vpop.f32.mrf.mxu0 }
 0x9bc   : > { %v2156_v20 = vadd.f32 %v2477_v16, %v2155_v17 }
 0x9bd   : > { %v2602_v21 = vpop.f32.mrf.mxu0 }
 0x9be   : > { %v2162_v26 = vmul.f32 0.044715, %v2156_v20  ;;  %v2161_v34 = vmul.f32 0.5, %v2156_v20 }
 0x9bf   : > { %v2158_v27 = vpop.f32.mrf.mxu0 }
 0x9c0   : > { %v2163_v28 = vmul.f32 %v2162_v26, %v2156_v20 }
 0x9c1   : > { %v2603_v29 = vpop.f32.mrf.mxu0 }
 0x9c2   : > { %v2164_v30 = vmul.f32 %v2163_v28, %v2156_v20 }
 0x9c4   : > { %v2165_v31 = vadd.f32 %v2164_v30, %v2156_v20 }
 0x9c6   : > { %v2166_v49 = vmul.f32 0.7978846, %v2165_v31 }
 0x9c8   : > { %2794 = vtanh.f32 %v2166_v49 }
 0x9d5   : > { %v2795_v33 = vpop.eup %2794 }
 0x9d6   : > { %v2168_v35 = vadd.f32 1.0, %v2795_v33 }
 0x9d8   : > { %v2169_v11 = vmul.f32 %v2168_v35, %v2161_v34 }
 0x9da   : > { %v2170_v36 = vpack.c.bf16 %v2169_v11, %v2169_v11 }
 0x9dc   : > { %2613 = vmatmul.mubr.msk.bf16.vlgmr.msra.gmra.mxu1 %vm2210_vm8, %v2170_v36 }
 0xa9c   : > { %v2248_v39 = vpop.f32.mrf.mxu1 }
 0xa9d   : > { %v2249_v40 = vadd.f32 %v2481_v37, %v2248_v39 }
 0xa9e   : > { %v2614_v41 = vpop.f32.mrf.mxu1 }
 0xa9f   : > { %v2254_v42 = vadd.f32 %v2249_v40, %v2093_v10 }
 0xaa0   : > { %v2251_v43 = vpop.f32.mrf.mxu1 }
 0xaa1   : > { %v2257_v19 = vsel %vm673_vm4, %v2254_v42, 0.0 }
 0xaa2   : > { %2258 = vadd.xlane.f32.xlu1 %v2257_v19  ;;  %v2615_v44 = vpop.f32.mrf.mxu1 }
 0xb2b   : > { %v2259_v24 = vpop.xlane.xlu1 %2258 }
 0xb2c   : > { %v2260_v47 = vmul.f32 0.03125, %v2259_v24 }
 0xb2e   : > { %v2261_v48 = vsub.f32 %v2254_v42, %v2260_v47 }
 0xb30   : > { %v2262_v32 = vmul.f32 %v2261_v48, %v2261_v48 }
 0xb32   : > { %v2263_v50 = vsel %vm673_vm4, %v2262_v32, 0.0 }
 0xb33   : > { %2264 = vadd.xlane.f32.xlu0 %v2263_v50 }
 0xbbc   : > { %v2265_v18 = vpop.xlane.xlu0 %2264 }
 0xbbd   : > { %v2266_v25 = vmul.f32 0.03125, %v2265_v18 }
 0xbbf   : > { %v2267_v51 = vadd.f32 1e-12, %v2266_v25 }
 0xbc1   : > { %2796 = vrsqrt.f32 %v2267_v51 }
 0xbce   : > { %v2797_v52 = vpop.eup %2796 }
 0xbcf   : > { %v2269_v38 = vmul.f32 %v2797_v52, %v2261_v48 }
 0xbd1   : > { %v2276_v55 = vmul.f32 %v2487_v53, %v2269_v38  ;;  %2288 = sbr.rel (%p2489_p13) target bundleno = 3031 (0xbd7), region = 112 }
 0xbd3   : > { %v2283_v56 = vadd.f32 %v2488_v54, %v2276_v55 }
 0xbd5   : > { %2284 = vst.msk [vmem:[#allocation2] sm:$0xff] %vm673_vm4, %v2283_v56 }
 0xbd6   : > { %2289 = vst.msk [vmem:[%s575_s24] sm:$0xff] %vm673_vm4, %v2283_v56 }
 0xbd7 PF: > { %s3698_s27 = sld [smem:[#allocation26_spill]]  ;;  %s2491_s28 = sshll.u32 %s3050_s22, 7 }
 0xbd8   : > { %s3699_s17 = sld [smem:[#allocation32_spill]]  ;;  %s2304_s18 = sshll.u32 %s575_s24, 4  ;;  %s2305_s18 = int_to_ptr.vmem [resolvable:$true] %s2304_s18 }
 0xbd9   : > { %s2291_s21 = scalar_lea.sflag [#allocation5], %s573_s6  ;;  %s2954_s25 = scalar_lea.vmem %s2305_s18, 128 }
 0xbda   : > { %p2955_p12 = scmp.ne.s32.totalorder %s2305_s18, %s2954_s25  ;;  %s3087_s26 = smov [#allocation14]  }
 0xbdb   : > { %s2958_s2 = sshll.u32 %s3087_s26, 4  ;;  %s2959_s2 = int_to_ptr.vmem [resolvable:$false] %s2958_s2 }
 0xbdc   : > { %s2960_s20 = scalar_lea.vmem %s2959_s2, 256  ;;  %p2961_p5 = scmp.lt.s32.totalorder %s2305_s18, %s2959_s2 }
 0xbdd   : > { %p3700_p2 = scmp.ne.s32.totalorder %s3698_s27, 0  ;;  %p2962_p9 = scmp.lt.s32.totalorder %s2960_s20, %s2954_s25 }
 0xbde   : > { %s2302_s29 = scalar_lea.hbm %s3699_s17, %s2491_s28 }
 0xbdf   : > { %p2956_p4 = pnand %p2955_p12, %p3700_p2  ;;  %p2963_p7 = por %p2962_p9, %p2961_p5 }
 0xbe1   : > { %p2957_p6 = pneg %p2956_p4 }
 0xbe3   : > { %p2964_p8 = pnand %p2963_p7, %p2957_p6 }
 0xbe5   : > { %2967 = shalt.err (!%p2964_p8)
}
 0xbe6   : > { %s2968_s22 = scalar_lea.hbm %s2302_s29, 128  ;;  %s2972_s24 = scalar_lea.hbm %s3699_s17, 256 }
 0xbe7   : > { %p2969_p10 = scmp.ne.s32.totalorder %s2302_s29, %s2968_s22  ;;  %p2973_p0 = scmp.lt.s32.totalorder %s2302_s29, %s3699_s17 }
 0xbe8   : > { %p2974_p1 = scmp.lt.s32.totalorder %s2972_s24, %s2968_s22 }
 0xbe9   : > { %p2970_p11 = pnand %p2969_p10, %p3700_p2 }
 0xbea   : > { %p2975_p13 = por %p2974_p1, %p2973_p0 }
 0xbeb   : > { %p2971_p3 = pneg %p2970_p11 }
 0xbed   : > { %p2976_p12 = pnand %p2975_p13, %p2971_p3 }
 0xbef   : > { %2979 = shalt.err (!%p2976_p12)
}
 0xbf0   : > { %2640 = dma.vmem_to_hbm [thread:$0]  (%p3700_p2), %s2305_s18, 128, %s2302_s29, %s2291_s21  }
 0xbf1 PF: > { %s3701_s30 = sld [smem:[#allocation24_spill]] }
 0xbf2   : > { %s3702_s15 = sld [smem:[#allocation20_spill]] }
 0xbf3   : > { %s3703_s25 = sld [smem:[#allocation28_spill]] }
 0xbf7   : > { %p2677_p4 = scmp.ge.s32.totalorder %s3701_s30, 2 }
 0xbf8   : > { %s2316_s26 = sand.u32 1, %s3702_s15  }
 0xbf9   : > { %p3704_p6 = scmp.ne.s32.totalorder %s3703_s25, 0  ;;  %s2317_s2 = scalar_lea.sflag [#allocation5], %s2316_s26 }
 0xbfb   : > { %p2662_p5 = pnand %p2677_p4, %p3704_p6 }
 0xbfd   : > { %p2663_p9 = pneg %p2662_p5 }
 0xbff   : > { %3029 = dma.done.wait (%p2663_p9), %s2317_s2, 128  }
 0xc00   : > { %3031 = vsyncadd (%p2663_p9), %s2317_s2, 4294967168  ;;  %s32_s25 = sadd.s32 1, %s3701_s30   ;;  %s3705_s20 = sld [smem:[#allocation21_spill]] }
 0xc01   : > { %p29_p7 = scmp.ge.s32.totalorder %s32_s25, 6   ;;  %s3706_s22 = sld [smem:[#allocation29_spill]] }
 0xc02   : > { %s3707_s21 = sld [smem:[#allocation22_spill]]  ;;  %s3711_s18 = smov %s3038_s19 }
 0xc03   : > { %s3708_s27 = sld [smem:[#allocation23_spill]] }
 0xc04   : > { %s3709_s23 = sld [smem:[#allocation25_spill]] }
 0xc05   : > { %s3710_s24 = sld [smem:[#allocation27_spill]]  ;;  %31 = sbr.rel (!%p29_p7) target bundleno = 13 (0xd), region = 148 }
 0xc06   : > { %s3712_s19 = smov %s3705_s20 }
 0xc07   : > { %s3713_s20 = smov %s3706_s22 }
 0xc09   : > { %s3714_s22 = smov %s3708_s27 }
 0xc0a   :  { %2322 = vsyncpa [#allocation4], 1 }
 0xc0b   :  { %2324 = vsyncpa [#allocation4 + $0x1], 1 }
 0xc0c   :  { %2325 = vsyncpa [#allocation7], 1 }
 0xc0d   :  { %2326 = vsyncpa [#allocation10], 1 }
 0xc0e   :  { %2327 = vsyncpa [#allocation13], 1 }
 0xc0f   :  { %2328 = vsyncpa [#allocation5], 1 }
 0xc10   :  { %2330 = vsyncpa [#allocation5 + $0x1], 1 }

// kernel: tpu_custom_call.1
= control target key start
LH: loop header
LB: loop body
LE: loop exit
PB: predicated region body
PF: predicated region fallthrough
CT: control target
= control target key end

     0   :  { %s3644_s0 = inlined_call_operand.vmem [shape: f32[2,8,16], index: 0, kind: input, shape index: {}]   ;;  %s3645_s1 = inlined_call_operand.hbm [shape: bf16[16,32], index: 1, kind: input, shape index: {}]   ;;  %s3646_s2 = inlined_call_operand.hbm [shape: f32[1,32], index: 2, kind: input, shape index: {}]   ;;  %s3647_s3 = inlined_call_operand.vmem [shape: bf16[1,32,96], index: 3, kind: input, shape index: {}]   ;;  %s3648_s4 = inlined_call_operand.hbm [shape: f32[1,1,96], index: 4, kind: input, shape index: {}]   ;;  %s3649_s5 = inlined_call_operand.vmem [shape: bf16[1,32,32], index: 5, kind: input, shape index: {}]   ;;  %s3650_s6 = inlined_call_operand.hbm [shape: f32[1,1,32], index: 6, kind: input, shape index: {}]   ;;  %s3651_s7 = inlined_call_operand.hbm [shape: f32[1,1,32], index: 7, kind: input, shape index: {}]   ;;  %s3652_s8 = inlined_call_operand.hbm [shape: f32[1,1,32], index: 8, kind: input, shape index: {}]   ;;  %s3653_s9 = inlined_call_operand.vmem [shape: bf16[1,32,64], index: 9, kind: input, shape index: {}]   ;;  %s3654_s10 = inlined_call_operand.vmem [shape: f32[1,1,64], index: 10, kind: input, shape index: {}]   ;;  %s3655_s11 = inlined_call_operand.vmem [shape: bf16[1,64,32], index: 11, kind: input, shape index: {}]   ;;  %s3656_s12 = inlined_call_operand.vmem [shape: f32[1,1,32], index: 12, kind: input, shape index: {}]   ;;  %s3657_s13 = inlined_call_operand.vmem [shape: f32[1,1,32], index: 13, kind: input, shape index: {}]   ;;  %s3658_s14 = inlined_call_operand.vmem [shape: f32[1,1,32], index: 14, kind: input, shape index: {}]   ;;  %s3659_s15 = inlined_call_operand.hbm [shape: f32[2,8,32], index: 15, kind: output, shape index: {}]  }
   0x1   :  { %3675 = sst [smem:[#allocation30_spill]] %s3646_s2 }
   0x2   :  { %3676 = sst [smem:[#allocation31_spill]] %s3650_s6 }
   0x3   :  { %3677 = sst [smem:[#allocation32_spill]] %s3659_s15 }
   0x4   :  { %20 = vsyncpa [#allocation4], 0 }
   0x5   :  { %21 = vsyncpa [#allocation7], 0 }
   0x6   :  { %22 = vsyncpa [#allocation10], 0 }
   0x7   :  { %23 = vsyncpa [#allocation13], 0 }
   0x8   :  { %24 = vsyncpa [#allocation5], 0 }
   0x9   :  { %26 = vsyncpa [#allocation5 + $0x1], 0  ;;  %s3168_s18 = smov 0   ;;  %s3170_s19 = smov 0  }
   0xa   :  { %s3172_s20 = smov 0   ;;  %s3174_s21 = smov 0  }
   0xb   :  { %s3176_s22 = smov 0   ;;  %s3178_s23 = smov 0  }
   0xc   :  { %s3180_s24 = smov 0   ;;  %s3182_s25 = smov 0  }
   0xd LB: > { %3678 = sst [smem:[#allocation20_spill]] %s3034_s18  ;;  %s2434_s26 = sadd.s32 4294967295, %s3062_s25   ;;  %s3062_s25 = sphi %s3182_s25, %s32_s25   ;;  %s3058_s24 = sphi %s3180_s24, %s3710_s24   ;;  %s3054_s23 = sphi %s3178_s23, %s3709_s23   ;;  %s3050_s22 = sphi %s3176_s22, %s3714_s22   ;;  %s3046_s21 = sphi %s3174_s21, %s3707_s21   ;;  %s3042_s20 = sphi %s3172_s20, %s3713_s20   ;;  %s3038_s19 = sphi %s3170_s19, %s3712_s19   ;;  %s3034_s18 = sphi %s3168_s18, %s3711_s18  }
   0xe   : > { %3679 = sst [smem:[#allocation21_spill]] %s3042_s20  ;;  %s2435_s27 = sadd.s32 4294967294, %s3062_s25  }
   0xf   : > { %3680 = sst [smem:[#allocation22_spill]] %s3054_s23  ;;  %s41_s28 = sadd.s32 1, %s3054_s23 }
  0x10   : > { %3681 = sst [smem:[#allocation23_spill]] %s3058_s24  ;;  %s44_s29 = sadd.s32 1, %s3058_s24 }
  0x11   : > { %3682 = sst [smem:[#allocation24_spill]] %s3062_s25  ;;  %p42_p0 = scmp.ge.s32.totalorder %s41_s28, 2 }
  0x12   : > { %s371_s30 = sadd.s32 1, %s3042_s20  ;;  %p381_p1 = scmp.ne.s32.totalorder %s3042_s20, %s3038_s19 }
  0x13   : > { %p382_p2 = scmp.eq.s32.totalorder %s2434_s26, 3  ;;  %s3716_s28 = smov (%p42_p0, %s41_s28), 0 }
  0x14   : > { %3683 = sst [smem:[#allocation25_spill]] %s3716_s28  ;;  %s3718_s29 = smov (!%p42_p0, %s44_s29), %s3058_s24 }
  0x15   : > { %p3218_p3 = por %p382_p2, %p381_p1  ;;  %p387_p4 = scmp.ne.s32.totalorder %s3038_s19, %s3034_s18 }
  0x16   : > { %p46_p5 = scmp.ge.s32.totalorder %s3718_s29, 2  ;;  %p388_p6 = scmp.eq.s32.totalorder %s2435_s27, 3 }
  0x17   : > { %s3684_s16 = scalar_select %p3218_p3, 1, 0 }
  0x18   : > { %p2436_p7 = scmp.ge.s32.totalorder %s3062_s25, 1  ;;  %p395_p8 = scmp.lt.s32.totalorder %s3062_s25, 5 }
  0x19   : > { %3685 = sst [smem:[#allocation26_spill]] %s3684_s16  ;;  %s3720_s29 = smov (%p46_p5, %s3718_s29), 0 }
  0x1a   : > { %3686 = sst [smem:[#allocation27_spill]] %s3720_s29  ;;  %p3228_p9 = por %p388_p6, %p387_p4 }
  0x1b   : > { %p3232_p10 = pnand %p2436_p7, %p395_p8  ;;  %s368_s28 = ssub.s32 %s3058_s24, %s3720_s29 }
  0x1c   : > { %s3687_s17 = scalar_select %p3228_p9, 1, 0 }
  0x1d   : > { %s3689_s23 = scalar_select %p3232_p10, 1, 0 }
  0x1e   : > { %3688 = sst [smem:[#allocation28_spill]] %s3687_s17  ;;  %p369_p11 = scmp.eq.s32.totalorder %s368_s28, 0 }
  0x1f   : > { %p2642_p12 = pneg %p3232_p10  ;;  %p3240_p13 = scmp.eq.s32.totalorder %s2434_s26, 0 }
  0x20   : > { %s3245_s18 = scalar_select %p369_p11, %s3042_s20, %s371_s30  }
  0x21   : > { %s3690_s27 = scalar_select %p3240_p13, 1, 0 }
  0x22   : > { %3691 = sst [smem:[#allocation29_spill]] %s3245_s18  ;;  %p3249_p0 = pnand %p3240_p13, %p2642_p12 }
  0x23   : > { %s3064_s17 = smov [#allocation6]   ;;  %s3065_s29 = smov [#allocation9]  }
  0x24   : > { %s421_s15 = sshll.u32 %s3064_s17, 4  ;;  %s449_s28 = sshll.u32 %s3065_s29, 4  ;;  %s422_s15 = int_to_ptr.vmem [resolvable:$true] %s421_s15  ;;  %s450_s28 = int_to_ptr.vmem [resolvable:$true] %s449_s28 }
  0x25   : > { %p3255_p1 = pneg %p3249_p0  ;;  %s2809_s24 = scalar_lea.vmem %s422_s15, 16 }
  0x26   : > { %p2810_p2 = scmp.ne.s32.totalorder %s422_s15, %s2809_s24  ;;  %s2816_s30 = scalar_lea.vmem %s422_s15, 32 }
  0x27   : > { %p2817_p6 = scmp.lt.s32.totalorder %s422_s15, %s422_s15  ;;  %p2818_p7 = scmp.lt.s32.totalorder %s2816_s30, %s2809_s24 }
  0x28   : > { %p2812_p4 = pnand %p2810_p2, %p3255_p1 }
  0x29   : > { %p2819_p8 = por %p2818_p7, %p2817_p6 }
  0x2a   : > { %p2813_p5 = pneg %p2812_p4 }
  0x2c   : > { %p2820_p11 = pnand %p2819_p8, %p2813_p5 }
  0x2e   : > { %2823 = shalt.err (!%p2820_p11)
}
  0x2f   : > { %s3694_s2 = sld [smem:[#allocation30_spill]]  ;;  %s2835_s18 = scalar_lea.vmem %s450_s28, 16 }
  0x30   : > { %p2836_p12 = scmp.ne.s32.totalorder %s450_s28, %s2835_s18  ;;  %s2842_s20 = scalar_lea.vmem %s450_s28, 32 }
  0x31   : > { %p2843_p4 = scmp.lt.s32.totalorder %s450_s28, %s450_s28  ;;  %p2844_p3 = scmp.lt.s32.totalorder %s2842_s20, %s2835_s18 }
  0x32   : > { %p2838_p9 = pnand %p2836_p12, %p3255_p1 }
  0x33   : > { %p2845_p13 = por %p2844_p3, %p2843_p4 }
  0x34   : > { %p2839_p2 = pneg %p2838_p9 }
  0x35   : > { %2648 = dma.hbm_to_vmem [thread:$0]  (!%p3249_p0), %s3694_s2, 16, %s422_s15, [#allocation7]  }
  0x36   : > { %p2846_p6 = pnand %p2845_p13, %p2839_p2 }
  0x38   : > { %2849 = shalt.err (!%p2846_p6)
}
  0x39   : > { %s3695_s6 = sld [smem:[#allocation31_spill]]  ;;  %s3066_s15 = smov [#allocation3]  }
  0x3a   : > { %s407_s29 = sshll.u32 %s3066_s15, 4  ;;  %s408_s29 = int_to_ptr.vmem [resolvable:$true] %s407_s29 }
  0x3b   : > { %s2861_s17 = scalar_lea.vmem %s408_s29, 128  ;;  %p2869_p8 = scmp.lt.s32.totalorder %s408_s29, %s408_s29 }
  0x3c   : > { %p2862_p5 = scmp.ne.s32.totalorder %s408_s29, %s2861_s17  ;;  %p2870_p11 = scmp.lt.s32.totalorder %s2861_s17, %s2861_s17 }
  0x3e   : > { %p2864_p9 = pnand %p2862_p5, %p3255_p1  ;;  %p2871_p3 = por %p2870_p11, %p2869_p8 }
  0x3f   : > { %2654 = dma.hbm_to_vmem [thread:$0]  (!%p3249_p0), %s3695_s6, 16, %s450_s28, [#allocation10]  }
  0x40   : > { %p2865_p7 = pneg %p2864_p9 }
  0x42   : > { %p2872_p13 = pnand %p2871_p3, %p2865_p7 }
  0x44   : > { %2875 = shalt.err (!%p2872_p13)
}
  0x45   : > { %s3067_s18 = smov 64   ;;  %s3068_s20 = smov 4  }
  0x46   : > { %2645 = dma.hbm_to_vmem [thread:$0]  (!%p3249_p0), %s3645_s1, 128, %s408_s29, [#allocation4], %s3067_s18, %s3067_s18, %s3068_s20  }
  0x47   : > { %s3069_s30 = smov [#allocation8]   ;;  %s3070_s2 = smov [#allocation11]  }
  0x48   : > { %s435_s15 = sshll.u32 %s3069_s30, 4  ;;  %s460_s6 = sshll.u32 %s3070_s2, 4  ;;  %s436_s15 = int_to_ptr.vmem [resolvable:$true] %s435_s15  ;;  %s461_s6 = int_to_ptr.vmem [resolvable:$true] %s460_s6 }
  0x49   : > { %s2887_s16 = scalar_lea.vmem %s436_s15, 16  ;;  %s2894_s17 = scalar_lea.vmem %s436_s15, 32 }
  0x4a   : > { %p2888_p12 = scmp.ne.s32.totalorder %s436_s15, %s2887_s16  ;;  %p2895_p6 = scmp.lt.s32.totalorder %s436_s15, %s436_s15 }
  0x4b   : > { %p2896_p5 = scmp.lt.s32.totalorder %s2894_s17, %s2887_s16 }
  0x4c   : > { %p2890_p2 = pnand %p2888_p12, %p3255_p1 }
  0x4d   : > { %p2897_p9 = por %p2896_p5, %p2895_p6 }
  0x4e   : > { %p2891_p4 = pneg %p2890_p2 }
  0x50   : > { %p2898_p7 = pnand %p2897_p9, %p2891_p4 }
  0x52   : > { %2901 = shalt.err (!%p2898_p7)
}
  0x53   : > { %2651 = dma.hbm_to_vmem [thread:$0]  (!%p3249_p0), %s3648_s4, 16, %s436_s15, [#allocation7]  }
  0x54   : > { %s2913_s2 = scalar_lea.vmem %s461_s6, 16  ;;  %s2920_s20 = scalar_lea.vmem %s461_s6, 32 }
  0x55   : > { %p2914_p8 = scmp.ne.s32.totalorder %s461_s6, %s2913_s2  ;;  %p2921_p13 = scmp.lt.s32.totalorder %s461_s6, %s461_s6 }
  0x56   : > { %p2922_p12 = scmp.lt.s32.totalorder %s2920_s20, %s2913_s2 }
  0x57   : > { %p2916_p11 = pnand %p2914_p8, %p3255_p1 }
  0x58   : > { %p2923_p2 = por %p2922_p12, %p2921_p13 }
  0x59   : > { %p2917_p3 = pneg %p2916_p11 }
  0x5b   : > { %p2924_p10 = pnand %p2923_p2, %p2917_p3 }
  0x5d   : > { %2927 = shalt.err (!%p2924_p10)
}
  0x5e   : > { %2657 = dma.hbm_to_vmem [thread:$0]  (!%p3249_p0), %s3651_s7, 16, %s461_s6, [#allocation10]  }
  0x5f   : > { %s3071_s28 = smov [#allocation12]  }
  0x60   : > { %s471_s30 = sshll.u32 %s3071_s28, 4  ;;  %s472_s30 = int_to_ptr.vmem [resolvable:$true] %s471_s30 }
  0x61   : > { %s2939_s15 = scalar_lea.vmem %s472_s30, 16  ;;  %s2946_s17 = scalar_lea.vmem %s472_s30, 32 }
  0x62   : > { %p2940_p4 = scmp.ne.s32.totalorder %s472_s30, %s2939_s15  ;;  %p2947_p9 = scmp.lt.s32.totalorder %s472_s30, %s472_s30 }
  0x63   : > { %p2948_p7 = scmp.lt.s32.totalorder %s2946_s17, %s2939_s15 }
  0x64   : > { %p2942_p6 = pnand %p2940_p4, %p3255_p1 }
  0x65   : > { %p2949_p8 = por %p2948_p7, %p2947_p9 }
  0x66   : > { %p2943_p5 = pneg %p2942_p6 }
  0x68   : > { %p2950_p10 = pnand %p2949_p8, %p2943_p5 }
  0x6a   : > { %2953 = shalt.err (!%p2950_p10)
}
  0x6b   : > { %2660 = dma.hbm_to_vmem [thread:$0]  (!%p3249_p0), %s3652_s8, 16, %s472_s30, [#allocation13]  }
  0x6c   : > { %p3696_p11 = scmp.ne.s32.totalorder %s3689_s23, 0 }
  0x6d   : > { %p3697_p3 = scmp.ne.s32.totalorder (!%p3696_p11), %s3690_s27, 0 }
  0x6e   : > { %509 = sbr.rel (%p3696_p11) target bundleno = 3057 (0xbf1), region = 80 }
  0x73   : > { %3013 = dma.done.wait (%p3697_p3), [#allocation4], 128  }
  0x74   : > { %3015 = vsyncadd (%p3697_p3), [#allocation4], 4294967168 }
  0x75   : > { %3017 = dma.done.wait (%p3697_p3), [#allocation7], 32  }
  0x76   : > { %3019 = vsyncadd (%p3697_p3), [#allocation7], 4294967264 }
  0x77   : > { %3021 = dma.done.wait (%p3697_p3), [#allocation10], 32  }
  0x78   : > { %3023 = vsyncadd (%p3697_p3), [#allocation10], 4294967264 }
  0x79   : > { %3025 = dma.done.wait (%p3697_p3), [#allocation13], 16  }
  0x7a   : > { %3027 = vsyncadd (%p3697_p3), [#allocation13], 4294967280  ;;  %s573_s6 = sand.u32 1, %s3038_s19   ;;  %p576_p0 = scmp.lt.s32.totalorder %s3050_s22, 1 }
  0x7b   : > { %s3323_s23 = sshll.u32 %s573_s6, 3  ;;  %p2453_p1 = scmp.ne.s32.totalorder %s3046_s21, 0 }
  0x7c   : > { %s577_s25 = scalar_select %p576_p0, %s3050_s22, 1 }
  0x7d   : > { %s575_s24 = scalar_lea.vmem [#allocation14], %s3323_s23  ;;  %584 = sbr.rel (%p2453_p1) target bundleno = 334 (0x14e), region = 108 }
  0x7e   : > { %s2452_s26 = sshll.u32 %s577_s25, 3 }
  0x7f   : > { %s579_s16 = scalar_lea.vmem %s3644_s0, %s2452_s26 }
  0x82   : > { %v2765_v0 = vld [vmem:[#allocation3] sm:$0xff]   ;;  %v3072_v1 = vmov 0.0   ;;  %v585_v2 = vld [vmem:[%s579_s16] sm:$0xff]  ;;  %vm3073_vm0 = vmmov 0   ;;  %vm602_vm1 = vcmask 130048   ;;  %vm646_vm2 = vcmask 261120  }
  0x83   : > { %2526 = vmatprep.subr.bf16.mxu0 %v3072_v1  ;;  %2528 = vmatprep.mubr.msk.bf16.mxu0 %vm3073_vm0, %v3072_v1  ;;  %v586_v3 = vpack.c.bf16 %v585_v2, %v585_v2  ;;  %v2454_v4 = vld [vmem:[#allocation6] ss:$0 sm:$0xff] }
  0x84   : > { %2527 = vmatpush3.bf16.msra.mxu0 %v2765_v0 }
  0x87   : > { %2529 = vmatmul.mubr.msk.bf16.vlgmr.msra.gmra.mxu0 %vm602_vm1, %v586_v3 }
 0x147   : > { %v640_v5 = vpop.f32.mrf.mxu0 }
 0x148   : > { %v641_v6 = vadd.f32 %v2454_v4, %v640_v5 }
 0x149   : > { %v2530_v7 = vpop.f32.mrf.mxu0 }
 0x14a   : > { %647 = vst.msk [vmem:[#allocation2] sm:$0xff] %vm646_vm2, %v641_v6 }
 0x14b   : > { %v643_v8 = vpop.f32.mrf.mxu0 }
 0x14d   : > { %v2531_v9 = vpop.f32.mrf.mxu0 }
 0x14e PF: > { %v2766_v10 = vld [vmem:[%s3647_s3 + $0x8] sm:$0xff]   ;;  %v3074_v11 = vmov 0.0   ;;  %v2767_v12 = vld [vmem:[%s3647_s3] sm:$0xff]   ;;  %vm3075_vm3 = vmmov 0   ;;  %vm673_vm4 = vcmask 261120   ;;  %s3076_s17 = smov 104   ;;  %v728_v27 = vlaneseq }
 0x14f   : > { %2532 = vmatprep.subr.bf16.mxu0 %v3074_v11  ;;  %2540 = vmatprep.subr.bf16.mxu1 %v3074_v11  ;;  %v2457_v15 = vld [vmem:[#allocation8] ss:$0 sm:$0xff]  ;;  %s3077_s29 = smov 120   ;;  %s3078_s18 = smov 96   ;;  %v3080_v25 = vmov 1983009808  }
 0x150   : > { %2533 = vmatpush3.bf16.msra.mxu0 %v2766_v10  ;;  %2536 = vmatprep.mubr.msk.bf16.mxu0 %vm3075_vm3, %v3074_v11  ;;  %s3079_s25 = smov 112   ;;  %v726_v26 = vunpack.c.l.s4 %v3080_v25  ;;  %v729_v29 = vshrl.u32 %v728_v27, 7  ;;  %v3081_v30 = vmov 1934713408   ;;  %v3082_v49 = vmov 0   ;;  %s3083_s26 = smov 64  }
 0x151   : > { %v3341_v13 = vld [vmem:[#allocation2] sm:$0xff]  ;;  %2534 = vmatprep.subr.bf16.mxu0 %v3074_v11  ;;  %2542 = vmatprep.mubr.msk.bf16.mxu1 %vm3075_vm3, %v3074_v11  ;;  %v743_v31 = vunpack.c.l.s4 %v3081_v30  ;;  %vm1230_vm5 = vcmask 64512   ;;  %s3084_s28 = smov 16   ;;  %s3085_s30 = smov 8   ;;  %vm1992_vm6 = vcmask 130048   ;;  %vm1994_vm7 = vcmask 195584  }
 0x152   : > { %v649_v14 = vpack.c.bf16 %v3341_v13, %v3341_v13  ;;  %v727_v28 = vunpack.c.0.s8 %v726_v26  ;;  %s3086_s15 = smov 24   ;;  %vm2210_vm8 = vcmask 523264   ;;  %p2489_p13 = scmp.ne.s32.totalorder %s3046_s21, 1 }
 0x153   : > { %v744_v34 = vunpack.c.0.s8 %v743_v31 }
 0x154   : > { %2535 = vmatpush3.bf16.msra.mxu0 %v2767_v12  ;;  %v3367_v32 = vsub.s32 %v727_v28, %v729_v29 }
 0x155   : > { %2546 = vmatprep.subr.bf16.mxu0 %v3074_v11  ;;  %v3377_v38 = vsub.s32 %v744_v34, %v729_v29 }
 0x157   : > { %2537 = vmatmul.mubr.msk.bf16.vlgmr.msra.gmra.mxu0 %vm673_vm4, %v649_v14 }
 0x158   : > { %2548 = vmatprep.mubr.msk.bf16.mxu0 %vm3075_vm3, %v3074_v11 }
 0x217   : > { %v711_v16 = vpop.f32.mrf.mxu0 }
 0x218   : > { %v712_v17 = vadd.f32 %v2457_v15, %v711_v16 }
 0x219   : > { %v2538_v18 = vpop.f32.mrf.mxu0 }
 0x21a   : > { %v3352_v19 = vpack.c.bf16 %v712_v17, %v712_v17 }
 0x21b   : > { %v714_v20 = vpop.f32.mrf.mxu0 }
 0x21c   : > { %723 = vrot.lane.b32.xlu1 %v3352_v19, %s3076_s17  ;;  %719 = vrot.lane.b32.xlu0 %v3352_v19, %s3077_s29  ;;  %v731_v37 = vrot.slane %v3352_v19, %v3367_v32 }
 0x21d   : > { %v2539_v21 = vpop.f32.mrf.mxu0 }
 0x220   : > { %886 = vrot.lane.b32.xlu1 %v3352_v19, %s3078_s18  ;;  %721 = vrot.lane.b32.xlu0 %v3352_v19, %s3079_s25 }
 0x28e   : > { %v3358_v22 = vpop.permute.xlu0 %719  ;;  %v3361_v23 = vpop.permute.xlu1 %723 }
 0x28f   : > { %888 = vrot.lane.b32.xlu0 %v3358_v22, %s3078_s18  ;;  %v773_v33 = vrot.slane %v3361_v23, %v3367_v32  ;;  %v765_v35 = vrot.slane %v3358_v22, %v3367_v32 }
 0x291   : > { %v774_v39 = vcombine.low %v765_v35, %v773_v33  ;;  %v775_v42 = vcombine.high %v765_v35, %v773_v33 }
 0x292   : > { %v3363_v24 = vpop.permute.xlu0 %721  ;;  %v887_v48 = vpop.permute.xlu1 %886 }
 0x293   : > { %892 = vrot.lane.b32.xlu0 %v3361_v23, %s3078_s18  ;;  %890 = vrot.lane.b32.xlu1 %v3363_v24, %s3078_s18  ;;  %v739_v36 = vrot.slane %v3363_v24, %v3367_v32  ;;  %v3380_v43 = vrot.slane %v774_v39, %v3377_v38  ;;  %v3389_v46 = vrot.slane %v775_v42, %v3377_v38 }
 0x294   : > { %v901_v55 = vrot.slane %v887_v48, %v3367_v32 }
 0x295   : > { %v740_v40 = vcombine.low %v731_v37, %v739_v36  ;;  %v741_v41 = vcombine.high %v731_v37, %v739_v36  ;;  %v790_v50 = vcombine.high %v3380_v43, %v3082_v49  ;;  %v791_v53 = vcombine.high %v3389_v46, %v3082_v49 }
 0x296   : > { %v797_v54 = vshrl.u32 %v3380_v43, 16  ;;  %v813_v58 = vshrl.u32 %v3389_v46, 16 }
 0x297   : > { %v3383_v44 = vrot.slane %v740_v40, %v3377_v38  ;;  %v3386_v45 = vrot.slane %v741_v41, %v3377_v38  ;;  %v805_v63 = vshrl.u32 %v790_v50, 16  ;;  %v821_v3 = vshrl.u32 %v791_v53, 16 }
 0x299   : > { %v756_v51 = vcombine.high %v3383_v44, %v3082_v49  ;;  %v757_v52 = vcombine.high %v3386_v45, %v3082_v49  ;;  %v796_v56 = vshrl.u32 %v3383_v44, 16  ;;  %v812_v59 = vshrl.u32 %v3386_v45, 16 }
 0x29a   : > { %v794_v4 = vpack.i.b16 %v3380_v43, %v3383_v44  ;;  %v810_v43 = vpack.i.b16 %v3389_v46, %v3386_v45 }
 0x29b   : > { %v804_v0 = vshrl.u32 %v756_v51, 16  ;;  %v820_v1 = vshrl.u32 %v757_v52, 16  ;;  %v798_v7 = vpack.i.b16 %v797_v54, %v796_v56  ;;  %v802_v8 = vpack.i.b16 %v790_v50, %v756_v51 }
 0x29c   : > { %v814_v12 = vpack.i.b16 %v813_v58, %v812_v59  ;;  %v818_v14 = vpack.i.b16 %v791_v53, %v757_v52  ;;  %v824_v58 = vcombine.low %v794_v4, %v810_v43 }
 0x29d   : > { %v806_v17 = vpack.i.b16 %v805_v63, %v804_v0  ;;  %v822_v18 = vpack.i.b16 %v821_v3, %v820_v1 }
 0x29e   : > { %v832_v53 = vcombine.low %v802_v8, %v818_v14  ;;  %v849_v56 = vcombine.low %v798_v7, %v814_v12  ;;  %v831_v3 = vrot.slane %v824_v58, %v3367_v32 }
 0x29f   : > { %v857_v52 = vcombine.low %v806_v17, %v822_v18 }
 0x2a0   : > { %v839_v63 = vrot.slane %v832_v53, %v3367_v32  ;;  %v856_v1 = vrot.slane %v849_v56, %v3367_v32 }
 0x2a1   : > { %v864_v46 = vrot.slane %v857_v52, %v3367_v32 }
 0x301   : > { %v889_v47 = vpop.permute.xlu0 %888 }
 0x302   : > { %v935_v60 = vrot.slane %v889_v47, %v3367_v32 }
 0x305   : > { %v893_v57 = vpop.permute.xlu0 %892  ;;  %v891_v61 = vpop.permute.xlu1 %890 }
 0x306   : > { %v943_v62 = vrot.slane %v893_v57, %v3367_v32  ;;  %v909_v2 = vrot.slane %v891_v61, %v3367_v32 }
 0x308   : > { %v944_v5 = vcombine.low %v935_v60, %v943_v62  ;;  %v945_v6 = vcombine.high %v935_v60, %v943_v62  ;;  %v910_v9 = vcombine.low %v901_v55, %v909_v2  ;;  %v911_v10 = vcombine.high %v901_v55, %v909_v2 }
 0x30a   : > { %v952_v15 = vrot.slane %v944_v5, %v3377_v38  ;;  %v959_v16 = vrot.slane %v945_v6, %v3377_v38  ;;  %v918_v20 = vrot.slane %v910_v9, %v3377_v38  ;;  %v925_v21 = vrot.slane %v911_v10, %v3377_v38 }
 0x30b   : > { %v865_v5 = vcombine.low %v856_v1, %v864_v46  ;;  %v840_v6 = vcombine.low %v831_v3, %v839_v63 }
 0x30c   : > { %v960_v25 = vcombine.high %v952_v15, %v3082_v49  ;;  %v961_v26 = vcombine.high %v959_v16, %v3082_v49  ;;  %v967_v27 = vshrl.u32 %v952_v15, 16  ;;  %v983_v28 = vshrl.u32 %v959_v16, 16 }
 0x30d   : > { %v926_v29 = vcombine.high %v918_v20, %v3082_v49  ;;  %v927_v30 = vcombine.high %v925_v21, %v3082_v49  ;;  %v966_v31 = vshrl.u32 %v918_v20, 16  ;;  %v982_v33 = vshrl.u32 %v925_v21, 16 }
 0x30e   : > { %v964_v34 = vpack.i.b16 %v952_v15, %v918_v20  ;;  %v975_v35 = vshrl.u32 %v960_v25, 16  ;;  %v980_v36 = vpack.i.b16 %v959_v16, %v925_v21  ;;  %v991_v37 = vshrl.u32 %v961_v26, 16 }
 0x30f   : > { %v974_v39 = vshrl.u32 %v926_v29, 16  ;;  %v990_v40 = vshrl.u32 %v927_v30, 16  ;;  %v968_v41 = vpack.i.b16 %v967_v27, %v966_v31  ;;  %v972_v42 = vpack.i.b16 %v960_v25, %v926_v29 }
 0x310   : > { %v984_v44 = vpack.i.b16 %v983_v28, %v982_v33  ;;  %v988_v47 = vpack.i.b16 %v961_v26, %v927_v30  ;;  %v994_v48 = vcombine.low %v964_v34, %v980_v36  ;;  %v872_v15 = vrot.slane %v865_v5, %v3377_v38 }
 0x311   : > { %v976_v50 = vpack.i.b16 %v975_v35, %v974_v39  ;;  %v992_v51 = vpack.i.b16 %v991_v37, %v990_v40  ;;  %v847_v18 = vrot.slane %v840_v6, %v3377_v38 }
 0x312   : > { %v1002_v54 = vcombine.low %v972_v42, %v988_v47  ;;  %v1019_v55 = vcombine.low %v968_v41, %v984_v44  ;;  %v1001_v59 = vrot.slane %v994_v48, %v3367_v32  ;;  %v878_v25 = vshrl.u32 %v872_v15, 16 }
 0x313   : > { %v1027_v57 = vcombine.low %v976_v50, %v992_v51  ;;  %v876_v27 = vpack.i.b16 %v872_v15, %v847_v18  ;;  %v877_v28 = vshrl.u32 %v847_v18, 16  ;;  %v873_v33 = vcombine.high %v872_v15, %v3082_v49 }
 0x314   : > { %v1009_v60 = vrot.slane %v1002_v54, %v3367_v32  ;;  %v1026_v61 = vrot.slane %v1019_v55, %v3367_v32  ;;  %v848_v35 = vcombine.high %v847_v18, %v3082_v49 }
 0x315   : > { %v1034_v45 = vrot.slane %v1027_v57, %v3367_v32  ;;  %v879_v31 = vpack.i.b16 %v878_v25, %v877_v28  ;;  %v884_v36 = vshrl.u32 %v873_v33, 16 }
 0x316   : > { %v1010_v62 = vcombine.low %v1001_v59, %v1009_v60  ;;  %v882_v37 = vpack.i.b16 %v873_v33, %v848_v35  ;;  %v883_v39 = vshrl.u32 %v848_v35, 16 }
 0x317   : > { %v1035_v0 = vcombine.low %v1026_v61, %v1034_v45 }
 0x318   : > { %v1017_v2 = vrot.slane %v1010_v62, %v3377_v38  ;;  %v885_v40 = vpack.i.b16 %v884_v36, %v883_v39 }
 0x319   : > { %v1042_v4 = vrot.slane %v1035_v0, %v3377_v38 }
 0x31a   : > { %v1047_v8 = vshrl.u32 %v1017_v2, 16  ;;  %v1018_v16 = vcombine.high %v1017_v2, %v3082_v49 }
 0x31b   : > { %v1046_v7 = vpack.i.b16 %v1042_v4, %v1017_v2  ;;  %v1048_v9 = vshrl.u32 %v1042_v4, 16  ;;  %v1043_v10 = vcombine.high %v1042_v4, %v3082_v49 }
 0x31c   : > { %v1053_v26 = vshrl.u32 %v1018_v16, 16 }
 0x31d   : > { %v1235_v12 = vsel %vm1230_vm5, %v1046_v7, 0  ;;  %v1049_v14 = vpack.i.b16 %v1048_v9, %v1047_v8  ;;  %v1054_v20 = vshrl.u32 %v1043_v10, 16  ;;  %v1052_v21 = vpack.i.b16 %v1043_v10, %v1018_v16 }
 0x31e   : > { %2541 = vmatpush3.bf16.xpose.msra.mxu1 %v1235_v12 }
 0x31f   : > { %v1281_v17 = vsel %vm1230_vm5, %v1049_v14, 0  ;;  %2552 = vmatprep.subr.bf16.mxu1 %v3074_v11  ;;  %v1055_v29 = vpack.i.b16 %v1054_v20, %v1053_v26  ;;  %v1327_v30 = vsel %vm1230_vm5, %v1052_v21, 0 }
 0x320   : > { %2547 = vmatpush3.bf16.xpose.msra.mxu0 %v1281_v17 }
 0x321   : > { %2558 = vmatprep.subr.bf16.mxu0 %v3074_v11  ;;  %v1373_v34 = vsel %vm1230_vm5, %v1055_v29, 0 }
 0x325   : > { %2543 = vmatmul.mubr.msk.bf16.vlgmr.msra.gmra.mxu1 %vm1230_vm5, %v876_v27 }
 0x326   : > { %2553 = vmatpush3.bf16.xpose.msra.mxu1 %v1327_v30  ;;  %2554 = vmatprep.mubr.msk.bf16.mxu1 %vm3075_vm3, %v3074_v11 }
 0x327   : > { %2549 = vmatmul.mubr.msk.bf16.vlgmr.msra.gmra.mxu0 %vm1230_vm5, %v879_v31  ;;  %2564 = vmatprep.subr.bf16.mxu1 %v3074_v11 }
 0x328   : > { %2559 = vmatpush3.bf16.xpose.msra.mxu0 %v1373_v34  ;;  %2560 = vmatprep.mubr.msk.bf16.mxu0 %vm3075_vm3, %v3074_v11 }
 0x329   : > { %2570 = vmatprep.subr.bf16.mxu0 %v3074_v11 }
 0x32d   : > { %2555 = vmatmul.mubr.msk.bf16.vlgmr.msra.gmra.mxu1 %vm1230_vm5, %v882_v37 }
 0x32e   : > { %2566 = vmatprep.mubr.msk.bf16.mxu1 %vm3075_vm3, %v3074_v11 }
 0x32f   : > { %2561 = vmatmul.mubr.msk.bf16.vlgmr.msra.gmra.mxu0 %vm1230_vm5, %v885_v40 }
 0x330   : > { %2572 = vmatprep.mubr.msk.bf16.mxu0 %vm3075_vm3, %v3074_v11 }
 0x3e5   : > { %v1271_v41 = vpop.f32.mrf.mxu1 }
 0x3e6   : > { %v1415_v42 = vmul.f32 0.35355338, %v1271_v41 }
 0x3e7   : > { %v2544_v43 = vpop.f32.mrf.mxu1  ;;  %v1317_v44 = vpop.f32.mrf.mxu0 }
 0x3e8   : > { %v1416_v47 = vmul.f32 0.35355338, %v1317_v44  ;;  %v1419_v48 = vsel %vm1230_vm5, %v1415_v42, -inf }
 0x3e9   : > { %1420 = vmax.xlane.f32.xlu1 %v1419_v48  ;;  %v1274_v50 = vpop.f32.mrf.mxu1  ;;  %v2550_v51 = vpop.f32.mrf.mxu0 }
 0x3ea   : > { %v1422_v52 = vsel %vm1230_vm5, %v1416_v47, -inf }
 0x3eb   : > { %v2545_v53 = vpop.f32.mrf.mxu1  ;;  %1423 = vmax.xlane.f32.xlu0 %v1422_v52  ;;  %v1320_v54 = vpop.f32.mrf.mxu0 }
 0x3ed   : > { %v2551_v55 = vpop.f32.mrf.mxu0  ;;  %v1363_v56 = vpop.f32.mrf.mxu1 }
 0x3ee   : > { %v1417_v57 = vmul.f32 0.35355338, %v1363_v56 }
 0x3ef   : > { %v2556_v58 = vpop.f32.mrf.mxu1  ;;  %v1409_v59 = vpop.f32.mrf.mxu0 }
 0x3f0   : > { %v1418_v60 = vmul.f32 0.35355338, %v1409_v59  ;;  %v1425_v61 = vsel %vm1230_vm5, %v1417_v57, -inf }
 0x3f1   : > { %v1366_v45 = vpop.f32.mrf.mxu1  ;;  %1426 = vmax.xlane.f32.xlu0 %v1425_v61  ;;  %v2562_v46 = vpop.f32.mrf.mxu0 }
 0x3f2   : > { %v1428_v62 = vsel %vm1230_vm5, %v1418_v60, -inf }
 0x3f3   : > { %v2557_v63 = vpop.f32.mrf.mxu1  ;;  %1429 = vmax.xlane.f32.xlu1 %v1428_v62  ;;  %v1412_v0 = vpop.f32.mrf.mxu0 }
 0x3f5   : > { %v2563_v1 = vpop.f32.mrf.mxu0 }
 0x404   : > { %1058 = vrot.lane.b32.xlu1 %v3358_v22, %s3083_s26 }
 0x407   : > { %1056 = vrot.lane.b32.xlu0 %v3352_v19, %s3083_s26 }
 0x408   : > { %1060 = vrot.lane.b32.xlu1 %v3363_v24, %s3083_s26 }
 0x40b   : > { %1062 = vrot.lane.b32.xlu0 %v3361_v23, %s3083_s26 }
 0x472   : > { %v1421_v2 = vpop.xlane.xlu1 %1420 }
 0x473   : > { %v1431_v3 = vsub.f32 %v1415_v42, %v1421_v2 }
 0x474   : > { %v1424_v4 = vpop.xlane.xlu0 %1423 }
 0x475   : > { %v1435_v5 = vmul.f32 1.442695, %v1431_v3  ;;  %v1432_v6 = vsub.f32 %v1416_v47, %v1424_v4 }
 0x477   : > { %2776 = vpow2.f32 %v1435_v5  ;;  %v1437_v7 = vmul.f32 1.442695, %v1432_v6 }
 0x479   : > { %2778 = vpow2.f32 %v1437_v7 }
 0x47a   : > { %v1427_v8 = vpop.xlane.xlu0 %1426 }
 0x47b   : > { %v1433_v9 = vsub.f32 %v1417_v57, %v1427_v8 }
 0x47c   : > { %v1430_v10 = vpop.xlane.xlu1 %1429 }
 0x47d   : > { %v1439_v12 = vmul.f32 1.442695, %v1433_v9  ;;  %v1434_v14 = vsub.f32 %v1418_v60, %v1430_v10 }
 0x47e   : > { %v1057_v16 = vpop.permute.xlu0 %1056 }
 0x47f   : > { %2780 = vpow2.f32 %v1439_v12  ;;  %v1441_v22 = vmul.f32 1.442695, %v1434_v14  ;;  %v1071_v29 = vrot.slane %v1057_v16, %v3367_v32 }
 0x480   : > { %v1059_v15 = vpop.permute.xlu1 %1058 }
 0x481   : > { %2782 = vpow2.f32 %v1441_v22  ;;  %v1105_v31 = vrot.slane %v1059_v15, %v3367_v32 }
 0x482   : > { %v1063_v26 = vpop.permute.xlu0 %1062 }
 0x483   : > { %v1113_v30 = vrot.slane %v1063_v26, %v3367_v32 }
 0x484   : > { %v3463_v19 = vpop.eup %2776  ;;  %v1061_v20 = vpop.permute.xlu1 %1060 }
 0x485   : > { %v1443_v23 = vsel %vm1230_vm5, %v3463_v19, 0.0  ;;  %v1079_v27 = vrot.slane %v1061_v20, %v3367_v32  ;;  %v1114_v35 = vcombine.low %v1105_v31, %v1113_v30  ;;  %v1115_v36 = vcombine.high %v1105_v31, %v1113_v30 }
 0x486   : > { %v3467_v24 = vpop.eup %2778  ;;  %1444 = vadd.xlane.f32.xlu1 %v1443_v23 }
 0x487   : > { %v1446_v17 = vsel %vm1230_vm5, %v3467_v24, 0.0  ;;  %v1080_v33 = vcombine.low %v1071_v29, %v1079_v27  ;;  %v1081_v34 = vcombine.high %v1071_v29, %v1079_v27  ;;  %v1122_v40 = vrot.slane %v1114_v35, %v3377_v38 }
 0x488   : > { %1447 = vadd.xlane.f32.xlu0 %v1446_v17  ;;  %v1129_v41 = vrot.slane %v1115_v36, %v3377_v38 }
 0x489   : > { %v1088_v37 = vrot.slane %v1080_v33, %v3377_v38  ;;  %v1095_v39 = vrot.slane %v1081_v34, %v3377_v38  ;;  %v1130_v44 = vcombine.high %v1122_v40, %v3082_v49  ;;  %v1137_v55 = vshrl.u32 %v1122_v40, 16 }
 0x48a   : > { %v1131_v47 = vcombine.high %v1129_v41, %v3082_v49  ;;  %v1153_v56 = vshrl.u32 %v1129_v41, 16 }
 0x48b   : > { %v1096_v42 = vcombine.high %v1088_v37, %v3082_v49  ;;  %v1097_v43 = vcombine.high %v1095_v39, %v3082_v49  ;;  %v1145_v51 = vshrl.u32 %v1130_v44, 16  ;;  %v1136_v53 = vshrl.u32 %v1088_v37, 16 }
 0x48c   : > { %v3471_v18 = vpop.eup %2780  ;;  %v1161_v52 = vshrl.u32 %v1131_v47, 16  ;;  %v1152_v54 = vshrl.u32 %v1095_v39, 16  ;;  %v1134_v46 = vpack.i.b16 %v1122_v40, %v1088_v37  ;;  %v1150_v62 = vpack.i.b16 %v1129_v41, %v1095_v39 }
 0x48d   : > { %v1449_v21 = vsel %vm1230_vm5, %v3471_v18, 0.0  ;;  %v1144_v48 = vshrl.u32 %v1096_v42, 16  ;;  %v1160_v50 = vshrl.u32 %v1097_v43, 16  ;;  %v1138_v59 = vpack.i.b16 %v1137_v55, %v1136_v53 }
 0x48e   : > { %v3475_v25 = vpop.eup %2782  ;;  %1450 = vadd.xlane.f32.xlu0 %v1449_v21  ;;  %v1142_v60 = vpack.i.b16 %v1130_v44, %v1096_v42  ;;  %v1154_v61 = vpack.i.b16 %v1153_v56, %v1152_v54  ;;  %v1158_v45 = vpack.i.b16 %v1131_v47, %v1097_v43  ;;  %v1164_v2 = vcombine.low %v1134_v46, %v1150_v62 }
 0x48f   : > { %v1452_v28 = vsel %vm1230_vm5, %v3475_v25, 0.0  ;;  %v1146_v57 = vpack.i.b16 %v1145_v51, %v1144_v48  ;;  %v1162_v58 = vpack.i.b16 %v1161_v52, %v1160_v50 }
 0x490   : > { %1453 = vadd.xlane.f32.xlu1 %v1452_v28  ;;  %v1172_v0 = vcombine.low %v1142_v60, %v1158_v45  ;;  %v1189_v1 = vcombine.low %v1138_v59, %v1154_v61  ;;  %v1171_v6 = vrot.slane %v1164_v2, %v3367_v32 }
 0x491   : > { %v1197_v63 = vcombine.low %v1146_v57, %v1162_v58 }
 0x492   : > { %v1179_v4 = vrot.slane %v1172_v0, %v3367_v32  ;;  %v1196_v5 = vrot.slane %v1189_v1, %v3367_v32 }
 0x493   : > { %v1204_v3 = vrot.slane %v1197_v63, %v3367_v32 }
 0x494   : > { %v1180_v8 = vcombine.low %v1171_v6, %v1179_v4 }
 0x495   : > { %v1205_v7 = vcombine.low %v1196_v5, %v1204_v3 }
 0x496   : > { %v1187_v10 = vrot.slane %v1180_v8, %v3377_v38 }
 0x497   : > { %v1212_v9 = vrot.slane %v1205_v7, %v3377_v38 }
 0x498   : > { %v1218_v23 = vshrl.u32 %v1187_v10, 16  ;;  %v1188_v15 = vcombine.high %v1187_v10, %v3082_v49 }
 0x499   : > { %v1219_v12 = vshrl.u32 %v1212_v9, 16  ;;  %v1213_v14 = vcombine.high %v1212_v9, %v3082_v49  ;;  %v1216_v22 = vpack.i.b16 %v1212_v9, %v1187_v10 }
 0x49a   : > { %v1226_v21 = vshrl.u32 %v1188_v15, 16 }
 0x49b   : > { %v1220_v16 = vpack.i.b16 %v1219_v12, %v1218_v23  ;;  %v1227_v17 = vshrl.u32 %v1213_v14, 16  ;;  %v1224_v20 = vpack.i.b16 %v1213_v14, %v1188_v15 }
 0x49d   : > { %v1228_v26 = vpack.i.b16 %v1227_v17, %v1226_v21  ;;  %v2768_v17 = vld [vmem:[%s3649_s5 + $0x8] sm:$0xff]  }
 0x4bb   : > { %1467 = vxpose.xlu0.c.b16.start.end [1/1] (short) (narrow) %v1216_v22, 16 }
 0x4bd   : > { %1529 = vxpose.xlu1.c.b16.start.end [1/1] (short) (narrow) %v1220_v16, 16 }
 0x4bf   : > { %1591 = vxpose.xlu0.c.b16.start.end [1/1] (short) (narrow) %v1224_v20, 16 }
 0x4c1   : > { %1653 = vxpose.xlu1.c.b16.start.end [1/1] (short) (narrow) %v1228_v26, 16 }
 0x50f   : > { %v1445_v27 = vpop.xlane.xlu1 %1444 }
 0x510   : > { %2784 = vrcp.f32 %v1445_v27 }
 0x511   : > { %v1448_v28 = vpop.xlane.xlu0 %1447 }
 0x512   : > { %2786 = vrcp.f32 %v1448_v28 }
 0x517   : > { %v1451_v29 = vpop.xlane.xlu0 %1450 }
 0x518   : > { %2788 = vrcp.f32 %v1451_v29 }
 0x519   : > { %v1454_v30 = vpop.xlane.xlu1 %1453 }
 0x51a   : > { %2790 = vrcp.f32 %v1454_v30 }
 0x51d   : > { %v2785_v31 = vpop.eup %2784  ;;  %v1475_v43 = vpop.trf.xlu0 }
 0x51e   : > { %v1459_v49 = vmul.f32 %v2785_v31, %v3463_v19 }
 0x51f   : > { %v2787_v33 = vpop.eup %2786  ;;  %v1537_v47 = vpop.trf.xlu1 }
 0x520   : > { %v1463_v34 = vpack.c.bf16 %v1459_v49, %v1459_v49  ;;  %v1460_v35 = vmul.f32 %v2787_v33, %v3467_v24  ;;  %v2769_v49 = vld [vmem:[%s3649_s5] sm:$0xff]  }
 0x522   : > { %v1487_v36 = vsel %vm1230_vm5, %v1463_v34, 0  ;;  %v1464_v37 = vpack.c.bf16 %v1460_v35, %v1460_v35 }
 0x523   : > { %2565 = vmatpush3.bf16.xpose.msra.mxu1 %v1487_v36 }
 0x524   : > { %2576 = vmatprep.subr.bf16.mxu1 %v3074_v11  ;;  %v1549_v40 = vsel %vm1230_vm5, %v1464_v37, 0 }
 0x525   : > { %v2789_v39 = vpop.eup %2788  ;;  %2571 = vmatpush3.bf16.xpose.msra.mxu0 %v1549_v40 }
 0x526   : > { %v1461_v41 = vmul.f32 %v2789_v39, %v3471_v18  ;;  %2582 = vmatprep.subr.bf16.mxu0 %v3074_v11  ;;  %v1599_v18 = vpop.trf.xlu0 }
 0x527   : > { %v2791_v42 = vpop.eup %2790 }
 0x528   : > { %v1465_v19 = vpack.c.bf16 %v1461_v41, %v1461_v41  ;;  %v1462_v44 = vmul.f32 %v2791_v42, %v3475_v25  ;;  %v1661_v25 = vpop.trf.xlu1 }
 0x52a   : > { %2567 = vmatmul.mubr.msk.bf16.vlgmr.msra.gmra.mxu1 %vm1230_vm5, %v1475_v43  ;;  %v1611_v24 = vsel %vm1230_vm5, %v1465_v19, 0  ;;  %v1466_v48 = vpack.c.bf16 %v1462_v44, %v1462_v44 }
 0x52b   : > { %2577 = vmatpush3.bf16.xpose.msra.mxu1 %v1611_v24  ;;  %2578 = vmatprep.mubr.msk.bf16.mxu1 %vm3075_vm3, %v3074_v11 }
 0x52c   : > { %v1673_v50 = vsel %vm1230_vm5, %v1466_v48, 0  ;;  %2588 = vmatprep.subr.bf16.mxu1 %v3074_v11  ;;  %2573 = vmatmul.mubr.msk.bf16.vlgmr.msra.gmra.mxu0 %vm1230_vm5, %v1537_v47 }
 0x52d   : > { %2583 = vmatpush3.bf16.xpose.msra.mxu0 %v1673_v50  ;;  %2584 = vmatprep.mubr.msk.bf16.mxu0 %vm3075_vm3, %v3074_v11 }
 0x52e   : > { %2596 = vmatprep.subr.bf16.mxu0 %v3074_v11 }
 0x532   : > { %2579 = vmatmul.mubr.msk.bf16.vlgmr.msra.gmra.mxu1 %vm1230_vm5, %v1599_v18 }
 0x533   : > { %2592 = vmatprep.mubr.msk.bf16.mxu1 %vm3075_vm3, %v3074_v11  ;;  %2589 = vmatpush3.bf16.msra.mxu1 %v2768_v17 }
 0x534   : > { %2585 = vmatmul.mubr.msk.bf16.vlgmr.msra.gmra.mxu0 %vm1230_vm5, %v1661_v25  ;;  %2590 = vmatprep.subr.bf16.mxu1 %v3074_v11 }
 0x535   : > { %2600 = vmatprep.mubr.msk.bf16.mxu0 %vm3075_vm3, %v3074_v11 }
 0x537   : > { %2591 = vmatpush3.bf16.msra.mxu1 %v2769_v49 }
 0x538   : > { %2604 = vmatprep.subr.bf16.mxu1 %v3074_v11 }
 0x5ea   : > { %v1523_v51 = vpop.f32.mrf.mxu1 }
 0x5eb   : > { %1715 = vxpose.xlu0.b32.start.end [1/1] (short) (narrow) %v1523_v51, 8 }
 0x5ec   : > { %v2568_v52 = vpop.f32.mrf.mxu1  ;;  %v1585_v53 = vpop.f32.mrf.mxu0 }
 0x5ed   : > { %1747 = vxpose.xlu1.b32.start.end [1/1] (short) (narrow) %v1585_v53, 8 }
 0x5ee   : > { %v1526_v54 = vpop.f32.mrf.mxu1  ;;  %v2574_v55 = vpop.f32.mrf.mxu0 }
 0x5ef   : > { %v2471_v54 = vld [vmem:[#allocation9] ss:$0 sm:$0xff] }
 0x5f0   : > { %v2569_v56 = vpop.f32.mrf.mxu1  ;;  %v1588_v57 = vpop.f32.mrf.mxu0 }
 0x5f2   : > { %v1647_v58 = vpop.f32.mrf.mxu1  ;;  %v2575_v59 = vpop.f32.mrf.mxu0 }
 0x5f3   : > { %1779 = vxpose.xlu0.b32.start.end [1/1] (short) (narrow) %v1647_v58, 8 }
 0x5f4   : > { %v2580_v60 = vpop.f32.mrf.mxu1  ;;  %v1709_v61 = vpop.f32.mrf.mxu0 }
 0x5f6   : > { %v1650_v45 = vpop.f32.mrf.mxu1  ;;  %v2586_v46 = vpop.f32.mrf.mxu0 }
 0x5f7   : > { %1811 = vxpose.xlu0.b32.start.end [1/1] (short) (narrow) %v1709_v61, 8 }
 0x5f8   : > { %v2581_v62 = vpop.f32.mrf.mxu1  ;;  %v1712_v63 = vpop.f32.mrf.mxu0 }
 0x5fa   : > { %v2587_v0 = vpop.f32.mrf.mxu0 }
 0x667   : > { %v1731_v1 = vpop.trf.xlu0 }
 0x669   : > { %v1763_v3 = vpop.trf.xlu1 }
 0x66f   : > { %v1795_v2 = vpop.trf.xlu0 }
 0x670   : > { %v1843_v4 = vcombine.low %v1731_v1, %v1795_v2  ;;  %v1844_v5 = vcombine.high %v1731_v1, %v1795_v2  ;;  %v2770_v1 = vld [vmem:[%s3653_s9 + $0x8] sm:$0xff]  }
 0x671   : > { %2597 = vmatpush3.bf16.msra.mxu0 %v2770_v1 }
 0x672   : > { %v1851_v9 = vrot.slane %v1843_v4, %v3367_v32  ;;  %v1858_v10 = vrot.slane %v1844_v5, %v3367_v32  ;;  %2598 = vmatprep.subr.bf16.mxu0 %v3074_v11 }
 0x673   : > { %v1827_v6 = vpop.trf.xlu0 }
 0x674   : > { %v1859_v7 = vcombine.low %v1763_v3, %v1827_v6  ;;  %v1860_v8 = vcombine.high %v1763_v3, %v1827_v6  ;;  %v2475_v6 = vld [vmem:[#allocation11] ss:$0 sm:$0xff] }
 0x676   : > { %v1867_v12 = vrot.slane %v1859_v7, %v3367_v32  ;;  %v1874_v14 = vrot.slane %v1860_v8, %v3367_v32  ;;  %v2476_v8 = vld [vmem:[#allocation12] ss:$0 sm:$0xff] }
 0x678   : > { %v1875_v22 = vcombine.low %v1851_v9, %v1867_v12  ;;  %v1876_v23 = vcombine.high %v1851_v9, %v1867_v12  ;;  %v1891_v15 = vcombine.low %v1858_v10, %v1874_v14  ;;  %v1892_v16 = vcombine.high %v1858_v10, %v1874_v14  ;;  %v2772_v14 = vld [vmem:[%s3655_s11 + $0x18] sm:$0xff]  }
 0x67a   : > { %v1883_v20 = vrot.slane %v1875_v22, %v3377_v38  ;;  %v1890_v21 = vrot.slane %v1876_v23, %v3377_v38  ;;  %v1899_v26 = vrot.slane %v1891_v15, %v3377_v38  ;;  %v1906_v27 = vrot.slane %v1892_v16, %v3377_v38  ;;  %v2773_v22 = vld [vmem:[%s3655_s11 + $0x10] sm:$0xff]   ;;  %v2774_v23 = vld [vmem:[%s3655_s11 + $0x8] sm:$0xff]   ;;  %v2775_v15 = vld [vmem:[%s3655_s11] sm:$0xff]  }
 0x67b   : > { %v2477_v16 = vld [vmem:[%s3654_s10] ss:$0 sm:$0xff] }
 0x67c   : > { %v1911_v28 = vcombine.low %v1883_v20, %v1890_v21  ;;  %v2469_v29 = vcombine.high %v1883_v20, %v1890_v21  ;;  %v1927_v30 = vcombine.low %v1899_v26, %v1906_v27  ;;  %v2470_v31 = vcombine.high %v1899_v26, %v1906_v27 }
 0x67e   : > { %v1918_v33 = vrot.slane %v1911_v28, %v3367_v32  ;;  %v1926_v34 = vrot.slane %v2469_v29, %v3367_v32  ;;  %v1934_v35 = vrot.slane %v1927_v30, %v3367_v32  ;;  %v1942_v36 = vrot.slane %v2470_v31, %v3367_v32 }
 0x680   : > { %v1944_v37 = vcombine.high %v1918_v33, %v1926_v34  ;;  %v1960_v39 = vcombine.high %v1934_v35, %v1942_v36  ;;  %v1943_v40 = vcombine.low %v1918_v33, %v1926_v34  ;;  %v1959_v41 = vcombine.low %v1934_v35, %v1942_v36 }
 0x682   : > { %v1958_v42 = vrot.slane %v1944_v37, %v3377_v38  ;;  %v1974_v43 = vrot.slane %v1960_v39, %v3377_v38  ;;  %v1951_v19 = vrot.slane %v1943_v40, %v3377_v38  ;;  %v1967_v44 = vrot.slane %v1959_v41, %v3377_v38  ;;  %v2481_v37 = vld [vmem:[%s3656_s12] ss:$0 sm:$0xff] }
 0x684   : > { %v1977_v24 = vcombine.low %v1958_v42, %v1974_v43  ;;  %v1976_v47 = vcombine.high %v1951_v19, %v1967_v44  ;;  %v1975_v48 = vcombine.low %v1951_v19, %v1967_v44  ;;  %v1978_v32 = vcombine.high %v1958_v42, %v1974_v43 }
 0x686   : > { %1984 = vrot.lane.b32.xlu0 %v1977_v24, %s3084_s28  ;;  %1980 = vrot.lane.b32.xlu1 %v1976_v47, %s3085_s30 }
 0x68a   : > { %1988 = vrot.lane.b32.xlu1 %v1978_v32, %s3086_s15 }
 0x6f8   : > { %v1981_v50 = vpop.permute.xlu1 %1980  ;;  %v1985_v18 = vpop.permute.xlu0 %1984 }
 0x6f9   : > { %v1991_v25 = vsel %vm1230_vm5, %v1975_v48, %v1981_v50 }
 0x6fa   : > { %v1993_v52 = vsel %vm1992_vm6, %v1991_v25, %v1985_v18 }
 0x6fc   : > { %v1989_v51 = vpop.permute.xlu1 %1988 }
 0x6fd   : > { %v1995_v53 = vsel %vm1994_vm7, %v1993_v52, %v1989_v51 }
 0x6fe   : > { %v1996_v38 = vpack.c.bf16 %v1995_v53, %v1995_v53  ;;  %v2487_v53 = vld [vmem:[%s3657_s13] ss:$0 sm:$0xff] }
 0x700   : > { %2593 = vmatmul.mubr.msk.bf16.vlgmr.msra.gmra.mxu1 %vm673_vm4, %v1996_v38 }
 0x701   : > { %2612 = vmatprep.mubr.msk.bf16.mxu1 %vm3075_vm3, %v3074_v11  ;;  %2605 = vmatpush3.bf16.msra.mxu1 %v2772_v14 }
 0x702   : > { %2606 = vmatprep.subr.bf16.mxu1 %v3074_v11 }
 0x705   : > { %2607 = vmatpush3.bf16.msra.mxu1 %v2773_v22 }
 0x706   : > { %2608 = vmatprep.subr.bf16.mxu1 %v3074_v11 }
 0x709   : > { %2609 = vmatpush3.bf16.msra.mxu1 %v2774_v23 }
 0x70a   : > { %2610 = vmatprep.subr.bf16.mxu1 %v3074_v11 }
 0x70d   : > { %2611 = vmatpush3.bf16.msra.mxu1 %v2775_v15 }
 0x7c0   : > { %v2057_v55 = vpop.f32.mrf.mxu1 }
 0x7c1   : > { %v2058_v56 = vadd.f32 %v2471_v54, %v2057_v55  ;;  %v2488_v54 = vld [vmem:[%s3658_s14] ss:$0 sm:$0xff] }
 0x7c2   : > { %v2594_v57 = vpop.f32.mrf.mxu1 }
 0x7c3   : > { %v2063_v58 = vadd.f32 %v2058_v56, %v3341_v13  ;;  %v2771_v13 = vld [vmem:[%s3653_s9] sm:$0xff]  }
 0x7c4   : > { %v2060_v59 = vpop.f32.mrf.mxu1  ;;  %2599 = vmatpush3.bf16.msra.mxu0 %v2771_v13 }
 0x7c5   : > { %v2066_v60 = vsel %vm673_vm4, %v2063_v58, 0.0 }
 0x7c6   : > { %2067 = vadd.xlane.f32.xlu1 %v2066_v60  ;;  %v2595_v61 = vpop.f32.mrf.mxu1 }
 0x84f   : > { %v2068_v45 = vpop.xlane.xlu1 %2067 }
 0x850   : > { %v2070_v46 = vmul.f32 0.03125, %v2068_v45 }
 0x852   : > { %v2071_v62 = vsub.f32 %v2063_v58, %v2070_v46 }
 0x854   : > { %v2072_v63 = vmul.f32 %v2071_v62, %v2071_v62 }
 0x856   : > { %v2073_v0 = vsel %vm673_vm4, %v2072_v63, 0.0 }
 0x857   : > { %2074 = vadd.xlane.f32.xlu0 %v2073_v0 }
 0x8e0   : > { %v2075_v2 = vpop.xlane.xlu0 %2074 }
 0x8e1   : > { %v2076_v3 = vmul.f32 0.03125, %v2075_v2 }
 0x8e3   : > { %v2077_v4 = vadd.f32 1e-12, %v2076_v3 }
 0x8e5   : > { %2792 = vrsqrt.f32 %v2077_v4 }
 0x8f2   : > { %v2793_v5 = vpop.eup %2792 }
 0x8f3   : > { %v2079_v7 = vmul.f32 %v2793_v5, %v2071_v62 }
 0x8f5   : > { %v2086_v9 = vmul.f32 %v2475_v6, %v2079_v7 }
 0x8f7   : > { %v2093_v10 = vadd.f32 %v2476_v8, %v2086_v9 }
 0x8f9   : > { %v2094_v12 = vpack.c.bf16 %v2093_v10, %v2093_v10 }
 0x8fb   : > { %2601 = vmatmul.mubr.msk.bf16.vlgmr.msra.gmra.mxu0 %vm673_vm4, %v2094_v12 }
 0x9bb   : > { %v2155_v17 = vpop.f32.mrf.mxu0 }
 0x9bc   : > { %v2156_v20 = vadd.f32 %v2477_v16, %v2155_v17 }
 0x9bd   : > { %v2602_v21 = vpop.f32.mrf.mxu0 }
 0x9be   : > { %v2162_v26 = vmul.f32 0.044715, %v2156_v20  ;;  %v2161_v34 = vmul.f32 0.5, %v2156_v20 }
 0x9bf   : > { %v2158_v27 = vpop.f32.mrf.mxu0 }
 0x9c0   : > { %v2163_v28 = vmul.f32 %v2162_v26, %v2156_v20 }
 0x9c1   : > { %v2603_v29 = vpop.f32.mrf.mxu0 }
 0x9c2   : > { %v2164_v30 = vmul.f32 %v2163_v28, %v2156_v20 }
 0x9c4   : > { %v2165_v31 = vadd.f32 %v2164_v30, %v2156_v20 }
 0x9c6   : > { %v2166_v49 = vmul.f32 0.7978846, %v2165_v31 }
 0x9c8   : > { %2794 = vtanh.f32 %v2166_v49 }
 0x9d5   : > { %v2795_v33 = vpop.eup %2794 }
 0x9d6   : > { %v2168_v35 = vadd.f32 1.0, %v2795_v33 }
 0x9d8   : > { %v2169_v11 = vmul.f32 %v2168_v35, %v2161_v34 }
 0x9da   : > { %v2170_v36 = vpack.c.bf16 %v2169_v11, %v2169_v11 }
 0x9dc   : > { %2613 = vmatmul.mubr.msk.bf16.vlgmr.msra.gmra.mxu1 %vm2210_vm8, %v2170_v36 }
 0xa9c   : > { %v2248_v39 = vpop.f32.mrf.mxu1 }
 0xa9d   : > { %v2249_v40 = vadd.f32 %v2481_v37, %v2248_v39 }
 0xa9e   : > { %v2614_v41 = vpop.f32.mrf.mxu1 }
 0xa9f   : > { %v2254_v42 = vadd.f32 %v2249_v40, %v2093_v10 }
 0xaa0   : > { %v2251_v43 = vpop.f32.mrf.mxu1 }
 0xaa1   : > { %v2257_v19 = vsel %vm673_vm4, %v2254_v42, 0.0 }
 0xaa2   : > { %2258 = vadd.xlane.f32.xlu1 %v2257_v19  ;;  %v2615_v44 = vpop.f32.mrf.mxu1 }
 0xb2b   : > { %v2259_v24 = vpop.xlane.xlu1 %2258 }
 0xb2c   : > { %v2260_v47 = vmul.f32 0.03125, %v2259_v24 }
 0xb2e   : > { %v2261_v48 = vsub.f32 %v2254_v42, %v2260_v47 }
 0xb30   : > { %v2262_v32 = vmul.f32 %v2261_v48, %v2261_v48 }
 0xb32   : > { %v2263_v50 = vsel %vm673_vm4, %v2262_v32, 0.0 }
 0xb33   : > { %2264 = vadd.xlane.f32.xlu0 %v2263_v50 }
 0xbbc   : > { %v2265_v18 = vpop.xlane.xlu0 %2264 }
 0xbbd   : > { %v2266_v25 = vmul.f32 0.03125, %v2265_v18 }
 0xbbf   : > { %v2267_v51 = vadd.f32 1e-12, %v2266_v25 }
 0xbc1   : > { %2796 = vrsqrt.f32 %v2267_v51 }
 0xbce   : > { %v2797_v52 = vpop.eup %2796 }
 0xbcf   : > { %v2269_v38 = vmul.f32 %v2797_v52, %v2261_v48 }
 0xbd1   : > { %v2276_v55 = vmul.f32 %v2487_v53, %v2269_v38  ;;  %2288 = sbr.rel (%p2489_p13) target bundleno = 3031 (0xbd7), region = 112 }
 0xbd3   : > { %v2283_v56 = vadd.f32 %v2488_v54, %v2276_v55 }
 0xbd5   : > { %2284 = vst.msk [vmem:[#allocation2] sm:$0xff] %vm673_vm4, %v2283_v56 }
 0xbd6   : > { %2289 = vst.msk [vmem:[%s575_s24] sm:$0xff] %vm673_vm4, %v2283_v56 }
 0xbd7 PF: > { %s3698_s27 = sld [smem:[#allocation26_spill]]  ;;  %s2491_s28 = sshll.u32 %s3050_s22, 7 }
 0xbd8   : > { %s3699_s17 = sld [smem:[#allocation32_spill]]  ;;  %s2304_s18 = sshll.u32 %s575_s24, 4  ;;  %s2305_s18 = int_to_ptr.vmem [resolvable:$true] %s2304_s18 }
 0xbd9   : > { %s2291_s21 = scalar_lea.sflag [#allocation5], %s573_s6  ;;  %s2954_s25 = scalar_lea.vmem %s2305_s18, 128 }
 0xbda   : > { %p2955_p12 = scmp.ne.s32.totalorder %s2305_s18, %s2954_s25  ;;  %s3087_s26 = smov [#allocation14]  }
 0xbdb   : > { %s2958_s2 = sshll.u32 %s3087_s26, 4  ;;  %s2959_s2 = int_to_ptr.vmem [resolvable:$false] %s2958_s2 }
 0xbdc   : > { %s2960_s20 = scalar_lea.vmem %s2959_s2, 256  ;;  %p2961_p5 = scmp.lt.s32.totalorder %s2305_s18, %s2959_s2 }
 0xbdd   : > { %p3700_p2 = scmp.ne.s32.totalorder %s3698_s27, 0  ;;  %p2962_p9 = scmp.lt.s32.totalorder %s2960_s20, %s2954_s25 }
 0xbde   : > { %s2302_s29 = scalar_lea.hbm %s3699_s17, %s2491_s28 }
 0xbdf   : > { %p2956_p4 = pnand %p2955_p12, %p3700_p2  ;;  %p2963_p7 = por %p2962_p9, %p2961_p5 }
 0xbe1   : > { %p2957_p6 = pneg %p2956_p4 }
 0xbe3   : > { %p2964_p8 = pnand %p2963_p7, %p2957_p6 }
 0xbe5   : > { %2967 = shalt.err (!%p2964_p8)
}
 0xbe6   : > { %s2968_s22 = scalar_lea.hbm %s2302_s29, 128  ;;  %s2972_s24 = scalar_lea.hbm %s3699_s17, 256 }
 0xbe7   : > { %p2969_p10 = scmp.ne.s32.totalorder %s2302_s29, %s2968_s22  ;;  %p2973_p0 = scmp.lt.s32.totalorder %s2302_s29, %s3699_s17 }
 0xbe8   : > { %p2974_p1 = scmp.lt.s32.totalorder %s2972_s24, %s2968_s22 }
 0xbe9   : > { %p2970_p11 = pnand %p2969_p10, %p3700_p2 }
 0xbea   : > { %p2975_p13 = por %p2974_p1, %p2973_p0 }
 0xbeb   : > { %p2971_p3 = pneg %p2970_p11 }
 0xbed   : > { %p2976_p12 = pnand %p2975_p13, %p2971_p3 }
 0xbef   : > { %2979 = shalt.err (!%p2976_p12)
}
 0xbf0   : > { %2640 = dma.vmem_to_hbm [thread:$0]  (%p3700_p2), %s2305_s18, 128, %s2302_s29, %s2291_s21  }
 0xbf1 PF: > { %s3701_s30 = sld [smem:[#allocation24_spill]] }
 0xbf2   : > { %s3702_s15 = sld [smem:[#allocation20_spill]] }
 0xbf3   : > { %s3703_s25 = sld [smem:[#allocation28_spill]] }
 0xbf7   : > { %p2677_p4 = scmp.ge.s32.totalorder %s3701_s30, 2 }
 0xbf8   : > { %s2316_s26 = sand.u32 1, %s3702_s15  }
 0xbf9   : > { %p3704_p6 = scmp.ne.s32.totalorder %s3703_s25, 0  ;;  %s2317_s2 = scalar_lea.sflag [#allocation5], %s2316_s26 }
 0xbfb   : > { %p2662_p5 = pnand %p2677_p4, %p3704_p6 }
 0xbfd   : > { %p2663_p9 = pneg %p2662_p5 }
 0xbff   : > { %3029 = dma.done.wait (%p2663_p9), %s2317_s2, 128  }
 0xc00   : > { %3031 = vsyncadd (%p2663_p9), %s2317_s2, 4294967168  ;;  %s32_s25 = sadd.s32 1, %s3701_s30   ;;  %s3705_s20 = sld [smem:[#allocation21_spill]] }
 0xc01   : > { %p29_p7 = scmp.ge.s32.totalorder %s32_s25, 6   ;;  %s3706_s22 = sld [smem:[#allocation29_spill]] }
 0xc02   : > { %s3707_s21 = sld [smem:[#allocation22_spill]]  ;;  %s3711_s18 = smov %s3038_s19 }
 0xc03   : > { %s3708_s27 = sld [smem:[#allocation23_spill]] }
 0xc04   : > { %s3709_s23 = sld [smem:[#allocation25_spill]] }
 0xc05   : > { %s3710_s24 = sld [smem:[#allocation27_spill]]  ;;  %31 = sbr.rel (!%p29_p7) target bundleno = 13 (0xd), region = 148 }
 0xc06   : > { %s3712_s19 = smov %s3705_s20 }
 0xc07   : > { %s3713_s20 = smov %s3706_s22 }
 0xc09   : > { %s3714_s22 = smov %s3708_s27 }
 0xc0a   :  { %2322 = vsyncpa [#allocation4], 1 }
 0xc0b   :  { %2324 = vsyncpa [#allocation4 + $0x1], 1 }
 0xc0c   :  { %2325 = vsyncpa [#allocation7], 1 }
 0xc0d   :  { %2326 = vsyncpa [#allocation10], 1 }
 0xc0e   :  { %2327 = vsyncpa [#allocation13], 1 }
 0xc0f   :  { %2328 = vsyncpa [#allocation5], 1 }
 0xc10   :  { %2330 = vsyncpa [#allocation5 + $0x1], 1 }

</bundles_post_ra>
